<compile_context>
chip_gen: v7x
topology: tpu7x:2x2x1
jax: 0.10.0
libtpu: 0.0.40
codegen_flags: <defaults>
</compile_context>

<pallas_src>
import functools

import jax
import jax.numpy as jnp
from jax.experimental import pallas as pl
from jax.experimental.pallas import tpu as pltpu

BN_EPS = 1e-5


def _pick_chunk(rows):
    """Largest row-chunk <= 128 that divides `rows` (prefer multiples of 16)."""
    for step in (16, 8):
        for c in range(min(rows, 128) // step * step, 0, -step):
            if rows % c == 0:
                return c
    return rows


# ------------------------------ Pallas kernel -------------------------------

def _convlstm_kernel(xh_ref, c_ref, w_ref, b_ref, ho_ref, co_ref, *,
                     wp, chunk, n_chunks, c_hid, n_img):
    """ConvLSTM cell for the `n_img` images of one grid step.

    xh_ref: (n_img, Rp, Cpad)   bf16  zero-padded [x|h|0] slab, rows = flat (H+3, W+2)
    c_ref : (n_img, R, C)       f32   cell state on the padded-width (H, W+2) grid
    w_ref : (9*Cpad, 4*C)       bf16  BN-folded conv weights, tap-major, gates [i|f|o|g]
                                       (i/f/o columns pre-scaled by 0.5)
    b_ref : (1, 4*C)            f32   folded BN shifts (i/f/o pre-scaled by 0.5)
    ho_ref: (n_img, R, C)       bf16  h_t
    co_ref: (n_img, R, C)       f32   c_t
    """
    C = c_hid
    offs = tuple(dy * wp + dx for dy in range(3) for dx in range(3))

    for b in range(n_img):
        for ck in range(n_chunks):
            r0 = ck * chunk
            # im2col for this row-chunk: 9 contiguous row windows of the padded
            # slab, concatenated on the lane axis -> (chunk, 9*Cpad).  Reads
            # are ref slices; nothing bigger than a chunk is materialized.
            cols = jnp.concatenate(
                [xh_ref[b, r0 + o:r0 + o + chunk, :] for o in offs], axis=-1)
            # ONE MXU matmul: all 8 conv branches, all 4 gates, f32 accumulate.
            gates = jnp.dot(cols, w_ref[...],
                            preferred_element_type=jnp.float32) + b_ref[...]
            # One full-lane EUP pass.  i/f/o pre-activations are already scaled
            # by 0.5 in the weights, so sigmoid(z) == 0.5 * tanh(z/2) + 0.5.
            t = jnp.tanh(gates)
            sg = 0.5 * t[:, :3 * C] + 0.5
            i_t = sg[:, 0 * C:1 * C]
            f_t = sg[:, 1 * C:2 * C]
            o_t = sg[:, 2 * C:3 * C]
            g_t = t[:, 3 * C:4 * C]

            c_prev = c_ref[b, r0:r0 + chunk, :]
            c_new = f_t * c_prev + i_t * g_t
            h_new = o_t * jnp.tanh(c_new)

            co_ref[b, r0:r0 + chunk, :] = c_new
            ho_ref[b, r0:r0 + chunk, :] = h_new.astype(ho_ref.dtype)


# --------------------------- parameter preparation --------------------------

def _fold_bn(w, gamma, beta, mean, var):
    """Fold eval-mode BatchNorm2d into the (bias-free) conv preceding it."""
    s = gamma * jax.lax.rsqrt(var + BN_EPS)
    return w * s, beta - mean * s


def _fuse_params(p, cin, chid, cpad):
    """BN-folded, gate-stacked weights as one (9*cpad, 4*chid) matrix.

    Gate order [i, f, o, g]; i/f/o weights and shifts are pre-scaled by 0.5 so
    the kernel evaluates all four gates with a single tanh pass.
    """
    wx_l, wh_l, b_l = [], [], []
    for g, scale in (("i", 0.5), ("f", 0.5), ("o", 0.5), ("c", 1.0)):
        wxg, bxg = _fold_bn(p[f"W{g}x_w"], p[f"W{g}x_gamma"], p[f"W{g}x_beta"],
                            p[f"W{g}x_mean"], p[f"W{g}x_var"])
        whg, bhg = _fold_bn(p[f"W{g}h_w"], p[f"W{g}h_gamma"], p[f"W{g}h_beta"],
                            p[f"W{g}h_mean"], p[f"W{g}h_var"])
        wx_l.append(wxg * scale)
        wh_l.append(whg * scale)
        b_l.append((bxg + bhg) * scale)
    wx = jnp.concatenate(wx_l, axis=-1).reshape(9, cin, 4 * chid)
    wh = jnp.concatenate(wh_l, axis=-1).reshape(9, chid, 4 * chid)
    w = jnp.zeros((9, cpad, 4 * chid), jnp.float32)
    w = w.at[:, :cin, :].set(wx)
    w = w.at[:, cin:cin + chid, :].set(wh)
    w = w.reshape(9 * cpad, 4 * chid).astype(jnp.bfloat16)
    bias = jnp.concatenate(b_l).reshape(1, 4 * chid)
    return w, bias


# --------------------------------- wrapper -----------------------------------

def convlstm_cell_forward(x_nchw, h_nchw, c_nchw, params, images_per_step=None):
    """Pallas equivalent of ConvLSTMCell.forward(x, h, c) -> (h_t, c_t), NCHW."""
    x = jnp.transpose(x_nchw, (0, 2, 3, 1)).astype(jnp.float32)
    h = jnp.transpose(h_nchw, (0, 2, 3, 1)).astype(jnp.float32)
    c = jnp.transpose(c_nchw, (0, 2, 3, 1)).astype(jnp.float32)
    N, H, W, Cin = x.shape
    C = h.shape[-1]
    Cxh = Cin + C
    Cpad = -(-Cxh // 64) * 64       # 64-lane-aligned tap width for the im2col
    Wp = W + 2                      # padded / compute-grid width
    R = H * Wp                      # compute rows per image (2 junk cols/row)
    Rp = (H + 3) * Wp               # padded slab rows (1 top + 2 bottom rows)

    if images_per_step is None:
        # >=2 grid steps when possible (both v7x TensorCores busy) while folding
        # several images per step on larger batches (v5e/v6e amortization).
        images_per_step = next(
            (b for b in (4, 3, 2, 1) if N % b == 0 and N // b >= 2), 1)
    assert N % images_per_step == 0, "images_per_step must divide the batch"
    B = images_per_step

    chunk = _pick_chunk(R)
    n_chunks = R // chunk

    w, bias = _fuse_params(params, Cin, C, Cpad)

    # One fused [x | h | zeros] slab: merges the two input DMA streams and lets
    # a single matmul contract over both branches.  Zero-pad 1 row top / 2 rows
    # bottom / 1 col each side; activations go to bf16 for the MXU and DMA.
    xh = jnp.concatenate([x, h], axis=-1)
    xh = jnp.pad(xh, ((0, 0), (1, 2), (1, 1), (0, Cpad - Cxh)))
    xh = xh.reshape(N, Rp, Cpad).astype(jnp.bfloat16)
    # Cell state on the same padded-width grid (junk columns are zeros).
    cp = jnp.pad(c, ((0, 0), (0, 0), (0, 2), (0, 0))).reshape(N, R, C)

    kernel = functools.partial(_convlstm_kernel, wp=Wp, chunk=chunk,
                               n_chunks=n_chunks, c_hid=C, n_img=B)

    cost = pl.CostEstimate(
        flops=2 * N * R * (9 * Cpad) * (4 * C) + 12 * N * R * C,
        transcendentals=5 * N * R * C,
        bytes_accessed=(xh.size * 2 + cp.size * 4 + w.size * 2 + bias.size * 4
                        + N * R * C * (2 + 4)))

    grid_spec = pltpu.PrefetchScalarGridSpec(
        num_scalar_prefetch=0,
        grid=(N // B,),
        in_specs=[
            pl.BlockSpec((B, Rp, Cpad), lambda n: (n, 0, 0)),
            pl.BlockSpec((B, R, C), lambda n: (n, 0, 0)),
            pl.BlockSpec((9 * Cpad, 4 * C), lambda n: (0, 0)),
            pl.BlockSpec((1, 4 * C), lambda n: (0, 0)),
        ],
        out_specs=[
            pl.BlockSpec((B, R, C), lambda n: (n, 0, 0)),
            pl.BlockSpec((B, R, C), lambda n: (n, 0, 0)),
        ],
    )

    h_flat, c_flat = pl.pallas_call(
        kernel,
        out_shape=(jax.ShapeDtypeStruct((N, R, C), jnp.bfloat16),
                   jax.ShapeDtypeStruct((N, R, C), jnp.float32)),
        grid_spec=grid_spec,
        compiler_params=pltpu.CompilerParams(
            dimension_semantics=("parallel",),
            vmem_limit_bytes=32 * 1024 * 1024),
        cost_estimate=cost,
    )(xh, cp, w, bias)

    # Drop the 2 junk columns of the padded-width grid, back to NCHW / f32.
    h_t = h_flat.astype(jnp.float32).reshape(N, H, Wp, C)[:, :, :W, :]
    c_t = c_flat.reshape(N, H, Wp, C)[:, :, :W, :]
    return (jnp.transpose(h_t, (0, 3, 1, 2)),
            jnp.transpose(c_t, (0, 3, 1, 2)))


# ---------------------------- pure-JAX reference -----------------------------

def _reference_forward(x_nchw, h_nchw, c_nchw, params):
    """XLA-conv reference using the same bf16 rounding as the kernel path."""
    x = jnp.transpose(x_nchw, (0, 2, 3, 1)).astype(jnp.float32)
    h = jnp.transpose(h_nchw, (0, 2, 3, 1)).astype(jnp.float32)
    c = jnp.transpose(c_nchw, (0, 2, 3, 1)).astype(jnp.float32)
    xb = x.astype(jnp.bfloat16).astype(jnp.float32)
    hb = h.astype(jnp.bfloat16).astype(jnp.float32)

    def branch(src, g):
        w, b = _fold_bn(params[f"W{g}{src}_w"], params[f"W{g}{src}_gamma"],
                        params[f"W{g}{src}_beta"], params[f"W{g}{src}_mean"],
                        params[f"W{g}{src}_var"])
        w = w.astype(jnp.bfloat16).astype(jnp.float32)
        a = xb if src == "x" else hb
        out = jax.lax.conv_general_dilated(
            a, w, (1, 1), "SAME", dimension_numbers=("NHWC", "HWIO", "NHWC"))
        return out + b

    i_t = jax.nn.sigmoid(branch("x", "i") + branch("h", "i"))
    f_t = jax.nn.sigmoid(branch("x", "f") + branch("h", "f"))
    g_t = jnp.tanh(branch("x", "c") + branch("h", "c"))
    o_t = jax.nn.sigmoid(branch("x", "o") + branch("h", "o"))
    c_t = f_t * c + i_t * g_t
    h_t = o_t * jnp.tanh(c_t)
    return (jnp.transpose(h_t, (0, 3, 1, 2)),
            jnp.transpose(c_t, (0, 3, 1, 2)))


# --------------------------- deterministic params ----------------------------

def init_params(key, in_channels, hidden_channels):
    """Deterministic stand-ins for the 8 (Conv2d no-bias + BatchNorm2d) branches.

    Conv weights are stored HWIO (PyTorch stores OIHW; transpose if importing).
    """
    C = hidden_channels
    branches = [("i", "x", in_channels), ("i", "h", C),
                ("f", "x", in_channels), ("f", "h", C),
                ("c", "x", in_channels), ("c", "h", C),
                ("o", "x", in_channels), ("o", "h", C)]
    keys = iter(jax.random.split(key, len(branches) * 5))

    def nrm(shape, s=0.2):
        return s * jax.random.normal(next(keys), shape, jnp.float32)

    def pos(shape):
        return 0.5 + jax.random.uniform(next(keys), shape, jnp.float32)

    p = {}
    for g, src, cin in branches:
        p[f"W{g}{src}_w"] = nrm((3, 3, cin, C))
        p[f"W{g}{src}_gamma"] = 1.0 + nrm((C,), 0.1)
        p[f"W{g}{src}_beta"] = nrm((C,), 0.1)
        p[f"W{g}{src}_mean"] = nrm((C,), 0.1)
        p[f"W{g}{src}_var"] = pos((C,))
    return p


if __name__ == "__main__":
    key = jax.random.PRNGKey(0)
    kx, kh, kc, kp = jax.random.split(key, 4)
    N, Cin, Chid, H, W = 2, 4, 32, 16, 16
    x = jax.random.normal(kx, (N, Cin, H, W), jnp.float32)    # NCHW like PyTorch
    h = jax.random.normal(kh, (N, Chid, H, W), jnp.float32)
    c = jax.random.normal(kc, (N, Chid, H, W), jnp.float32)
    params = init_params(kp, Cin, Chid)

    fwd = jax.jit(convlstm_cell_forward, static_argnames=("images_per_step",))
    h_t, c_t = fwd(x, h, c, params)
    jax.block_until_ready((h_t, c_t))
    assert h_t.shape == (N, Chid, H, W) and c_t.shape == (N, Chid, H, W)
    assert h_t.dtype == jnp.float32 and c_t.dtype == jnp.float32

    h_ref, c_ref = _reference_forward(x, h, c, params)
    err = max(float(jnp.max(jnp.abs(h_t - h_ref))),
              float(jnp.max(jnp.abs(c_t - c_ref))))
    assert err < 2e-2, f"max abs error vs reference: {err}"

    # Also exercise the multi-image-per-step path (v5e/v6e-friendly batching).
    h_t2, c_t2 = fwd(x, h, c, params, images_per_step=2)
    jax.block_until_ready((h_t2, c_t2))
    err2 = max(float(jnp.max(jnp.abs(h_t2 - h_ref))),
               float(jnp.max(jnp.abs(c_t2 - c_ref))))
    assert err2 < 2e-2, f"max abs error vs reference (batched step): {err2}"

    print("KERNEL_OK")
</pallas_src>

<mosaic_0001>
module attributes {stable_mosaic.version = 11 : i64} {
  func.func @_convlstm_kernel(%arg0: i32, %arg1: memref<1x342x64xbf16, #tpu.memory_space<vmem>>, %arg2: memref<1x288x32xf32, #tpu.memory_space<vmem>>, %arg3: memref<576x128xbf16, #tpu.memory_space<vmem>>, %arg4: memref<1x128xf32, #tpu.memory_space<vmem>>, %arg5: memref<1x288x32xbf16, #tpu.memory_space<vmem>>, %arg6: memref<1x288x32xf32, #tpu.memory_space<vmem>>) attributes {dimension_semantics = [#tpu.dimension_semantics<parallel>], iteration_bounds = array<i64: 2>, scalar_prefetch = 0 : i64, scratch_operands = 0 : i64, tpu.core_type = #tpu.core_type<tc>, window_params = [{transform_indices = @transform_0, window_bounds = array<i64: 1, 342, 64>}, {transform_indices = @transform_1, window_bounds = array<i64: 1, 288, 32>}, {pipeline_mode = #tpu.pipeline_mode<synchronous>, transform_indices = @transform_2, window_bounds = array<i64: 576, 128>}, {pipeline_mode = #tpu.pipeline_mode<synchronous>, transform_indices = @transform_3, window_bounds = array<i64: 1, 128>}, {transform_indices = @transform_4, window_bounds = array<i64: 1, 288, 32>}, {transform_indices = @transform_5, window_bounds = array<i64: 1, 288, 32>}]} {
    %c0 = arith.constant 0 : index
    %c0_0 = arith.constant 0 : index
    %c0_1 = arith.constant 0 : index
    %0 = vector.load %arg1[%c0, %c0_0, %c0_1] : memref<1x342x64xbf16, #tpu.memory_space<vmem>>, vector<1x96x64xbf16>
    %1 = vector.shape_cast %0 : vector<1x96x64xbf16> to vector<96x64xbf16>
    %c0_2 = arith.constant 0 : index
    %c1 = arith.constant 1 : index
    %c0_3 = arith.constant 0 : index
    %2 = vector.load %arg1[%c0_2, %c1, %c0_3] : memref<1x342x64xbf16, #tpu.memory_space<vmem>>, vector<1x96x64xbf16>
    %3 = vector.shape_cast %2 : vector<1x96x64xbf16> to vector<96x64xbf16>
    %c0_4 = arith.constant 0 : index
    %c2 = arith.constant 2 : index
    %c0_5 = arith.constant 0 : index
    %4 = vector.load %arg1[%c0_4, %c2, %c0_5] : memref<1x342x64xbf16, #tpu.memory_space<vmem>>, vector<1x96x64xbf16>
    %5 = vector.shape_cast %4 : vector<1x96x64xbf16> to vector<96x64xbf16>
    %c0_6 = arith.constant 0 : index
    %c18 = arith.constant 18 : index
    %c0_7 = arith.constant 0 : index
    %6 = vector.load %arg1[%c0_6, %c18, %c0_7] : memref<1x342x64xbf16, #tpu.memory_space<vmem>>, vector<1x96x64xbf16>
    %7 = vector.shape_cast %6 : vector<1x96x64xbf16> to vector<96x64xbf16>
    %c0_8 = arith.constant 0 : index
    %c19 = arith.constant 19 : index
    %c0_9 = arith.constant 0 : index
    %8 = vector.load %arg1[%c0_8, %c19, %c0_9] : memref<1x342x64xbf16, #tpu.memory_space<vmem>>, vector<1x96x64xbf16>
    %9 = vector.shape_cast %8 : vector<1x96x64xbf16> to vector<96x64xbf16>
    %c0_10 = arith.constant 0 : index
    %c20 = arith.constant 20 : index
    %c0_11 = arith.constant 0 : index
    %10 = vector.load %arg1[%c0_10, %c20, %c0_11] : memref<1x342x64xbf16, #tpu.memory_space<vmem>>, vector<1x96x64xbf16>
    %11 = vector.shape_cast %10 : vector<1x96x64xbf16> to vector<96x64xbf16>
    %c0_12 = arith.constant 0 : index
    %c36 = arith.constant 36 : index
    %c0_13 = arith.constant 0 : index
    %12 = vector.load %arg1[%c0_12, %c36, %c0_13] : memref<1x342x64xbf16, #tpu.memory_space<vmem>>, vector<1x96x64xbf16>
    %13 = vector.shape_cast %12 : vector<1x96x64xbf16> to vector<96x64xbf16>
    %c0_14 = arith.constant 0 : index
    %c37 = arith.constant 37 : index
    %c0_15 = arith.constant 0 : index
    %14 = vector.load %arg1[%c0_14, %c37, %c0_15] : memref<1x342x64xbf16, #tpu.memory_space<vmem>>, vector<1x96x64xbf16>
    %15 = vector.shape_cast %14 : vector<1x96x64xbf16> to vector<96x64xbf16>
    %c0_16 = arith.constant 0 : index
    %c38 = arith.constant 38 : index
    %c0_17 = arith.constant 0 : index
    %16 = vector.load %arg1[%c0_16, %c38, %c0_17] : memref<1x342x64xbf16, #tpu.memory_space<vmem>>, vector<1x96x64xbf16>
    %17 = vector.shape_cast %16 : vector<1x96x64xbf16> to vector<96x64xbf16>
    %18 = tpu.concatenate %1, %3, %5, %7, %9, %11, %13, %15, %17 in 1 : vector<96x64xbf16>, vector<96x64xbf16>, vector<96x64xbf16>, vector<96x64xbf16>, vector<96x64xbf16>, vector<96x64xbf16>, vector<96x64xbf16>, vector<96x64xbf16>, vector<96x64xbf16> -> vector<96x576xbf16>
    %c0_18 = arith.constant 0 : index
    %c0_19 = arith.constant 0 : index
    %19 = vector.load %arg3[%c0_18, %c0_19] : memref<576x128xbf16, #tpu.memory_space<vmem>>, vector<576x128xbf16>
    %cst = arith.constant dense<0.000000e+00> : vector<96x128xf32>
    %20 = tpu.matmul %18, %19, %cst {dimension_numbers = #tpu.dot_dimension_numbers<[1], [0], [0], [1], [0, 0, 1, 1], [], []>} : vector<96x576xbf16>, vector<576x128xbf16>, vector<96x128xf32> -> vector<96x128xf32>
    %c0_20 = arith.constant 0 : index
    %c0_21 = arith.constant 0 : index
    %21 = vector.load %arg4[%c0_20, %c0_21] : memref<1x128xf32, #tpu.memory_space<vmem>>, vector<1x128xf32>
    %22 = vector.broadcast %21 : vector<1x128xf32> to vector<96x128xf32>
    %23 = arith.addf %20, %22 : vector<96x128xf32>
    %24 = math.tanh %23 : vector<96x128xf32>
    %25 = vector.extract_strided_slice %24 {offsets = [0, 0], sizes = [96, 96], strides = [1, 1]} : vector<96x128xf32> to vector<96x96xf32>
    %cst_22 = arith.constant 5.000000e-01 : f32
    %26 = vector.broadcast %cst_22 : f32 to vector<96x96xf32>
    %27 = arith.mulf %26, %25 : vector<96x96xf32>
    %cst_23 = arith.constant 5.000000e-01 : f32
    %28 = vector.broadcast %cst_23 : f32 to vector<96x96xf32>
    %29 = arith.addf %27, %28 : vector<96x96xf32>
    %30 = vector.extract_strided_slice %29 {offsets = [0, 0], sizes = [96, 32], strides = [1, 1]} : vector<96x96xf32> to vector<96x32xf32>
    %31 = vector.extract_strided_slice %29 {offsets = [0, 32], sizes = [96, 32], strides = [1, 1]} : vector<96x96xf32> to vector<96x32xf32>
    %32 = vector.extract_strided_slice %29 {offsets = [0, 64], sizes = [96, 32], strides = [1, 1]} : vector<96x96xf32> to vector<96x32xf32>
    %33 = vector.extract_strided_slice %24 {offsets = [0, 96], sizes = [96, 32], strides = [1, 1]} : vector<96x128xf32> to vector<96x32xf32>
    %c0_24 = arith.constant 0 : index
    %c0_25 = arith.constant 0 : index
    %c0_26 = arith.constant 0 : index
    %34 = vector.load %arg2[%c0_24, %c0_25, %c0_26] : memref<1x288x32xf32, #tpu.memory_space<vmem>>, vector<1x96x32xf32>
    %35 = vector.shape_cast %34 : vector<1x96x32xf32> to vector<96x32xf32>
    %36 = arith.mulf %31, %35 : vector<96x32xf32>
    %37 = arith.mulf %30, %33 : vector<96x32xf32>
    %38 = arith.addf %36, %37 : vector<96x32xf32>
    %39 = math.tanh %38 : vector<96x32xf32>
    %40 = arith.mulf %32, %39 : vector<96x32xf32>
    %c0_27 = arith.constant 0 : index
    %c0_28 = arith.constant 0 : index
    %c0_29 = arith.constant 0 : index
    %41 = vector.load %arg6[%c0_27, %c0_28, %c0_29] : memref<1x288x32xf32, #tpu.memory_space<vmem>>, vector<1x96x32xf32>
    %42 = vector.shape_cast %41 : vector<1x96x32xf32> to vector<96x32xf32>
    %43 = vector.shape_cast %38 : vector<96x32xf32> to vector<1x96x32xf32>
    tpu.vector_store %arg6[%c0_27, %c0_28, %c0_29], %43 {strides = array<i32>} : memref<1x288x32xf32, #tpu.memory_space<vmem>>, vector<1x96x32xf32>,
    %44 = arith.truncf %40 : vector<96x32xf32> to vector<96x32xbf16>
    %c0_30 = arith.constant 0 : index
    %c0_31 = arith.constant 0 : index
    %c0_32 = arith.constant 0 : index
    %45 = vector.load %arg5[%c0_30, %c0_31, %c0_32] : memref<1x288x32xbf16, #tpu.memory_space<vmem>>, vector<1x96x32xbf16>
    %46 = vector.shape_cast %45 : vector<1x96x32xbf16> to vector<96x32xbf16>
    %47 = vector.shape_cast %44 : vector<96x32xbf16> to vector<1x96x32xbf16>
    tpu.vector_store %arg5[%c0_30, %c0_31, %c0_32], %47 {strides = array<i32>} : memref<1x288x32xbf16, #tpu.memory_space<vmem>>, vector<1x96x32xbf16>,
    %c0_33 = arith.constant 0 : index
    %c96 = arith.constant 96 : index
    %c0_34 = arith.constant 0 : index
    %48 = vector.load %arg1[%c0_33, %c96, %c0_34] : memref<1x342x64xbf16, #tpu.memory_space<vmem>>, vector<1x96x64xbf16>
    %49 = vector.shape_cast %48 : vector<1x96x64xbf16> to vector<96x64xbf16>
    %c0_35 = arith.constant 0 : index
    %c97 = arith.constant 97 : index
    %c0_36 = arith.constant 0 : index
    %50 = vector.load %arg1[%c0_35, %c97, %c0_36] : memref<1x342x64xbf16, #tpu.memory_space<vmem>>, vector<1x96x64xbf16>
    %51 = vector.shape_cast %50 : vector<1x96x64xbf16> to vector<96x64xbf16>
    %c0_37 = arith.constant 0 : index
    %c98 = arith.constant 98 : index
    %c0_38 = arith.constant 0 : index
    %52 = vector.load %arg1[%c0_37, %c98, %c0_38] : memref<1x342x64xbf16, #tpu.memory_space<vmem>>, vector<1x96x64xbf16>
    %53 = vector.shape_cast %52 : vector<1x96x64xbf16> to vector<96x64xbf16>
    %c0_39 = arith.constant 0 : index
    %c114 = arith.constant 114 : index
    %c0_40 = arith.constant 0 : index
    %54 = vector.load %arg1[%c0_39, %c114, %c0_40] : memref<1x342x64xbf16, #tpu.memory_space<vmem>>, vector<1x96x64xbf16>
    %55 = vector.shape_cast %54 : vector<1x96x64xbf16> to vector<96x64xbf16>
    %c0_41 = arith.constant 0 : index
    %c115 = arith.constant 115 : index
    %c0_42 = arith.constant 0 : index
    %56 = vector.load %arg1[%c0_41, %c115, %c0_42] : memref<1x342x64xbf16, #tpu.memory_space<vmem>>, vector<1x96x64xbf16>
    %57 = vector.shape_cast %56 : vector<1x96x64xbf16> to vector<96x64xbf16>
    %c0_43 = arith.constant 0 : index
    %c116 = arith.constant 116 : index
    %c0_44 = arith.constant 0 : index
    %58 = vector.load %arg1[%c0_43, %c116, %c0_44] : memref<1x342x64xbf16, #tpu.memory_space<vmem>>, vector<1x96x64xbf16>
    %59 = vector.shape_cast %58 : vector<1x96x64xbf16> to vector<96x64xbf16>
    %c0_45 = arith.constant 0 : index
    %c132 = arith.constant 132 : index
    %c0_46 = arith.constant 0 : index
    %60 = vector.load %arg1[%c0_45, %c132, %c0_46] : memref<1x342x64xbf16, #tpu.memory_space<vmem>>, vector<1x96x64xbf16>
    %61 = vector.shape_cast %60 : vector<1x96x64xbf16> to vector<96x64xbf16>
    %c0_47 = arith.constant 0 : index
    %c133 = arith.constant 133 : index
    %c0_48 = arith.constant 0 : index
    %62 = vector.load %arg1[%c0_47, %c133, %c0_48] : memref<1x342x64xbf16, #tpu.memory_space<vmem>>, vector<1x96x64xbf16>
    %63 = vector.shape_cast %62 : vector<1x96x64xbf16> to vector<96x64xbf16>
    %c0_49 = arith.constant 0 : index
    %c134 = arith.constant 134 : index
    %c0_50 = arith.constant 0 : index
    %64 = vector.load %arg1[%c0_49, %c134, %c0_50] : memref<1x342x64xbf16, #tpu.memory_space<vmem>>, vector<1x96x64xbf16>
    %65 = vector.shape_cast %64 : vector<1x96x64xbf16> to vector<96x64xbf16>
    %66 = tpu.concatenate %49, %51, %53, %55, %57, %59, %61, %63, %65 in 1 : vector<96x64xbf16>, vector<96x64xbf16>, vector<96x64xbf16>, vector<96x64xbf16>, vector<96x64xbf16>, vector<96x64xbf16>, vector<96x64xbf16>, vector<96x64xbf16>, vector<96x64xbf16> -> vector<96x576xbf16>
    %c0_51 = arith.constant 0 : index
    %c0_52 = arith.constant 0 : index
    %67 = vector.load %arg3[%c0_51, %c0_52] : memref<576x128xbf16, #tpu.memory_space<vmem>>, vector<576x128xbf16>
    %cst_53 = arith.constant dense<0.000000e+00> : vector<96x128xf32>
    %68 = tpu.matmul %66, %67, %cst_53 {dimension_numbers = #tpu.dot_dimension_numbers<[1], [0], [0], [1], [0, 0, 1, 1], [], []>} : vector<96x576xbf16>, vector<576x128xbf16>, vector<96x128xf32> -> vector<96x128xf32>
    %c0_54 = arith.constant 0 : index
    %c0_55 = arith.constant 0 : index
    %69 = vector.load %arg4[%c0_54, %c0_55] : memref<1x128xf32, #tpu.memory_space<vmem>>, vector<1x128xf32>
    %70 = vector.broadcast %69 : vector<1x128xf32> to vector<96x128xf32>
    %71 = arith.addf %68, %70 : vector<96x128xf32>
    %72 = math.tanh %71 : vector<96x128xf32>
    %73 = vector.extract_strided_slice %72 {offsets = [0, 0], sizes = [96, 96], strides = [1, 1]} : vector<96x128xf32> to vector<96x96xf32>
    %cst_56 = arith.constant 5.000000e-01 : f32
    %74 = vector.broadcast %cst_56 : f32 to vector<96x96xf32>
    %75 = arith.mulf %74, %73 : vector<96x96xf32>
    %cst_57 = arith.constant 5.000000e-01 : f32
    %76 = vector.broadcast %cst_57 : f32 to vector<96x96xf32>
    %77 = arith.addf %75, %76 : vector<96x96xf32>
    %78 = vector.extract_strided_slice %77 {offsets = [0, 0], sizes = [96, 32], strides = [1, 1]} : vector<96x96xf32> to vector<96x32xf32>
    %79 = vector.extract_strided_slice %77 {offsets = [0, 32], sizes = [96, 32], strides = [1, 1]} : vector<96x96xf32> to vector<96x32xf32>
    %80 = vector.extract_strided_slice %77 {offsets = [0, 64], sizes = [96, 32], strides = [1, 1]} : vector<96x96xf32> to vector<96x32xf32>
    %81 = vector.extract_strided_slice %72 {offsets = [0, 96], sizes = [96, 32], strides = [1, 1]} : vector<96x128xf32> to vector<96x32xf32>
    %c0_58 = arith.constant 0 : index
    %c96_59 = arith.constant 96 : index
    %c0_60 = arith.constant 0 : index
    %82 = vector.load %arg2[%c0_58, %c96_59, %c0_60] : memref<1x288x32xf32, #tpu.memory_space<vmem>>, vector<1x96x32xf32>
    %83 = vector.shape_cast %82 : vector<1x96x32xf32> to vector<96x32xf32>
    %84 = arith.mulf %79, %83 : vector<96x32xf32>
    %85 = arith.mulf %78, %81 : vector<96x32xf32>
    %86 = arith.addf %84, %85 : vector<96x32xf32>
    %87 = math.tanh %86 : vector<96x32xf32>
    %88 = arith.mulf %80, %87 : vector<96x32xf32>
    %c0_61 = arith.constant 0 : index
    %c96_62 = arith.constant 96 : index
    %c0_63 = arith.constant 0 : index
    %89 = vector.load %arg6[%c0_61, %c96_62, %c0_63] : memref<1x288x32xf32, #tpu.memory_space<vmem>>, vector<1x96x32xf32>
    %90 = vector.shape_cast %89 : vector<1x96x32xf32> to vector<96x32xf32>
    %91 = vector.shape_cast %86 : vector<96x32xf32> to vector<1x96x32xf32>
    tpu.vector_store %arg6[%c0_61, %c96_62, %c0_63], %91 {strides = array<i32>} : memref<1x288x32xf32, #tpu.memory_space<vmem>>, vector<1x96x32xf32>,
    %92 = arith.truncf %88 : vector<96x32xf32> to vector<96x32xbf16>
    %c0_64 = arith.constant 0 : index
    %c96_65 = arith.constant 96 : index
    %c0_66 = arith.constant 0 : index
    %93 = vector.load %arg5[%c0_64, %c96_65, %c0_66] : memref<1x288x32xbf16, #tpu.memory_space<vmem>>, vector<1x96x32xbf16>
    %94 = vector.shape_cast %93 : vector<1x96x32xbf16> to vector<96x32xbf16>
    %95 = vector.shape_cast %92 : vector<96x32xbf16> to vector<1x96x32xbf16>
    tpu.vector_store %arg5[%c0_64, %c96_65, %c0_66], %95 {strides = array<i32>} : memref<1x288x32xbf16, #tpu.memory_space<vmem>>, vector<1x96x32xbf16>,
    %c0_67 = arith.constant 0 : index
    %c192 = arith.constant 192 : index
    %c0_68 = arith.constant 0 : index
    %96 = vector.load %arg1[%c0_67, %c192, %c0_68] : memref<1x342x64xbf16, #tpu.memory_space<vmem>>, vector<1x96x64xbf16>
    %97 = vector.shape_cast %96 : vector<1x96x64xbf16> to vector<96x64xbf16>
    %c0_69 = arith.constant 0 : index
    %c193 = arith.constant 193 : index
    %c0_70 = arith.constant 0 : index
    %98 = vector.load %arg1[%c0_69, %c193, %c0_70] : memref<1x342x64xbf16, #tpu.memory_space<vmem>>, vector<1x96x64xbf16>
    %99 = vector.shape_cast %98 : vector<1x96x64xbf16> to vector<96x64xbf16>
    %c0_71 = arith.constant 0 : index
    %c194 = arith.constant 194 : index
    %c0_72 = arith.constant 0 : index
    %100 = vector.load %arg1[%c0_71, %c194, %c0_72] : memref<1x342x64xbf16, #tpu.memory_space<vmem>>, vector<1x96x64xbf16>
    %101 = vector.shape_cast %100 : vector<1x96x64xbf16> to vector<96x64xbf16>
    %c0_73 = arith.constant 0 : index
    %c210 = arith.constant 210 : index
    %c0_74 = arith.constant 0 : index
    %102 = vector.load %arg1[%c0_73, %c210, %c0_74] : memref<1x342x64xbf16, #tpu.memory_space<vmem>>, vector<1x96x64xbf16>
    %103 = vector.shape_cast %102 : vector<1x96x64xbf16> to vector<96x64xbf16>
    %c0_75 = arith.constant 0 : index
    %c211 = arith.constant 211 : index
    %c0_76 = arith.constant 0 : index
    %104 = vector.load %arg1[%c0_75, %c211, %c0_76] : memref<1x342x64xbf16, #tpu.memory_space<vmem>>, vector<1x96x64xbf16>
    %105 = vector.shape_cast %104 : vector<1x96x64xbf16> to vector<96x64xbf16>
    %c0_77 = arith.constant 0 : index
    %c212 = arith.constant 212 : index
    %c0_78 = arith.constant 0 : index
    %106 = vector.load %arg1[%c0_77, %c212, %c0_78] : memref<1x342x64xbf16, #tpu.memory_space<vmem>>, vector<1x96x64xbf16>
    %107 = vector.shape_cast %106 : vector<1x96x64xbf16> to vector<96x64xbf16>
    %c0_79 = arith.constant 0 : index
    %c228 = arith.constant 228 : index
    %c0_80 = arith.constant 0 : index
    %108 = vector.load %arg1[%c0_79, %c228, %c0_80] : memref<1x342x64xbf16, #tpu.memory_space<vmem>>, vector<1x96x64xbf16>
    %109 = vector.shape_cast %108 : vector<1x96x64xbf16> to vector<96x64xbf16>
    %c0_81 = arith.constant 0 : index
    %c229 = arith.constant 229 : index
    %c0_82 = arith.constant 0 : index
    %110 = vector.load %arg1[%c0_81, %c229, %c0_82] : memref<1x342x64xbf16, #tpu.memory_space<vmem>>, vector<1x96x64xbf16>
    %111 = vector.shape_cast %110 : vector<1x96x64xbf16> to vector<96x64xbf16>
    %c0_83 = arith.constant 0 : index
    %c230 = arith.constant 230 : index
    %c0_84 = arith.constant 0 : index
    %112 = vector.load %arg1[%c0_83, %c230, %c0_84] : memref<1x342x64xbf16, #tpu.memory_space<vmem>>, vector<1x96x64xbf16>
    %113 = vector.shape_cast %112 : vector<1x96x64xbf16> to vector<96x64xbf16>
    %114 = tpu.concatenate %97, %99, %101, %103, %105, %107, %109, %111, %113 in 1 : vector<96x64xbf16>, vector<96x64xbf16>, vector<96x64xbf16>, vector<96x64xbf16>, vector<96x64xbf16>, vector<96x64xbf16>, vector<96x64xbf16>, vector<96x64xbf16>, vector<96x64xbf16> -> vector<96x576xbf16>
    %c0_85 = arith.constant 0 : index
    %c0_86 = arith.constant 0 : index
    %115 = vector.load %arg3[%c0_85, %c0_86] : memref<576x128xbf16, #tpu.memory_space<vmem>>, vector<576x128xbf16>
    %cst_87 = arith.constant dense<0.000000e+00> : vector<96x128xf32>
    %116 = tpu.matmul %114, %115, %cst_87 {dimension_numbers = #tpu.dot_dimension_numbers<[1], [0], [0], [1], [0, 0, 1, 1], [], []>} : vector<96x576xbf16>, vector<576x128xbf16>, vector<96x128xf32> -> vector<96x128xf32>
    %c0_88 = arith.constant 0 : index
    %c0_89 = arith.constant 0 : index
    %117 = vector.load %arg4[%c0_88, %c0_89] : memref<1x128xf32, #tpu.memory_space<vmem>>, vector<1x128xf32>
    %118 = vector.broadcast %117 : vector<1x128xf32> to vector<96x128xf32>
    %119 = arith.addf %116, %118 : vector<96x128xf32>
    %120 = math.tanh %119 : vector<96x128xf32>
    %121 = vector.extract_strided_slice %120 {offsets = [0, 0], sizes = [96, 96], strides = [1, 1]} : vector<96x128xf32> to vector<96x96xf32>
    %cst_90 = arith.constant 5.000000e-01 : f32
    %122 = vector.broadcast %cst_90 : f32 to vector<96x96xf32>
    %123 = arith.mulf %122, %121 : vector<96x96xf32>
    %cst_91 = arith.constant 5.000000e-01 : f32
    %124 = vector.broadcast %cst_91 : f32 to vector<96x96xf32>
    %125 = arith.addf %123, %124 : vector<96x96xf32>
    %126 = vector.extract_strided_slice %125 {offsets = [0, 0], sizes = [96, 32], strides = [1, 1]} : vector<96x96xf32> to vector<96x32xf32>
    %127 = vector.extract_strided_slice %125 {offsets = [0, 32], sizes = [96, 32], strides = [1, 1]} : vector<96x96xf32> to vector<96x32xf32>
    %128 = vector.extract_strided_slice %125 {offsets = [0, 64], sizes = [96, 32], strides = [1, 1]} : vector<96x96xf32> to vector<96x32xf32>
    %129 = vector.extract_strided_slice %120 {offsets = [0, 96], sizes = [96, 32], strides = [1, 1]} : vector<96x128xf32> to vector<96x32xf32>
    %c0_92 = arith.constant 0 : index
    %c192_93 = arith.constant 192 : index
    %c0_94 = arith.constant 0 : index
    %130 = vector.load %arg2[%c0_92, %c192_93, %c0_94] : memref<1x288x32xf32, #tpu.memory_space<vmem>>, vector<1x96x32xf32>
    %131 = vector.shape_cast %130 : vector<1x96x32xf32> to vector<96x32xf32>
    %132 = arith.mulf %127, %131 : vector<96x32xf32>
    %133 = arith.mulf %126, %129 : vector<96x32xf32>
    %134 = arith.addf %132, %133 : vector<96x32xf32>
    %135 = math.tanh %134 : vector<96x32xf32>
    %136 = arith.mulf %128, %135 : vector<96x32xf32>
    %c0_95 = arith.constant 0 : index
    %c192_96 = arith.constant 192 : index
    %c0_97 = arith.constant 0 : index
    %137 = vector.load %arg6[%c0_95, %c192_96, %c0_97] : memref<1x288x32xf32, #tpu.memory_space<vmem>>, vector<1x96x32xf32>
    %138 = vector.shape_cast %137 : vector<1x96x32xf32> to vector<96x32xf32>
    %139 = vector.shape_cast %134 : vector<96x32xf32> to vector<1x96x32xf32>
    tpu.vector_store %arg6[%c0_95, %c192_96, %c0_97], %139 {strides = array<i32>} : memref<1x288x32xf32, #tpu.memory_space<vmem>>, vector<1x96x32xf32>,
    %140 = arith.truncf %136 : vector<96x32xf32> to vector<96x32xbf16>
    %c0_98 = arith.constant 0 : index
    %c192_99 = arith.constant 192 : index
    %c0_100 = arith.constant 0 : index
    %141 = vector.load %arg5[%c0_98, %c192_99, %c0_100] : memref<1x288x32xbf16, #tpu.memory_space<vmem>>, vector<1x96x32xbf16>
    %142 = vector.shape_cast %141 : vector<1x96x32xbf16> to vector<96x32xbf16>
    %143 = vector.shape_cast %140 : vector<96x32xbf16> to vector<1x96x32xbf16>
    tpu.vector_store %arg5[%c0_98, %c192_99, %c0_100], %143 {strides = array<i32>} : memref<1x288x32xbf16, #tpu.memory_space<vmem>>, vector<1x96x32xbf16>,
    return
  }
  func.func @transform_0(%arg0: i32) -> (i32, i32, i32) {
    %c0_i32 = arith.constant 0 : i32
    %c0_i32_0 = arith.constant 0 : i32
    %c0_i32_1 = arith.constant 0 : i32
    return %arg0, %c0_i32, %c0_i32_0 : i32, i32, i32
  }
  func.func @transform_1(%arg0: i32) -> (i32, i32, i32) {
    %c0_i32 = arith.constant 0 : i32
    %c0_i32_0 = arith.constant 0 : i32
    %c0_i32_1 = arith.constant 0 : i32
    return %arg0, %c0_i32, %c0_i32_0 : i32, i32, i32
  }
  func.func @transform_2(%arg0: i32) -> (i32, i32) {
    %c0_i32 = arith.constant 0 : i32
    %c0_i32_0 = arith.constant 0 : i32
    %c0_i32_1 = arith.constant 0 : i32
    return %c0_i32, %c0_i32_0 : i32, i32
  }
  func.func @transform_3(%arg0: i32) -> (i32, i32) {
    %c0_i32 = arith.constant 0 : i32
    %c0_i32_0 = arith.constant 0 : i32
    %c0_i32_1 = arith.constant 0 : i32
    return %c0_i32, %c0_i32_0 : i32, i32
  }
  func.func @transform_4(%arg0: i32) -> (i32, i32, i32) {
    %c0_i32 = arith.constant 0 : i32
    %c0_i32_0 = arith.constant 0 : i32
    %c0_i32_1 = arith.constant 0 : i32
    return %arg0, %c0_i32, %c0_i32_0 : i32, i32, i32
  }
  func.func @transform_5(%arg0: i32) -> (i32, i32, i32) {
    %c0_i32 = arith.constant 0 : i32
    %c0_i32_0 = arith.constant 0 : i32
    %c0_i32_1 = arith.constant 0 : i32
    return %arg0, %c0_i32, %c0_i32_0 : i32, i32, i32
  }
}

</mosaic_0001>

<bundles_post_ra>
// kernel: convlstm_cell_forward.1
= control target key start
LH: loop header
LB: loop body
LE: loop exit
PB: predicated region body
PF: predicated region fallthrough
CT: control target
= control target key end

     0   :  { %s5706_s18 = smov 0   ;;  %s8026_s0 = inlined_call_operand.vmem [shape: bf16[2,342,64], index: 0, kind: input, shape index: {}]   ;;  %s8027_s1 = inlined_call_operand.vmem [shape: f32[2,288,32], index: 1, kind: input, shape index: {}]   ;;  %s8028_s2 = inlined_call_operand.vmem [shape: bf16[576,128], index: 2, kind: input, shape index: {}]   ;;  %s8029_s3 = inlined_call_operand.vmem [shape: f32[1,128], index: 3, kind: input, shape index: {}]   ;;  %s8030_s4 = inlined_call_operand.vmem [shape: bf16[2,288,32], index: 4, kind: output, shape index: {0}]   ;;  %s8031_s5 = inlined_call_operand.vmem [shape: f32[2,288,32], index: 5, kind: output, shape index: {1}]  }
   0x1 LB: > { %s4631_s19 = sadd.s32 4294967295, %s5671_s18   ;;  %p4635_p0 = scmp.ge.s32.totalorder %s5671_s18, 1  ;;  %s5671_s18 = sphi %s5706_s18, %s16_s18  }
   0x2   : > { %p200_p1 = scmp.lt.s32.totalorder %s5671_s18, 3 }
   0x4   : > { %p201_p2 = pnand %p4635_p0, %p200_p1 }
   0x6   : > { %204 = sbr.rel (%p201_p2) target bundleno = 1084 (0x43c), region = 36 }
   0xd   : > { %p238_p3 = scmp.lt.s32.totalorder %s4631_s19, 1  ;;  %v5355_v0 = vld [vmem:[%s8028_s2 + $0xc0] sm:$0xff]   ;;  %v5359_v2 = vld [vmem:[%s8028_s2 + $0xc8] sm:$0xff]   ;;  %vm524_vm0 = vsmask.f32 5376  ;;  %vm478_vm1 = vcmask 1045504  }
   0xe   : > { %v5357_v1 = vld [vmem:[%s8028_s2 + $0x80] sm:$0xff]   ;;  %4949 = vmatprep.subr.bf16.mxu1 %v5355_v0  ;;  %v5361_v4 = vld [vmem:[%s8028_s2 + $0x88] sm:$0xff]   ;;  %s5673_s9 = smov 64   ;;  %vm386_vm2 = vcmask 1046528   ;;  %vm318_vm3 = vsmask.f32 7424 }
   0xf   : > { %s8189_s19 = smov (!%p238_p3, %s4631_s19), 1  ;;  %4950 = vmatpush3.bf16.msra.mxu1 %v5357_v1  ;;  %v5360_v3 = vld [vmem:[%s8028_s2 + $0x40] sm:$0xff]   ;;  %vm432_vm4 = vsmask.f32 6400  ;;  %vm596_vm5 = vcmask 523264   ;;  %s5674_s28 = smov 32  }
  0x10   : > { %s5315_s24 = smul.u32 172, %s8189_s19  ;;  %4951 = vmatprep.subr.bf16.mxu1 %v5359_v2  ;;  %4897 = vmatprep.subr.bf16.mxu0 %v5360_v3  ;;  %vm582_vm6 = vcmask 1044480   ;;  %s5675_s7 = smov 96   ;;  %vm1591_vm7 = vcmask 261120   ;;  %vm1676_vm8 = vcmask 257024  }
  0x12   : > { %s5732_s6 = scalar_lea.vmem %s8026_s0, %s5315_s24  ;;  %s5316_s24 = smul.u32 288, %s8189_s19 }
  0x13   : > { %v264_v5 = vld [vmem:[%s5732_s6 + $0x14] sm:$0xf]  ;;  %v279_v6 = vld [vmem:[%s5732_s6 + $0x10] sm:$0xc]  ;;  %v5740_v7 = vld [vmem:[%s5732_s6 + $0x18] sm:$0xff]   ;;  %4952 = vmatpush3.bf16.msra.mxu1 %v5361_v4 }
  0x14   : > { %v263_v8 = vld [vmem:[%s5732_s6 + $0x10] sm:$0xf]  ;;  %v5743_v9 = vcombine.low %v279_v6, %v264_v5  ;;  %v5746_v10 = vld [vmem:[%s5732_s6 + $0x20] sm:$0xff]   ;;  %v5749_v11 = vshll.u32 %v5740_v7, 16  ;;  %v5752_v12 = vshrl.u32 %v5740_v7, 16  ;;  %v5771_v25 = vld [vmem:[%s5732_s6 + $0x28] sm:$0xff]   ;;  %s6582_s27 = scalar_lea.vmem %s8027_s1, %s5316_s24  ;;  %s7736_s11 = scalar_lea.vmem %s8031_s5, %s5316_s24 }
  0x15   : > { %v5754_v13 = vcombine.low %v263_v8, %v264_v5  ;;  %v262_v14 = vld [vmem:[%s5732_s6 + $0xc] sm:$0xf]  ;;  %v278_v15 = vld [vmem:[%s5732_s6 + $0x8] sm:$0xc]  ;;  %v5761_v18 = vshll.u32 %v5746_v10, 16  ;;  %v5764_v19 = vshrl.u32 %v5746_v10, 16 }
  0x16   : > { %v526_v16 = vshrl.u32 %v5743_v9, 16  ;;  %v529_v17 = vshll.u32 %v5743_v9, 16  ;;  %v261_v20 = vld [vmem:[%s5732_s6 + $0x8] sm:$0xf]  ;;  %v533_v21 = vrot.slane %v5752_v12, 2  ;;  %v534_v22 = vrot.slane %v5749_v11, 3 }
  0x17   : > { %v4652_v23 = vcombine.low %v278_v15, %v262_v14  ;;  %v273_v24 = vld [vmem:[%s5732_s6 + $0x8] sm:$0xe]  ;;  %v537_v28 = vrot.slane %v5764_v19, 2  ;;  %v538_v29 = vrot.slane %v5761_v18, 3  ;;  %v259_v30 = vld [vmem:[%s5732_s6] sm:$0xf]  ;;  %v5777_v34 = vcombine.low %v261_v20, %v262_v14 }
  0x18   : > { %v528_v26 = vrot.slane %v526_v16, 2  ;;  %v531_v27 = vrot.slane %v529_v17, 3  ;;  %v535_v31 = vor.u32 %v534_v22, %v533_v21  ;;  %v480_v33 = vrot.slane %v5754_v13, 2  ;;  %v260_v35 = vld [vmem:[%s5732_s6 + $0x4] sm:$0xf]  ;;  %v5809_v53 = vld [vmem:[%s5732_s6 + $0x30] sm:$0xff]  }
  0x19   : > { %v479_v32 = vrot.slane %v4652_v23, 2  ;;  %v539_v37 = vor.u32 %v538_v29, %v537_v28  ;;  %v5781_v38 = vrot.slane %v5740_v7, 2  ;;  %v5783_v39 = vcombine.low %v273_v24, %v262_v14  ;;  %v5339_v5 = vld [vmem:[%s5732_s6 + $0x38] sm:$0xff]   ;;  %v5362_v24 = vld [vmem:[%s8028_s2] sm:$0xff]   ;;  %s5317_s24 = smul.u32 144, %s8189_s19 }
  0x1a   : > { %v532_v36 = vor.u32 %v531_v27, %v528_v26  ;;  %v5785_v40 = vcombine.low %v259_v30, %v260_v35  ;;  %v327_v41 = vshll.u32 %v5777_v34, 16  ;;  %v5791_v44 = vrot.slane %v5754_v13, 1  ;;  %4898 = vmatpush3.bf16.msra.mxu0 %v5362_v24  ;;  %v5363_v35 = vld [vmem:[%s8028_s2 + $0xd0] sm:$0xff]  }
  0x1b   : > { %v540_v43 = vsel %vm524_vm0, %v535_v31, %v539_v37  ;;  %v5794_v45 = vshll.u32 %v5771_v25, 16  ;;  %v411_v46 = vrot.slane %v5783_v39, 1  ;;  %v5802_v49 = vshrl.u32 %v5771_v25, 16  ;;  %4953 = vmatprep.subr.bf16.mxu1 %v5363_v35  ;;  %v5347_v24 = vld [vmem:[%s5732_s6 + $0x30] ss:$0 sps:$4 sm:$0x11]   ;;  %s7917_s13 = scalar_lea.vmem %s8030_s4, %s5317_s24 }
  0x1c   : > { %v536_v42 = vsel %vm524_vm0, %v532_v36, %v535_v31  ;;  %569 = vrot.lane.b32.xlu1 %v540_v43, %s5673_s9  ;;  %v320_v47 = vshrl.u32 %v5785_v40, 16  ;;  %v322_v48 = vshll.u32 %v5785_v40, 16  ;;  %v481_v50 = vsel %vm478_vm1, %v479_v32, %v480_v33 }
  0x1d   : > { %567 = vrot.lane.b32.xlu0 %v536_v42, %s5673_s9  ;;  %v483_v51 = vsel %vm478_vm1, %v480_v33, %v5781_v38  ;;  %v542_v52 = vrot.slane %v5794_v45, 3  ;;  %v329_v55 = vrot.slane %v327_v41, 1  ;;  %v541_v56 = vrot.slane %v5802_v49, 2  ;;  %v5340_v33 = vld [vmem:[%s5732_s6 + $0x40] ss:$0 sps:$4 sm:$0x77]  }
  0x1e   : > { %v324_v54 = vrot.slane %v322_v48, 1  ;;  %v412_v57 = vsel %vm386_vm2, %v411_v46, %v5791_v44  ;;  %v484_v59 = vrot.slane %v5746_v10, 2  ;;  %v335_v60 = vshll.u32 %v5754_v13, 16  ;;  %v1690_v41 = vld [vmem:[%s5732_s6 + $0x34] sm:$0xf] }
  0x1f   : > { %v543_v61 = vor.u32 %v542_v52, %v541_v56  ;;  %v331_v62 = vshrl.u32 %v5777_v34, 16  ;;  %v8033_v63 = vshrl.u32 %v5809_v53, 16  ;;  %v8032_v0 = vshll.u32 %v5809_v53, 16  ;;  %v5341_v48 = vld [vmem:[%s5732_s6 + $0x38] ss:$0 sps:$4 sm:$0x33]  }
  0x20   : > { %494 = vrot.lane.b32.xlu1 %v483_v51, %s5673_s9  ;;  %v325_v58 = vor.u32 %v324_v54, %v320_v47  ;;  %v5826_v2 = vsel %vm478_vm1, %v5781_v38, %v484_v59  ;;  %v392_v3 = vrot.slane %v5740_v7, 1  ;;  %v337_v4 = vrot.slane %v335_v60, 1  ;;  %v5365_v51 = vld [vmem:[%s8028_s2 + $0x90] sm:$0xff]  }
  0x21   : > { %492 = vrot.lane.b32.xlu0 %v481_v50, %s5673_s9  ;;  %v544_v6 = vsel %vm524_vm0, %v539_v37, %v543_v61  ;;  %v333_v8 = vor.u32 %v331_v62, %v329_v55  ;;  %v545_v14 = vrot.slane %v8033_v63, 2  ;;  %v546_v15 = vrot.slane %v8032_v0, 3  ;;  %v1689_v37 = vld [vmem:[%s5732_s6 + $0x30] sm:$0xf]  ;;  %v5364_v50 = vld [vmem:[%s8028_s2 + $0x48] sm:$0xff]   ;;  %4954 = vmatpush3.bf16.msra.mxu1 %v5365_v51 }
  0x22   : > { %v330_v1 = vsel %vm318_vm3, %v325_v58, %v329_v55  ;;  %v5842_v7 = vsel %vm386_vm2, %v5791_v44, %v392_v3  ;;  %v486_v16 = vrot.slane %v5771_v25, 2  ;;  %v339_v17 = vshrl.u32 %v5754_v13, 16  ;;  %4899 = vmatprep.subr.bf16.mxu0 %v5364_v50 }
  0x23   : > { %v338_v20 = vsel %vm318_vm3, %v333_v8, %v337_v4  ;;  %v547_v21 = vor.u32 %v546_v15, %v545_v14  ;;  %v550_v22 = vshrl.u32 %v5339_v5, 16  ;;  %v553_v23 = vshll.u32 %v5339_v5, 16  ;;  %v1691_v5 = vld [vmem:[%s5732_s6 + $0x38] sm:$0xf]  ;;  %v5370_v8 = vld [vmem:[%s8028_s2 + $0x50] sm:$0xff]  }
  0x24   : > { %371 = vrot.lane.b32.xlu1 %v330_v1, %s5673_s9  ;;  %v5854_v26 = vsel %vm478_vm1, %v484_v59, %v486_v16  ;;  %v394_v27 = vrot.slane %v5746_v10, 1  ;;  %v345_v28 = vrot.slane %v5749_v11, 1  ;;  %v341_v30 = vor.u32 %v339_v17, %v337_v4  ;;  %v5366_v1 = vld [vmem:[%s8028_s2 + $0x8] sm:$0xff]   ;;  %v5910_v4 = vld [vmem:[%s5732_s6 + $0x44] sm:$0xf] }
  0x25   : > { %417 = vrot.lane.b32.xlu0 %v412_v57, %s5673_s9  ;;  %v548_v29 = vsel %vm524_vm0, %v543_v61, %v547_v21  ;;  %v552_v31 = vrot.slane %v550_v22, 2  ;;  %v555_v32 = vrot.slane %v553_v23, 3  ;;  %v5872_v36 = vrot.slane %v5809_v53, 2  ;;  %v5898_v61 = vld [vmem:[%s5732_s6 + $0x3c] sm:$0xf]  ;;  %4900 = vmatpush3.bf16.msra.mxu0 %v5366_v1 }
  0x26   : > { %v5869_v10 = vsel %vm386_vm2, %v392_v3, %v394_v27  ;;  %v346_v42 = vsel %vm318_vm3, %v341_v30, %v345_v28  ;;  %v559_v46 = vshrl.u32 %v5340_v33, 16  ;;  %v562_v47 = vshll.u32 %v5340_v33, 16  ;;  %v1693_v3 = vld [vmem:[%s5732_s6 + $0x40] sm:$0xf]  ;;  %4901 = vmatprep.subr.bf16.mxu0 %v5370_v8 }
  0x27   : > { %v556_v43 = vor.u32 %v555_v32, %v552_v31  ;;  %v5889_v52 = vsel %vm478_vm1, %v486_v16, %v5872_v36  ;;  %v5892_v54 = vrot.slane %v5771_v25, 1  ;;  %v349_v55 = vor.u32 %v5752_v12, %v345_v28  ;;  %v5368_v25 = vld [vmem:[%s8028_s2 + $0xd8] sm:$0xff]   ;;  %v5934_v28 = vld [vmem:[%s5732_s6 + $0x48] sm:$0xff]  }
  0x28   : > { %496 = vrot.lane.b32.xlu1 %v5826_v2, %s5673_s9  ;;  %v353_v56 = vrot.slane %v5761_v18, 1  ;;  %v561_v58 = vrot.slane %v559_v46, 2  ;;  %v564_v59 = vrot.slane %v562_v47, 3  ;;  %v5900_v62 = vcombine.low %v1689_v37, %v1690_v41  ;;  %4955 = vmatprep.subr.bf16.mxu1 %v5368_v25  ;;  %v5930_v23 = vld [vmem:[%s5732_s6 + $0x38] ss:$0 sps:$4 sm:$0x11]  }
  0x29   : > { %571 = vrot.lane.b32.xlu0 %v544_v6, %s5673_s9  ;;  %v557_v57 = vsel %vm524_vm0, %v547_v21, %v556_v43  ;;  %v1703_v6 = vld [vmem:[%s5732_s6 + $0x38] sm:$0xe]  ;;  %v5922_v14 = vsel %vm386_vm2, %v394_v27, %v5892_v54  ;;  %v490_v15 = vrot.slane %v5341_v48, 2  ;;  %v5926_v21 = vcombine.low %v1691_v5, %v5898_v61  ;;  %v5962_v48 = vld [vmem:[%s5732_s6 + $0x50] sm:$0xff]  }
  0x2a   : > { %v354_v16 = vsel %vm318_vm3, %v349_v55, %v353_v56  ;;  %v1751_v22 = vshll.u32 %v5900_v62, 16  ;;  %v5371_v27 = vld [vmem:[%s8028_s2 + $0x98] sm:$0xff]   ;;  %v413_v30 = vrot.slane %v5809_v53, 1  ;;  %v5943_v31 = vcombine.low %v1693_v3, %v5910_v4 }
  0x2b   : > { %v491_v32 = vsel %vm478_vm1, %v5872_v36, %v490_v15  ;;  %v357_v33 = vor.u32 %v5764_v19, %v353_v56  ;;  %v361_v35 = vrot.slane %v5794_v45, 1  ;;  %v5953_v37 = vcombine.low %v1703_v6, %v5898_v61  ;;  %4956 = vmatpush3.bf16.msra.mxu1 %v5371_v27 }
  0x2c   : > { %373 = vrot.lane.b32.xlu1 %v338_v20, %s5673_s9  ;;  %v565_v20 = vor.u32 %v564_v59, %v561_v58  ;;  %v1753_v46 = vrot.slane %v1751_v22, 1  ;;  %v1756_v47 = vshll.u32 %v5926_v21, 16  ;;  %v441_v50 = vrot.slane %v339_v17, 1  ;;  %v5373_v58 = vld [vmem:[%s8028_s2 + $0xe0] sm:$0xff]   ;;  %v5374_v17 = vld [vmem:[%s8028_s2 + $0x58] sm:$0xff]  }
  0x2d   : > { %419 = vrot.lane.b32.xlu0 %v5842_v7, %s5673_s9  ;;  %v367_v51 = vshll.u32 %v5347_v24, 16  ;;  %v5967_v55 = vrot.slane %v5943_v31, 1  ;;  %v415_v56 = vrot.slane %v5930_v23, 1  ;;  %v414_v59 = vsel %vm386_vm2, %v5892_v54, %v413_v30  ;;  %4957 = vmatprep.subr.bf16.mxu1 %v5373_v58  ;;  %v5376_v22 = vld [vmem:[%s8028_s2 + $0x18] sm:$0xff]  }
  0x2e   : > { %v566_v41 = vsel %vm524_vm0, %v556_v43, %v565_v20  ;;  %v8035_v43 = vshll.u32 %v5943_v31, 16  ;;  %v1839_v1 = vrot.slane %v5953_v37, 1  ;;  %v1820_v25 = vrot.slane %v5934_v28, 1  ;;  %v5375_v20 = vld [vmem:[%s8028_s2 + $0xa0] sm:$0xff]  }
  0x2f   : > { %v362_v3 = vsel %vm318_vm3, %v357_v33, %v361_v35  ;;  %v1758_v6 = vrot.slane %v1756_v47, 1  ;;  %v1760_v8 = vshrl.u32 %v5926_v21, 16  ;;  %v369_v15 = vrot.slane %v367_v51, 1  ;;  %4958 = vmatpush3.bf16.msra.mxu1 %v5375_v20  ;;  %v5378_v47 = vld [vmem:[%s8028_s2 + $0x60] sm:$0xff]  }
  0x30   : > { %498 = vrot.lane.b32.xlu1 %v5854_v26, %s5673_s9  ;;  %v1766_v23 = vrot.slane %v8035_v43, 1  ;;  %v8034_v24 = vshrl.u32 %v5943_v31, 16  ;;  %v365_v33 = vor.u32 %v5802_v49, %v361_v35  ;;  %v434_v51 = vshrl.u32 %v5783_v39, 16 }
  0x31   : > { %573 = vrot.lane.b32.xlu0 %v548_v29, %s5673_s9  ;;  %v442_v29 = vrot.slane %v335_v60, 2  ;;  %v5372_v60 = vld [vmem:[%s8028_s2 + $0x10] sm:$0xff]   ;;  %v6042_v20 = vshll.u32 %v5962_v48, 16  ;;  %v1906_v43 = vrot.slane %v5943_v31, 2 }
  0x32   : > { %4902 = vmatpush3.bf16.msra.mxu0 %v5372_v60  ;;  %v6008_v60 = vshrl.u32 %v5934_v28, 16 }
  0x33   : > { %4903 = vmatprep.subr.bf16.mxu0 %v5374_v17  ;;  %v443_v35 = vor.u32 %v442_v29, %v441_v50  ;;  %v437_v17 = vshll.u32 %v5783_v39, 16  ;;  %v416_v29 = vsel %vm386_vm2, %v413_v30, %v415_v56  ;;  %v1762_v50 = vor.u32 %v1760_v8, %v1758_v6  ;;  %v6036_v39 = vld [vmem:[%s5732_s6 + $0x58] sm:$0xff]   ;;  %8071 = vst [vmem:[#allocation4_spill] sm:$0xff] %v6042_v20  ;;  %v5382_v30 = vld [vmem:[%s8028_s2 + $0x68] sm:$0xff]   ;;  %v5383_v56 = vld [vmem:[%s8028_s2 + $0xb0] sm:$0xff]  }
  0x34   : > { %375 = vrot.lane.b32.xlu1 %v346_v42, %s5673_s9  ;;  %v1749_v42 = vshrl.u32 %v5900_v62, 16  ;;  %8070 = vst [vmem:[#allocation3_spill] sm:$0xff] %v6008_v60  ;;  %v445_v8 = vrot.slane %v5752_v12, 1  ;;  %v450_v12 = vrot.slane %v5761_v18, 2  ;;  %v5386_v18 = vld [vmem:[%s8028_s2 + $0x70] sm:$0xff]  }
  0x35   : > { %421 = vrot.lane.b32.xlu0 %v5869_v10, %s5673_s9 }
  0x36   : > { %v1754_v5 = vor.u32 %v1753_v46, %v1749_v42  ;;  %v1840_v42 = vsel %vm386_vm2, %v1839_v1, %v5967_v55  ;;  %4904 = vmatpush3.bf16.msra.mxu0 %v5376_v22  ;;  %v436_v1 = vrot.slane %v434_v51, 1  ;;  %v1709_v22 = vld [vmem:[%s5732_s6 + $0x40] sm:$0xc]  ;;  %v5385_v51 = vld [vmem:[%s8028_s2 + $0xf8] sm:$0xff]  }
  0x37   : > { %4905 = vmatprep.subr.bf16.mxu0 %v5378_v47  ;;  %v5353_v47 = vld [vmem:[%s5732_s6 + $0x60] ss:$0 sps:$4 sm:$0x11]  }
  0x38   : > { %500 = vrot.lane.b32.xlu1 %v5889_v52, %s5673_s9  ;;  %v1759_v46 = vsel %vm318_vm3, %v1754_v5, %v1758_v6  ;;  %v439_v5 = vrot.slane %v437_v17, 2 }
  0x39   : > { %575 = vrot.lane.b32.xlu0 %v557_v57, %s5673_s9  ;;  %v5972_v57 = vshll.u32 %v5934_v28, 16 }
  0x3a   : > { %v440_v6 = vor.u32 %v439_v5, %v436_v1 }
  0x3b   : > { %8069 = vst [vmem:[#allocation2_spill] sm:$0xff] %v5972_v57  ;;  %v1774_v27 = vrot.slane %v5972_v57, 1 }
  0x3c   : > { %377 = vrot.lane.b32.xlu1 %v354_v16, %s5673_s9  ;;  %v1822_v16 = vrot.slane %v5962_v48, 1 }
  0x3d   : > { %423 = vrot.lane.b32.xlu0 %v5922_v14, %s5673_s9 }
  0x3e   : > { %v6089_v1 = vsel %vm386_vm2, %v1820_v25, %v1822_v16 }
  0x40   : > { %502 = vrot.lane.b32.xlu1 %v491_v32, %s5673_s9  ;;  %v5377_v32 = vld [vmem:[%s8028_s2 + $0xe8] sm:$0xff]  }
  0x41   : > { %577 = vrot.lane.b32.xlu0 %v566_v41, %s5673_s9  ;;  %v515_v41 = vrot.slane %v5743_v9, 2  ;;  %4959 = vmatprep.subr.bf16.mxu1 %v5377_v32  ;;  %v5379_v9 = vld [vmem:[%s8028_s2 + $0xa8] sm:$0xff]  }
  0x42   : > { %4960 = vmatpush3.bf16.msra.mxu1 %v5379_v9  ;;  %v5384_v32 = vld [vmem:[%s8028_s2 + $0x28] sm:$0xff]   ;;  %v6074_v9 = vsel %vm432_vm4, %v440_v6, %v443_v35  ;;  %v1708_v6 = vld [vmem:[%s5732_s6 + $0x38] sm:$0xc] }
  0x43   : > { %v6023_v58 = vsel %vm478_vm1, %v515_v41, %v5781_v38  ;;  %v370_v38 = vsel %vm318_vm3, %v365_v33, %v369_v15  ;;  %v6058_v15 = vsel %vm386_vm2, %v5967_v55, %v1820_v25  ;;  %v446_v33 = vrot.slane %v5749_v11, 2 }
  0x44   : > { %379 = vrot.lane.b32.xlu1 %v362_v3, %s5673_s9  ;;  %v5381_v3 = vld [vmem:[%s8028_s2 + $0xf0] sm:$0xff]   ;;  %v449_v41 = vrot.slane %v5764_v19, 1  ;;  %v453_v11 = vrot.slane %v5802_v49, 1  ;;  %v6078_v19 = vld [vmem:[%s5732_s6 + $0x60] sm:$0xff]   ;;  %v6092_v49 = vrot.slane %v6036_v39, 1  ;;  %v6104_v25 = vshrl.u32 %v5962_v48, 16 }
  0x45   : > { %425 = vrot.lane.b32.xlu0 %v414_v59, %s5673_s9  ;;  %v5380_v59 = vld [vmem:[%s8028_s2 + $0x20] sm:$0xff]   ;;  %4961 = vmatprep.subr.bf16.mxu1 %v5381_v3  ;;  %8072 = vst [vmem:[#allocation5_spill] sm:$0xff] %v6078_v19  ;;  %v8039_v0 = vshll.u32 %v6078_v19, 16 }
  0x46   : > { %4906 = vmatpush3.bf16.msra.mxu0 %v5380_v59  ;;  %4962 = vmatpush3.bf16.msra.mxu1 %v5383_v56  ;;  %v451_v17 = vor.u32 %v450_v12, %v449_v41  ;;  %v454_v59 = vrot.slane %v5794_v45, 2  ;;  %8073 = vst [vmem:[#allocation6_spill] sm:$0xff] %v6092_v49  ;;  %v5387_v45 = vld [vmem:[%s8028_s2 + $0xb8] sm:$0xff]   ;;  %8074 = vst [vmem:[#allocation7_spill] sm:$0xff] %v6104_v25  ;;  %v6125_v56 = vshll.u32 %v6036_v39, 16  ;;  %v6144_v41 = vshrl.u32 %v6036_v39, 16 }
  0x47   : > { %4907 = vmatprep.subr.bf16.mxu0 %v5382_v30  ;;  %4963 = vmatprep.subr.bf16.mxu1 %v5385_v51  ;;  %v1782_v30 = vrot.slane %v6042_v20, 1 }
  0x48   : > { %1800 = vrot.lane.b32.xlu1 %v1759_v46, %s5673_s9  ;;  %v1770_v46 = vor.u32 %v8034_v24, %v1766_v23  ;;  %v6115_v3 = vor.u32 %v454_v59, %v453_v11  ;;  %v1790_v51 = vrot.slane %v6125_v56, 1  ;;  %v5358_v11 = vld [vmem:[%s5732_s6 + $0x68] sm:$0xff]   ;;  %v1959_v59 = vrot.slane %v5972_v57, 3 }
  0x49   : > { %1845 = vrot.lane.b32.xlu0 %v1840_v42, %s5673_s9  ;;  %v1767_v42 = vsel %vm318_vm3, %v1762_v50, %v1766_v23  ;;  %v447_v23 = vor.u32 %v446_v33, %v445_v8  ;;  %v1841_v33 = vrot.slane %v6078_v19, 1 }
  0x4a   : > { %4908 = vmatpush3.bf16.msra.mxu0 %v5384_v32  ;;  %v1775_v5 = vsel %vm318_vm3, %v1770_v46, %v1774_v27  ;;  %4964 = vmatpush3.bf16.msra.mxu1 %v5387_v45  ;;  %v6131_v8 = vsel %vm432_vm4, %v451_v17, %v6115_v3  ;;  %v1796_v32 = vshll.u32 %v5353_v47, 16  ;;  %v1786_v47 = vor.u32 %v6104_v25, %v1782_v30  ;;  %v6163_v45 = vld [vmem:[%s8028_s2 + $0x100] sm:$0xff]  }
  0x4b   : > { %v6113_v50 = vsel %vm432_vm4, %v447_v23, %v451_v17  ;;  %4909 = vmatprep.subr.bf16.mxu0 %v5386_v18  ;;  %v5394_v18 = vld [vmem:[%s8028_s2 + $0x38] sm:$0xff]   ;;  %v1958_v17 = vrot.slane %v6008_v60, 2 }
  0x4c   : > { %381 = vrot.lane.b32.xlu1 %v370_v38, %s5673_s9  ;;  %v6110_v38 = vsel %vm432_vm4, %v443_v35, %v447_v23  ;;  %v5352_v35 = vld [vmem:[%s5732_s6 + $0x68] ss:$0 sps:$4 sm:$0x11]  }
  0x4d   : > { %427 = vrot.lane.b32.xlu0 %v416_v29, %s5673_s9  ;;  %v6095_v29 = vcombine.low %v1709_v22, %v5910_v4  ;;  %v5388_v4 = vld [vmem:[%s8028_s2 + $0x30] sm:$0xff]   ;;  %v1778_v22 = vor.u32 %v6008_v60, %v1774_v27  ;;  %v6140_v27 = vsel %vm386_vm2, %v1822_v16, %v6092_v49  ;;  %v1843_v23 = vrot.slane %v5352_v35, 1 }
  0x4e   : > { %4910 = vmatpush3.bf16.msra.mxu0 %v5388_v4  ;;  %v1798_v4 = vrot.slane %v1796_v32, 1  ;;  %v1794_v35 = vor.u32 %v6144_v41, %v1790_v51  ;;  %v1791_v32 = vsel %vm318_vm3, %v1786_v47, %v1790_v51  ;;  %v1960_v47 = vor.u32 %v1959_v59, %v1958_v17 }
  0x4f   : > { %v1951_v12 = vshrl.u32 %v6095_v29, 16  ;;  %v1783_v46 = vsel %vm318_vm3, %v1778_v22, %v1782_v30  ;;  %v1954_v16 = vshll.u32 %v6095_v29, 16  ;;  %v8040_v22 = vshrl.u32 %v6078_v19, 16 }
  0x50   : > { %1802 = vrot.lane.b32.xlu1 %v1767_v42, %s5673_s9  ;;  %v5393_v42 = vld [vmem:[%s8028_s2 + $0x78] sm:$0xff]   ;;  %v1842_v30 = vsel %vm386_vm2, %v6092_v49, %v1841_v33  ;;  %v1962_v17 = vrot.slane %v6104_v25, 2 }
  0x51   : > { %1847 = vrot.lane.b32.xlu0 %v6058_v15, %s5673_s9  ;;  %4911 = vmatprep.subr.bf16.mxu0 %v5393_v42  ;;  %v1953_v42 = vrot.slane %v1951_v12, 2  ;;  %v1956_v63 = vrot.slane %v1954_v16, 3  ;;  %v1844_v12 = vsel %vm386_vm2, %v1841_v33, %v1843_v23  ;;  %v1970_v51 = vrot.slane %v8040_v22, 2  ;;  %v3112_v22 = vld [vmem:[%s5732_s6 + $0x68] sm:$0xf] }
  0x52   : > { %4912 = vmatpush3.bf16.msra.mxu0 %v5394_v18  ;;  %v5398_v18 = vld [vmem:[%s8028_s2 + $0x40] sm:$0xff]   ;;  %v1971_v16 = vrot.slane %v8039_v0, 3  ;;  %v8041_v33 = vrot.slane %v6036_v39, 2  ;;  %v6195_v23 = vrot.slane %v6078_v19, 2  ;;  %v3114_v0 = vld [vmem:[%s5732_s6 + $0x70] sm:$0xf] }
  0x53   : > { %5239 = vmatprep.subr.bf16.mxu0 %v6163_v45  ;;  %5011 = vmatprep.subr.bf16.mxu1 %v5398_v18  ;;  %v1957_v57 = vor.u32 %v1956_v63, %v1953_v42  ;;  %v8075_v18 = vshll.u32 %v5943_v31, 16  ;;  %v5431_v19 = vld [vmem:[%s5732_s6 + $0x98] sm:$0xff]  }
  0x54   : > { %1804 = vrot.lane.b32.xlu1 %v1775_v5, %s5673_s9  ;;  %v4725_v5 = vcombine.low %v1708_v6, %v5898_v61  ;;  %v1975_v61 = vshrl.u32 %v5358_v11, 16  ;;  %v1978_v6 = vshll.u32 %v5358_v11, 16  ;;  %v1799_v11 = vsel %vm318_vm3, %v1794_v35, %v1798_v4  ;;  %8077 = vst [vmem:[#allocation8_spill] sm:$0xff] %v6195_v23 }
  0x55   : > { %1849 = vrot.lane.b32.xlu0 %v6089_v1, %s5673_s9  ;;  %v1961_v35 = vsel %vm524_vm0, %v1957_v57, %v1960_v47  ;;  %v1972_v42 = vor.u32 %v1971_v16, %v1970_v51  ;;  %v6214_v57 = vsel %vm478_vm1, %v8041_v33, %v6195_v23  ;;  %v8079_v16 = vshrl.u32 %v5809_v53, 16  ;;  %v3115_v33 = vld [vmem:[%s5732_s6 + $0x74] sm:$0xf] }
  0x56   : > { %v1905_v24 = vrot.slane %v4725_v5, 2  ;;  %v1977_v5 = vrot.slane %v1975_v61, 2  ;;  %v1980_v60 = vrot.slane %v1978_v6, 3  ;;  %v1963_v6 = vrot.slane %v6042_v20, 3  ;;  %8078 = vst [vmem:[#allocation9_spill] sm:$0xff] %v6214_v57 }
  0x58   : > { %1806 = vrot.lane.b32.xlu1 %v1783_v46, %s5673_s9  ;;  %v5367_v46 = vld [vmem:[%s5732_s6 + $0x70] ss:$0 sps:$4 sm:$0x77]   ;;  %v1907_v63 = vsel %vm478_vm1, %v1905_v24, %v1906_v43  ;;  %v1981_v61 = vor.u32 %v1980_v60, %v1977_v5  ;;  %v1964_v60 = vor.u32 %v1963_v6, %v1962_v17  ;;  %v460_v5 = vrot.slane %v8079_v16, 1  ;;  %v6235_v16 = vld [vmem:[%s5732_s6 + $0x6c] sm:$0xf] }
  0x59   : > { %1851 = vrot.lane.b32.xlu0 %v6140_v27, %s5673_s9  ;;  %v1984_v59 = vshrl.u32 %v5367_v46, 16  ;;  %v1987_v4 = vshll.u32 %v5367_v46, 16  ;;  %v3110_v46 = vld [vmem:[%s5732_s6 + $0x60] sm:$0xf]  ;;  %v1966_v17 = vrot.slane %v6144_v41, 2  ;;  %v8081_v6 = vshll.u32 %v5809_v53, 16 }
  0x5b   : > { %v1989_v24 = vrot.slane %v1987_v4, 3  ;;  %v1967_v4 = vrot.slane %v6125_v56, 3 }
  0x5c   : > { %1808 = vrot.lane.b32.xlu1 %v1791_v32, %s5673_s9  ;;  %v8076_v32 = vshrl.u32 %v5943_v31, 16 }
  0x5d   : > { %1853 = vrot.lane.b32.xlu0 %v1842_v30, %s5673_s9  ;;  %v1869_v30 = vrot.slane %v8075_v18, 2  ;;  %v5369_v18 = vld [vmem:[%s5732_s6 + $0x68] ss:$0 sps:$4 sm:$0x33]  }
  0x5e   : > { %v1868_v49 = vrot.slane %v8076_v32, 1  ;;  %v1982_v32 = vsel %vm524_vm0, %v1972_v42, %v1981_v61 }
  0x60   : > { %1810 = vrot.lane.b32.xlu1 %v1799_v11, %s5673_s9  ;;  %v1986_v11 = vrot.slane %v1984_v59, 2  ;;  %v6217_v51 = vor.u32 %v1869_v30, %v1868_v49  ;;  %v1916_v59 = vrot.slane %v5369_v18, 2  ;;  %v1965_v49 = vsel %vm524_vm0, %v1960_v47, %v1964_v60 }
  0x61   : > { %1855 = vrot.lane.b32.xlu0 %v1844_v12, %s5673_s9  ;;  %v6207_v12 = vrot.slane %v5934_v28, 2  ;;  %v3111_v28 = vld [vmem:[%s5732_s6 + $0x64] sm:$0xf]  ;;  %v1968_v18 = vor.u32 %v1967_v4, %v1966_v17 }
  0x62   : > { %v1990_v30 = vor.u32 %v1989_v24, %v1986_v11  ;;  %v1917_v47 = vsel %vm478_vm1, %v6195_v23, %v1916_v59  ;;  %v1910_v11 = vrot.slane %v5962_v48, 2  ;;  %v3124_v24 = vld [vmem:[%s5732_s6 + $0x68] sm:$0xe] }
  0x63   : > { %v6263_v48 = vcombine.low %v3124_v24, %v6235_v16 }
  0x64   : > { %1918 = vrot.lane.b32.xlu1 %v1907_v63, %s5673_s9  ;;  %v1909_v63 = vsel %vm478_vm1, %v1906_v43, %v6207_v12  ;;  %v1991_v53 = vsel %vm524_vm0, %v1981_v61, %v1990_v30  ;;  %v6269_v59 = vsel %vm478_vm1, %v6207_v12, %v1910_v11  ;;  %v8087_v30 = vrot.slane %v6036_v39, 2 }
  0x65   : > { %1992 = vrot.lane.b32.xlu0 %v1961_v35, %s5673_s9  ;;  %v6230_v35 = vcombine.low %v3110_v46, %v3111_v28  ;;  %v6250_v46 = vcombine.low %v3112_v22, %v6235_v16  ;;  %8084 = vst [vmem:[#allocation13_spill] sm:$0xff] %v6263_v48  ;;  %v1969_v22 = vsel %vm524_vm0, %v1964_v60, %v1968_v18  ;;  %8085 = vst [vmem:[#allocation14_spill] sm:$0xff] %v6269_v59 }
  0x66   : > { %v1973_v60 = vsel %vm524_vm0, %v1968_v18, %v1972_v42 }
  0x67   : > { %8080 = vst [vmem:[#allocation10_spill] sm:$0xff] %v6230_v35  ;;  %8082 = vst [vmem:[#allocation11_spill] sm:$0xff] %v6250_v46  ;;  %v3172_v28 = vshll.u32 %v6230_v35, 16  ;;  %v3170_v61 = vshrl.u32 %v6230_v35, 16 }
  0x68   : > { %1926 = vrot.lane.b32.xlu1 %v6214_v57, %s5673_s9 }
  0x69   : > { %2000 = vrot.lane.b32.xlu0 %v1982_v32, %s5673_s9  ;;  %v463_v32 = vrot.slane %v8081_v6, 2  ;;  %v3174_v17 = vrot.slane %v3172_v28, 1  ;;  %v6286_v6 = vsel %vm478_vm1, %v1910_v11, %v8087_v30  ;;  %v3181_v28 = vshrl.u32 %v6250_v46, 16  ;;  %v6303_v11 = vld [vmem:[%s5732_s6 + $0x80] sm:$0xff]   ;;  %v3129_v30 = vld [vmem:[%s5732_s6 + $0x68] sm:$0xc] }
  0x6a   : > { %8088 = vst [vmem:[#allocation16_spill] sm:$0xff] %v6286_v6  ;;  %v4798_v57 = vcombine.low %v3129_v30, %v6235_v16 }
  0x6b   : > { %v6240_v43 = vor.u32 %v463_v32, %v460_v5  ;;  %v3260_v32 = vrot.slane %v6263_v48, 1 }
  0x6c   : > { %1920 = vrot.lane.b32.xlu1 %v1909_v63, %s5673_s9  ;;  %v6258_v63 = vcombine.low %v3114_v0, %v3115_v33  ;;  %v3130_v0 = vld [vmem:[%s5732_s6 + $0x70] sm:$0xc] }
  0x6d   : > { %1994 = vrot.lane.b32.xlu0 %v1965_v49, %s5673_s9  ;;  %v6256_v5 = vsel %vm432_vm4, %v6115_v3, %v6240_v43  ;;  %v3177_v3 = vshll.u32 %v6250_v46, 16  ;;  %v6277_v49 = vld [vmem:[%s5732_s6 + $0x78] sm:$0xff]  }
  0x6e   : > { %8083 = vst [vmem:[#allocation12_spill] sm:$0xff] %v6258_v63  ;;  %v6274_v4 = vrot.slane %v6258_v63, 1  ;;  %v3241_v35 = vrot.slane %v6277_v49, 1  ;;  %v8051_v42 = vshrl.u32 %v6258_v63, 16 }
  0x6f   : > { %v3179_v24 = vrot.slane %v3177_v3, 1 }
  0x70   : > { %1928 = vrot.lane.b32.xlu1 %v1917_v47, %s5673_s9  ;;  %8086 = vst [vmem:[#allocation15_spill] sm:$0xff] %v6274_v4  ;;  %v8043_v47 = vshll.u32 %v6258_v63, 16  ;;  %v3261_v39 = vsel %vm386_vm2, %v3260_v32, %v6274_v4  ;;  %v6317_v32 = vsel %vm386_vm2, %v6274_v4, %v3241_v35 }
  0x71   : > { %2002 = vrot.lane.b32.xlu0 %v1991_v53, %s5673_s9  ;;  %v3175_v53 = vor.u32 %v3174_v17, %v3170_v61  ;;  %v6309_v61 = vshrl.u32 %v6277_v49, 16  ;;  %v3183_v3 = vor.u32 %v3181_v28, %v3179_v24  ;;  %8092 = vst [vmem:[#allocation20_spill] sm:$0xff] %v6317_v32 }
  0x72   : > { %v3187_v18 = vrot.slane %v8043_v47, 1 }
  0x73   : > { %8091 = vst [vmem:[#allocation19_spill] sm:$0xff] %v6309_v61  ;;  %v3180_v17 = vsel %vm318_vm3, %v3175_v53, %v3179_v24  ;;  %v3243_v53 = vrot.slane %v6303_v11, 1  ;;  %v3379_v28 = vrot.slane %v6309_v61, 2 }
  0x74   : > { %1922 = vrot.lane.b32.xlu1 %v6269_v59, %s5673_s9  ;;  %v3191_v47 = vor.u32 %v8051_v42, %v3187_v18  ;;  %v3327_v42 = vrot.slane %v6258_v63, 2 }
  0x75   : > { %1996 = vrot.lane.b32.xlu0 %v1969_v22, %s5673_s9  ;;  %v6291_v22 = vcombine.low %v3130_v0, %v3115_v33  ;;  %v6306_v33 = vshll.u32 %v6277_v49, 16 }
  0x77   : > { %8089 = vst [vmem:[#allocation17_spill] sm:$0xff] %v6291_v22  ;;  %8090 = vst [vmem:[#allocation18_spill] sm:$0xff] %v6306_v33  ;;  %v3372_v0 = vshrl.u32 %v6291_v22, 16  ;;  %v3195_v24 = vrot.slane %v6306_v33, 1  ;;  %v3380_v48 = vrot.slane %v6306_v33, 3  ;;  %v6338_v33 = vshll.u32 %v6303_v11, 16 }
  0x78   : > { %1924 = vrot.lane.b32.xlu1 %v6286_v6, %s5673_s9  ;;  %v6335_v6 = vld [vmem:[%s5732_s6 + $0x88] sm:$0xff]  }
  0x79   : > { %1998 = vrot.lane.b32.xlu0 %v1973_v60, %s5673_s9  ;;  %v3375_v60 = vshll.u32 %v6291_v22, 16  ;;  %v3188_v22 = vsel %vm318_vm3, %v3183_v3, %v3187_v18  ;;  %v3374_v4 = vrot.slane %v3372_v0, 2  ;;  %8093 = vst [vmem:[#allocation21_spill] sm:$0xff] %v6338_v33  ;;  %v6341_v18 = vsel %vm386_vm2, %v3241_v35, %v3243_v53 }
  0x7a   : > { %8094 = vst [vmem:[#allocation22_spill] sm:$0xff] %v6341_v18  ;;  %v3326_v3 = vrot.slane %v4798_v57, 2  ;;  %v6344_v0 = vshrl.u32 %v6303_v11, 16  ;;  %v3203_v35 = vrot.slane %v6338_v33, 1 }
  0x7b   : > { %v3377_v46 = vrot.slane %v3375_v60, 3  ;;  %v272_v60 = vld [vmem:[%s5732_s6] sm:$0xe] }
  0x7c   : > { %3221 = vrot.lane.b32.xlu1 %v3180_v17, %s5673_s9  ;;  %v3381_v17 = vor.u32 %v3380_v48, %v3379_v28  ;;  %8095 = vst [vmem:[#allocation23_spill] sm:$0xff] %v6344_v0  ;;  %v6350_v48 = vrot.slane %v6335_v6, 1  ;;  %v3328_v57 = vsel %vm478_vm1, %v3326_v3, %v3327_v42  ;;  %v6373_v3 = vshrl.u32 %v6335_v6, 16 }
  0x7d   : > { %3266 = vrot.lane.b32.xlu0 %v3261_v39, %s5673_s9  ;;  %v3196_v39 = vsel %vm318_vm3, %v3191_v47, %v3195_v24  ;;  %v3378_v16 = vor.u32 %v3377_v46, %v3374_v4  ;;  %v3199_v47 = vor.u32 %v6309_v61, %v3195_v24  ;;  %v3383_v4 = vrot.slane %v6344_v0, 2  ;;  %v6366_v24 = vld [vmem:[%s5732_s6 + $0x90] sm:$0xff]  }
  0x7e   : > { %8096 = vst [vmem:[#allocation24_spill] sm:$0xff] %v6350_v48  ;;  %v6363_v30 = vsel %vm386_vm2, %v3243_v53, %v6350_v48  ;;  %v3387_v61 = vrot.slane %v6373_v3, 2  ;;  %v8099_v53 = vshll.u32 %v6258_v63, 16  ;;  %v3207_v25 = vor.u32 %v6344_v0, %v3203_v35 }
  0x7f   : > { %v3382_v46 = vsel %vm524_vm0, %v3378_v16, %v3381_v17  ;;  %8097 = vst [vmem:[#allocation25_spill] sm:$0xff] %v6363_v30  ;;  %v3204_v28 = vsel %vm318_vm3, %v3199_v47, %v3203_v35  ;;  %v6370_v16 = vshll.u32 %v6335_v6, 16  ;;  %v3262_v47 = vrot.slane %v6366_v24, 1 }
  0x80   : > { %3223 = vrot.lane.b32.xlu1 %v3188_v22, %s5673_s9  ;;  %v3384_v22 = vrot.slane %v6338_v33, 3  ;;  %v3290_v20 = vrot.slane %v8099_v53, 2  ;;  %v8100_v53 = vshrl.u32 %v6258_v63, 16  ;;  %v8101_v35 = vrot.slane %v5777_v34, 1 }
  0x81   : > { %3268 = vrot.lane.b32.xlu0 %v6317_v32, %s5673_s9  ;;  %8098 = vst [vmem:[#allocation26_spill] sm:$0xff] %v6370_v16  ;;  %v3211_v23 = vrot.slane %v6370_v16, 1 }
  0x84   : > { %3225 = vrot.lane.b32.xlu1 %v3196_v39, %s5673_s9  ;;  %v3385_v39 = vor.u32 %v3384_v22, %v3383_v4  ;;  %v5418_v4 = vld [vmem:[%s5732_s6 + $0x98] ss:$0 sps:$4 sm:$0x11]  }
  0x85   : > { %3270 = vrot.lane.b32.xlu0 %v6341_v18, %s5673_s9  ;;  %v3264_v63 = vrot.slane %v5418_v4, 1  ;;  %v3399_v4 = vshll.u32 %v5431_v19, 16 }
  0x86   : > { %v3386_v22 = vsel %vm524_vm0, %v3381_v17, %v3385_v39  ;;  %v5399_v17 = vld [vmem:[%s8028_s2] sm:$0xff]  }
  0x88   : > { %3339 = vrot.lane.b32.xlu1 %v3328_v57, %s5673_s9  ;;  %v6377_v57 = vrot.slane %v6277_v49, 2  ;;  %v5420_v49 = vld [vmem:[%s5732_s6 + $0x90] ss:$0 sps:$4 sm:$0x11]  }
  0x89   : > { %3413 = vrot.lane.b32.xlu0 %v3382_v46, %s5673_s9  ;;  %v5635_v46 = vld [vmem:[%s5732_s6 + $0x4] sm:$0xf] }
  0x8a   : > { %v4647_v33 = vcombine.low %v272_v60, %v5635_v46  ;;  %v3388_v60 = vrot.slane %v6370_v16, 3 }
  0x8c   : > { %3227 = vrot.lane.b32.xlu1 %v3204_v28, %s5673_s9  ;;  %v387_v32 = vrot.slane %v4647_v33, 1  ;;  %v3330_v28 = vsel %vm478_vm1, %v3327_v42, %v6377_v57  ;;  %v5400_v33 = vld [vmem:[%s8028_s2 + $0x48] sm:$0xff]   ;;  %v3289_v42 = vrot.slane %v8100_v53, 1  ;;  %v3396_v53 = vshrl.u32 %v5431_v19, 16  ;;  %v5405_v19 = vld [vmem:[%s8028_s2 + $0x50] sm:$0xff]  }
  0x8d   : > { %3272 = vrot.lane.b32.xlu0 %v6363_v30, %s5673_s9 }
  0x8e   : > { %v570_v18 = vpop.permute.xlu1 %569  ;;  %v389_v59 = vsel %vm386_vm2, %v387_v32, %v8101_v35 }
  0x8f   : > { %v568_v46 = vpop.permute.xlu0 %567 }
  0x90   : > { %v665_v30 = vsel %vm596_vm5, %v6023_v58, %v568_v46  ;;  %3341 = vrot.lane.b32.xlu1 %v3330_v28, %s5673_s9  ;;  %v3263_v58 = vsel %vm386_vm2, %v6350_v48, %v3262_v47  ;;  %v6410_v46 = vor.u32 %v3388_v60, %v3387_v61  ;;  %v5401_v28 = vld [vmem:[%s8028_s2 + $0x8] sm:$0xff]   ;;  %v3212_v61 = vsel %vm318_vm3, %v3207_v25, %v3211_v23 }
  0x91   : > { %1113 = vmatprep.mubr.bf16.mxu1 %v665_v30  ;;  %3415 = vrot.lane.b32.xlu0 %v3386_v22, %s5673_s9  ;;  %v3217_v60 = vshll.u32 %v5420_v49, 16  ;;  %v669_v30 = vsel %vm596_vm5, %v5826_v2, %v570_v18  ;;  %v5403_v25 = vld [vmem:[%s8028_s2 + $0x108] sm:$0xff]   ;;  %v8102_v49 = vshrl.u32 %v6366_v24, 16  ;;  %v8103_v18 = vshll.u32 %v6366_v24, 16 }
  0x92   : > { %v495_v0 = vpop.permute.xlu1 %494 }
  0x93   : > { %v493_v16 = vpop.permute.xlu0 %492  ;;  %v3391_v2 = vrot.slane %v8102_v49, 2  ;;  %v3219_v49 = vrot.slane %v3217_v60, 1 }
  0x94   : > { %v641_v22 = vsel %vm596_vm5, %v6074_v9, %v493_v16  ;;  %v5436_v9 = vld [vmem:[%s5732_s6 + $0xa0] ss:$0 sps:$4 sm:$0x77]   ;;  %v3390_v16 = vsel %vm524_vm0, %v3385_v39, %v6410_v46  ;;  %3229 = vrot.lane.b32.xlu1 %v3212_v61, %s5673_s9 }
  0x95   : > { %1114 = vmatmul.mubr.bf16.vlgmr.msra.gmra.mrb[0].mxu1 %v641_v22  ;;  %3274 = vrot.lane.b32.xlu0 %v3263_v58, %s5673_s9  ;;  %v3392_v22 = vrot.slane %v8103_v18, 3  ;;  %v5407_v58 = vld [vmem:[%s8028_s2 + $0x10] sm:$0xff]   ;;  %v3398_v18 = vrot.slane %v3396_v53, 2  ;;  %v3408_v48 = vshll.u32 %v5436_v9, 16 }
  0x96   : > { %1121 = vmatprep.mubr.bf16.mxu1 %v669_v30  ;;  %5012 = vmatpush3.bf16.msra.mxu1 %v5399_v17  ;;  %v372_v35 = vpop.permute.xlu1 %371  ;;  %v3215_v30 = vor.u32 %v6373_v3, %v3211_v23  ;;  %v6456_v23 = vor.u32 %v3290_v20, %v3289_v42  ;;  %v5411_v20 = vld [vmem:[%s8028_s2 + $0x110] sm:$0xff]  }
  0x97   : > { %v418_v32 = vpop.permute.xlu0 %417  ;;  %5013 = vmatprep.subr.bf16.mxu1 %v5400_v33  ;;  %v598_v39 = vsel %vm596_vm5, %v5785_v40, %v372_v35  ;;  %v8104_v33 = vrot.slane %v6303_v11, 2  ;;  %v3401_v40 = vrot.slane %v3399_v4, 3  ;;  %v3405_v35 = vshrl.u32 %v5436_v9, 16  ;;  %v5416_v11 = vld [vmem:[%s8028_s2 + $0x68] sm:$0xff]  }
  0x98   : > { %v617_v17 = vsel %vm596_vm5, %v389_v59, %v418_v32  ;;  %v3265_v59 = vsel %vm386_vm2, %v3262_v47, %v3264_v63  ;;  %v3393_v32 = vor.u32 %v3392_v22, %v3391_v2  ;;  %v645_v63 = vsel %vm596_vm5, %v6110_v38, %v495_v0  ;;  %v5410_v38 = vld [vmem:[%s8028_s2 + $0x18] sm:$0xff]   ;;  %v5413_v22 = vld [vmem:[%s8028_s2 + $0x60] sm:$0xff]  }
  0x99   : > { %1032 = vmatprep.mubr.bf16.mxu0 %v617_v17  ;;  %3417 = vrot.lane.b32.xlu0 %v3390_v16, %s5673_s9  ;;  %v6453_v61 = vsel %vm478_vm1, %v6377_v57, %v8104_v33  ;;  %v5409_v17 = vld [vmem:[%s8028_s2 + $0x58] sm:$0xff]   ;;  %v3333_v0 = vrot.slane %v6335_v6, 2  ;;  %v3402_v53 = vor.u32 %v3401_v40, %v3398_v18  ;;  %v3407_v4 = vrot.slane %v3405_v35, 2 }
  0x9a   : > { %1033 = vmatmul.mubr.bf16.vlgmr.msra.gmra.mrb[0].mxu0 %v598_v39  ;;  %5014 = vmatpush3.bf16.msra.mxu1 %v5401_v28  ;;  %v497_v16 = vpop.permute.xlu1 %496  ;;  %v3394_v28 = vsel %vm524_vm0, %v6410_v46, %v3393_v32  ;;  %v3410_v9 = vrot.slane %v3408_v48, 3  ;;  %v5421_v48 = vld [vmem:[%s8028_s2 + $0x118] sm:$0xff]   ;;  %v8106_v46 = vmov %v8104_v33 }
  0x9b   : > { %v572_v60 = vpop.permute.xlu0 %571  ;;  %5240 = vmatpush3.bf16.msra.mxu0 %v6163_v45  ;;  %5015 = vmatprep.subr.bf16.mxu1 %v5405_v19  ;;  %v8105_v45 = vrot.slane %v5777_v34, 1  ;;  %v5437_v19 = vld [vmem:[%s5732_s6 + $0x98] ss:$0 sps:$4 sm:$0x33]   ;;  %v649_v18 = vsel %vm596_vm5, %v6113_v50, %v497_v16  ;;  %v5417_v16 = vld [vmem:[%s8028_s2 + $0x28] sm:$0xff]  }
  0x9c   : > { %v673_v47 = vsel %vm596_vm5, %v5854_v26, %v572_v60  ;;  %5241 = vmatprep.subr.bf16.mxu0 %v5403_v25  ;;  %3343 = vrot.lane.b32.xlu1 %v6453_v61, %s5673_s9  ;;  %v3220_v26 = vsel %vm318_vm3, %v3215_v30, %v3219_v49  ;;  %v3403_v30 = vsel %vm524_vm0, %v3393_v32, %v3402_v53  ;;  %v5427_v32 = vld [vmem:[%s8028_s2 + $0xc0] sm:$0xff]   ;;  %v6520_v35 = vld [vmem:[%s5732_s6 + $0x38] sm:$0xff]  }
  0x9d   : > { %1122 = vmatmul.mubr.bf16.gmra.mrb[4].mxu1 %v645_v63  ;;  %v391_v42 = vsel %vm386_vm2, %v8105_v45, %v5791_v44  ;;  %3276 = vrot.lane.b32.xlu0 %v3265_v59, %s5673_s9  ;;  %v3411_v49 = vor.u32 %v3410_v9, %v3407_v4  ;;  %v517_v60 = vrot.slane %v6520_v35, 2  ;;  %v5419_v45 = vld [vmem:[%s8028_s2 + $0x70] sm:$0xff]  }
  0x9e   : > { %1129 = vmatprep.mubr.bf16.mxu1 %v673_v47  ;;  %5016 = vmatpush3.bf16.msra.mxu1 %v5407_v58  ;;  %v374_v2 = vpop.permute.xlu1 %373  ;;  %v6501_v58 = vrot.slane %v6366_v24, 2 }
  0x9f   : > { %v420_v44 = vpop.permute.xlu0 %419  ;;  %5242 = vmatpush3.bf16.msra.mxu0 %v5403_v25  ;;  %5017 = vmatprep.subr.bf16.mxu1 %v5409_v17  ;;  %v601_v6 = vsel %vm596_vm5, %v5777_v34, %v374_v2  ;;  %v6498_v25 = vsel %vm478_vm1, %v8106_v46, %v3333_v0  ;;  %v5415_v34 = vld [vmem:[%s8028_s2 + $0x20] sm:$0xff]   ;;  %v3412_v63 = vsel %vm524_vm0, %v3402_v53, %v3411_v49  ;;  %v6565_v46 = vld [vmem:[%s5732_s6 + $0x18] sm:$0xff]  }
  0xa0   : > { %v621_v39 = vsel %vm596_vm5, %v391_v42, %v420_v44  ;;  %5243 = vmatprep.subr.bf16.mxu0 %v5411_v20  ;;  %3231 = vrot.lane.b32.xlu1 %v3220_v26, %s5673_s9  ;;  %v5414_v17 = vld [vmem:[%s5732_s6 + $0x40] ss:$0 sps:$4 sm:$0x33]   ;;  %v6527_v50 = vsel %vm478_vm1, %v3333_v0, %v6501_v58  ;;  %v518_v26 = vsel %vm478_vm1, %v5872_v36, %v517_v60  ;;  %v5424_v36 = vld [vmem:[%s8028_s2 + $0x78] sm:$0xff]  }
  0xa1   : > { %1040 = vmatprep.mubr.bf16.mxu0 %v621_v39  ;;  %3419 = vrot.lane.b32.xlu0 %v3394_v28, %s5673_s9  ;;  %v519_v53 = vrot.slane %v5414_v17, 2  ;;  %v5637_v44 = vld [vmem:[%s5732_s6 + $0x38] ss:$0 sps:$4 sm:$0x33]  }
  0xa2   : > { %1041 = vmatmul.mubr.bf16.gmra.mrb[4].mxu0 %v601_v6  ;;  %5018 = vmatpush3.bf16.msra.mxu1 %v5410_v38  ;;  %v499_v59 = vpop.permute.xlu1 %498  ;;  %v467_v2 = vshrl.u32 %v5637_v44, 16  ;;  %v5425_v39 = vld [vmem:[%s8028_s2 + $0x38] sm:$0xff]  }
  0xa3   : > { %v574_v33 = vpop.permute.xlu0 %573  ;;  %5244 = vmatpush3.bf16.msra.mxu0 %v5411_v20  ;;  %5019 = vmatprep.subr.bf16.mxu1 %v5413_v22  ;;  %v653_v4 = vsel %vm596_vm5, %v6131_v8, %v499_v59  ;;  %v470_v22 = vshll.u32 %v5637_v44, 16  ;;  %v5639_v59 = vld [vmem:[%s5732_s6 + $0x34] sm:$0xf] }
  0xa4   : > { %v677_v40 = vsel %vm596_vm5, %v5889_v52, %v574_v33  ;;  %5245 = vmatprep.subr.bf16.mxu0 %v5421_v48  ;;  %3345 = vrot.lane.b32.xlu1 %v6498_v25, %s5673_s9  ;;  %v3337_v52 = vrot.slane %v5437_v19, 2  ;;  %v1702_v19 = vld [vmem:[%s5732_s6 + $0x30] sm:$0xe]  ;;  %v469_v49 = vrot.slane %v467_v2, 1  ;;  %v584_v2 = vrot.slane %v6565_v46, 3 }
  0xa5   : > { %1130 = vmatmul.mubr.bf16.gmra.mrb[8].mxu1 %v649_v18  ;;  %3421 = vrot.lane.b32.xlu0 %v3403_v30, %s5673_s9  ;;  %v520_v30 = vsel %vm478_vm1, %v517_v60, %v519_v53  ;;  %v472_v33 = vrot.slane %v470_v22, 2  ;;  %v1281_v53 = vld [vmem:[%s6582_s27 + $0x10] sm:$0xff] }
  0xa6   : > { %1137 = vmatprep.mubr.bf16.mxu1 %v677_v40  ;;  %5020 = vmatpush3.bf16.msra.mxu1 %v5415_v34  ;;  %v376_v20 = vpop.permute.xlu1 %375  ;;  %v3338_v0 = vsel %vm478_vm1, %v6501_v58, %v3337_v52  ;;  %v1816_v40 = vrot.slane %v5926_v21, 1  ;;  %v284_v52 = vld [vmem:[%s5732_s6 + $0x10] sm:$0x8] }
  0xa7   : > { %v422_v47 = vpop.permute.xlu0 %421  ;;  %5021 = vmatprep.subr.bf16.mxu1 %v5416_v11  ;;  %5246 = vmatpush3.bf16.msra.mxu0 %v5421_v48  ;;  %v604_v38 = vsel %vm596_vm5, %v5754_v13, %v376_v20  ;;  %v5422_v13 = vld [vmem:[%s8028_s2 + $0x30] sm:$0xff]   ;;  %v4720_v11 = vcombine.low %v1702_v19, %v5639_v59  ;;  %v1282_v19 = vld [vmem:[%s6582_s27 + $0x18] sm:$0xff] }
  0xa8   : > { %v625_v42 = vsel %vm596_vm5, %v5842_v7, %v422_v47  ;;  %5063 = vmatprep.subr.bf16.mxu0 %v5427_v32  ;;  %3347 = vrot.lane.b32.xlu1 %v6527_v50, %s5673_s9 }
  0xa9   : > { %1048 = vmatprep.mubr.bf16.mxu0 %v625_v42  ;;  %3423 = vrot.lane.b32.xlu0 %v3412_v63, %s5673_s9  ;;  %v1815_v63 = vrot.slane %v4720_v11, 1  ;;  %v5641_v42 = vld [vmem:[%s5732_s6 + $0x14] sm:$0xf] }
  0xaa   : > { %1049 = vmatmul.mubr.bf16.gmra.mrb[8].mxu0 %v604_v38  ;;  %5022 = vmatpush3.bf16.msra.mxu1 %v5417_v16  ;;  %v501_v28 = vpop.permute.xlu1 %500  ;;  %v473_v16 = vor.u32 %v472_v33, %v469_v49  ;;  %v4657_v38 = vcombine.low %v284_v52, %v5641_v42  ;;  %v1284_v49 = vld [vmem:[%s6582_s27 + $0x28] sm:$0xff]  ;;  %v1285_v33 = vld [vmem:[%s6582_s27 + $0x30] sm:$0xff]  ;;  %v1286_v52 = vld [vmem:[%s6582_s27 + $0x38] sm:$0xff] }
  0xab   : > { %v576_v7 = vpop.permute.xlu0 %575  ;;  %5023 = vmatprep.subr.bf16.mxu1 %v5419_v45  ;;  %v657_v17 = vsel %vm596_vm5, %v6256_v5, %v501_v28  ;;  %v1288_v42 = vld [vmem:[%s6582_s27 + $0x48] sm:$0xff] }
  0xac   : > { %v681_v9 = vsel %vm596_vm5, %v518_v26, %v576_v7  ;;  %3349 = vrot.lane.b32.xlu1 %v3338_v0, %s5673_s9  ;;  %v1279_v26 = vld [vmem:[%s6582_s27] sm:$0xff]  ;;  %v474_v0 = vsel %vm432_vm4, %v6240_v43, %v473_v16  ;;  %v5642_v7 = vld [vmem:[%s5732_s6 + $0x30] ss:$0 sps:$4 sm:$0x11]   ;;  %v583_v44 = vrot.slane %v4657_v38, 3 }
  0xad   : > { %1138 = vmatmul.mubr.bf16.gmra.mrb[12].mxu1 %v653_v4  ;;  %v398_v28 = vrot.slane %v5642_v7, 1  ;;  %1303 = vrot.lane.b32.xlu0 %v1279_v26, %s5674_s28  ;;  %v1287_v16 = vld [vmem:[%s6582_s27 + $0x40] sm:$0xff]  ;;  %v5644_v38 = vld [vmem:[%s5732_s6 + $0x30] sm:$0xff]  }
  0xae   : > { %1145 = vmatprep.mubr.bf16.mxu1 %v681_v9  ;;  %5024 = vmatpush3.bf16.msra.mxu1 %v5422_v13  ;;  %v378_v48 = vpop.permute.xlu1 %377  ;;  %v1817_v13 = vsel %vm386_vm2, %v1815_v63, %v1816_v40  ;;  %v590_v26 = vrot.slane %v5644_v38, 3 }
  0xaf   : > { %v424_v6 = vpop.permute.xlu0 %423  ;;  %5025 = vmatprep.subr.bf16.mxu1 %v5424_v36  ;;  %v607_v34 = vsel %vm596_vm5, %v6565_v46, %v378_v48  ;;  %v399_v22 = vsel %vm386_vm2, %v5892_v54, %v398_v28  ;;  %v1819_v54 = vsel %vm386_vm2, %v1816_v40, %v5967_v55  ;;  %v5428_v55 = vld [vmem:[%s8028_s2 + $0x80] sm:$0xff]   ;;  %v592_v28 = vrot.slane %v6520_v35, 3  ;;  %v5435_v35 = vld [vmem:[%s8028_s2 + $0x98] sm:$0xff]  }
  0xb0   : > { %v629_v8 = vsel %vm596_vm5, %v5869_v10, %v424_v6 }
  0xb1   : > { %1056 = vmatprep.mubr.bf16.mxu0 %v629_v8  ;;  %1307 = vrot.lane.b32.xlu0 %v1281_v53, %s5674_s28  ;;  %v1289_v53 = vld [vmem:[%s6582_s27 + $0x50] sm:$0xff] }
  0xb2   : > { %1057 = vmatmul.mubr.bf16.gmra.mrb[12].mxu0 %v607_v34  ;;  %5026 = vmatpush3.bf16.msra.mxu1 %v5425_v39  ;;  %v503_v10 = vpop.permute.xlu1 %502  ;;  %v1283_v39 = vld [vmem:[%s6582_s27 + $0x20] sm:$0xff]  ;;  %v5643_v34 = vld [vmem:[%s5732_s6 + $0x28] sm:$0xff]  }
  0xb3   : > { %v578_v18 = vpop.permute.xlu0 %577  ;;  %5299 = vmatprep.subr.bf16.mxu1 %v5427_v32  ;;  %v6587_v32 = vld [vmem:[%s5732_s6 + $0x20] sm:$0xff]   ;;  %v661_v9 = vsel %vm596_vm5, %v474_v0, %v503_v10 }
  0xb4   : > { %v685_v60 = vsel %vm596_vm5, %v520_v30, %v578_v18  ;;  %v585_v30 = vsel %vm582_vm6, %v583_v44, %v584_v2  ;;  %v586_v11 = vrot.slane %v6587_v32, 3  ;;  %v1941_v44 = vrot.slane %v6095_v29, 2 }
  0xb5   : > { %1146 = vmatmul.mubr.bf16.gmra.mrb[16].mxu1 %v657_v17  ;;  %1311 = vrot.lane.b32.xlu0 %v1283_v39, %s5674_s28  ;;  %v588_v17 = vrot.slane %v5643_v34, 3 }
  0xb6   : > { %1153 = vmatprep.mubr.bf16.mxu1 %v685_v60  ;;  %v380_v20 = vpop.permute.xlu1 %379  ;;  %v5429_v60 = vld [vmem:[%s8028_s2 + $0xc8] sm:$0xff]  }
  0xb7   : > { %v426_v47 = vpop.permute.xlu0 %425  ;;  %v610_v45 = vsel %vm596_vm5, %v6587_v32, %v380_v20  ;;  %v5430_v20 = vld [vmem:[%s8028_s2 + $0x88] sm:$0xff]  }
  0xb8   : > { %v633_v5 = vsel %vm596_vm5, %v5922_v14, %v426_v47  ;;  %v1280_v14 = vld [vmem:[%s6582_s27 + $0x8] sm:$0xff] }
  0xb9   : > { %1064 = vmatprep.mubr.bf16.mxu0 %v633_v5  ;;  %1305 = vrot.lane.b32.xlu1 %v1280_v14, %s5674_s28  ;;  %v589_v5 = vsel %vm582_vm6, %v586_v11, %v588_v17  ;;  %v5434_v14 = vld [vmem:[%s8028_s2 + $0xd8] sm:$0xff]  }
  0xba   : > { %1065 = vmatmul.mubr.bf16.gmra.mrb[16].mxu0 %v610_v45  ;;  %v1801_v4 = vpop.permute.xlu1 %1800  ;;  %1315 = vrot.lane.b32.xlu0 %v1285_v33, %s5674_s28  ;;  %v5432_v45 = vld [vmem:[%s8028_s2 + $0xd0] sm:$0xff]   ;;  %v6701_v33 = vld [vmem:[%s5732_s6 + $0x48] sm:$0xff]  }
  0xbb   : > { %v1846_v36 = vpop.permute.xlu0 %1845  ;;  %v2021_v10 = vsel %vm596_vm5, %v5900_v62, %v1801_v4  ;;  %v587_v62 = vsel %vm582_vm6, %v584_v2, %v586_v11  ;;  %v5442_v11 = vld [vmem:[%s8028_s2 + $0xf0] sm:$0xff]  }
  0xbc   : > { %v2040_v43 = vsel %vm596_vm5, %v1817_v13, %v1846_v36  ;;  %v591_v36 = vsel %vm582_vm6, %v588_v17, %v590_v26 }
  0xbd   : > { %1154 = vmatmul.mubr.bf16.gmra.mrb[20].mxu1 %v661_v9  ;;  %1309 = vrot.lane.b32.xlu1 %v1282_v19, %s5674_s28  ;;  %v593_v9 = vsel %vm582_vm6, %v590_v26, %v592_v28  ;;  %v5645_v19 = vld [vmem:[%s5732_s6 + $0x40] ss:$0 sps:$4 sm:$0x77]  }
  0xbe   : > { %2455 = vmatprep.mubr.bf16.mxu1 %v2040_v43  ;;  %v382_v48 = vpop.permute.xlu1 %381  ;;  %1319 = vrot.lane.b32.xlu0 %v1287_v16, %s5674_s28  ;;  %v594_v39 = vrot.slane %v5645_v19, 3  ;;  %v6722_v16 = vld [vmem:[%s8028_s2 + $0x100] sm:$0xff]  }
  0xbf   : > { %v428_v6 = vpop.permute.xlu0 %427  ;;  %v613_v46 = vsel %vm596_vm5, %v5643_v34, %v382_v48  ;;  %v5439_v48 = vld [vmem:[%s8028_s2 + $0xa0] sm:$0xff]  }
  0xc0   : > { %v637_v8 = vsel %vm596_vm5, %v399_v22, %v428_v6  ;;  %v5438_v22 = vld [vmem:[%s8028_s2 + $0xe0] sm:$0xff]  }
  0xc1   : > { %1072 = vmatprep.mubr.bf16.mxu0 %v637_v8  ;;  %1313 = vrot.lane.b32.xlu1 %v1284_v49, %s5674_s28  ;;  %v1942_v8 = vsel %vm478_vm1, %v1941_v44, %v6207_v12  ;;  %v1864_v49 = vshll.u32 %v5953_v37, 16  ;;  %v5446_v26 = vld [vmem:[%s8028_s2 + $0x40] sm:$0xff]  }
  0xc2   : > { %1073 = vmatmul.mubr.bf16.gmra.mrb[20].mxu0 %v613_v46  ;;  %v1803_v18 = vpop.permute.xlu1 %1802  ;;  %1323 = vrot.lane.b32.xlu0 %v1289_v53, %s5674_s28 }
  0xc3   : > { %5247 = vmatprep.mubr.msk.bf16.mxu0 %vm596_vm5, %v585_v30  ;;  %v1848_v59 = vpop.permute.xlu0 %1847  ;;  %v2024_v32 = vsel %vm596_vm5, %v5926_v21, %v1803_v18  ;;  %v5433_v21 = vld [vmem:[%s8028_s2 + $0x90] sm:$0xff]   ;;  %v5441_v30 = vld [vmem:[%s8028_s2 + $0xa8] sm:$0xff]  }
  0xc4   : > { %v2044_v40 = vsel %vm596_vm5, %v1819_v54, %v1848_v59  ;;  %v1861_v54 = vshrl.u32 %v5953_v37, 16 }
  0xc5   : > { %2456 = vmatmul.mubr.bf16.vlgmr.msra.gmra.mrb[24].mxu1 %v2021_v10  ;;  %1317 = vrot.lane.b32.xlu1 %v1286_v52, %s5674_s28  ;;  %v5443_v10 = vld [vmem:[%s8028_s2 + $0xb0] sm:$0xff]  }
  0xc6   : > { %2463 = vmatprep.mubr.bf16.mxu1 %v2044_v40  ;;  %5307 = vmatpush3.bf16.msra.mxu1 %v5428_v55  ;;  %v1805_v47 = vpop.permute.xlu1 %1804  ;;  %v1866_v40 = vrot.slane %v1864_v49, 2 }
  0xc7   : > { %v1850_v63 = vpop.permute.xlu0 %1849  ;;  %5300 = vmatprep.subr.bf16.mxu1 %v5429_v60  ;;  %v2027_v2 = vsel %vm596_vm5, %v5943_v31, %v1805_v47  ;;  %v5440_v31 = vld [vmem:[%s8028_s2 + $0xe8] sm:$0xff]  }
  0xc8   : > { %v2048_v0 = vsel %vm596_vm5, %v6058_v15, %v1850_v63  ;;  %v1290_v15 = vld [vmem:[%s6582_s27 + $0x58] sm:$0xff] }
  0xc9   : > { %1321 = vrot.lane.b32.xlu1 %v1288_v42, %s5674_s28 }
  0xca   : > { %5248 = vmatmul.mubr.msk.bf16.vlgmr.msra.gmra.mrb[24].mxu0 %vm596_vm5, %v587_v62  ;;  %5308 = vmatpush3.bf16.msra.mxu1 %v5430_v20  ;;  %v1807_v7 = vpop.permute.xlu1 %1806  ;;  %v5445_v62 = vld [vmem:[%s8028_s2 + $0xb8] sm:$0xff]  }
  0xcb   : > { %5064 = vmatpush3.bf16.msra.mxu0 %v5428_v55  ;;  %5251 = vmatprep.mubr.msk.bf16.mxu0 %vm596_vm5, %v589_v5  ;;  %v1852_v13 = vpop.permute.xlu0 %1851  ;;  %v2030_v59 = vsel %vm596_vm5, %v6701_v33, %v1807_v7  ;;  %v1863_v55 = vrot.slane %v1861_v54, 1  ;;  %v8109_v7 = vld [vmem:[#allocation2_spill] sm:$0xff] }
  0xcc   : > { %5065 = vmatprep.subr.bf16.mxu0 %v5429_v60  ;;  %5301 = vmatprep.subr.bf16.mxu1 %v5432_v45  ;;  %v2052_v29 = vsel %vm596_vm5, %v6089_v1, %v1852_v13  ;;  %v595_v1 = vsel %vm582_vm6, %v592_v28, %v594_v39  ;;  %v5444_v60 = vld [vmem:[%s8028_s2 + $0xf8] sm:$0xff]  }
  0xcd   : > { %2464 = vmatmul.mubr.bf16.gmra.mrb[28].mxu1 %v2024_v32  ;;  %1325 = vrot.lane.b32.xlu1 %v1290_v15, %s5674_s28  ;;  %v1867_v63 = vor.u32 %v1866_v40, %v1863_v55  ;;  %v8111_v39 = vld [vmem:[#allocation5_spill] sm:$0xff] }
  0xce   : > { %2471 = vmatprep.mubr.bf16.mxu1 %v2048_v0  ;;  %5309 = vmatpush3.bf16.msra.mxu1 %v5433_v21  ;;  %v6667_v43 = vpop.permute.xlu1 %1808  ;;  %v8108_v0 = vld [vmem:[#allocation3_spill] sm:$0xff] }
  0xcf   : > { %5066 = vmatpush3.bf16.msra.mxu0 %v5430_v20  ;;  %v1854_v4 = vpop.permute.xlu0 %1853  ;;  %5302 = vmatprep.subr.bf16.mxu1 %v5434_v14  ;;  %v8107_v20 = vld [vmem:[#allocation6_spill] sm:$0xff]  ;;  %v1871_v38 = vsel %vm432_vm4, %v1867_v63, %v6217_v51  ;;  %v1872_v13 = vrot.slane %v8108_v0, 1  ;;  %v5451_v63 = vld [vmem:[%s8028_s2 + $0x10] sm:$0xff]  }
  0xd0   : > { %5067 = vmatprep.subr.bf16.mxu0 %v5432_v45  ;;  %v2056_v18 = vsel %vm596_vm5, %v6140_v27, %v1854_v4  ;;  %v5647_v27 = vld [vmem:[%s5732_s6 + $0x60] ss:$0 sps:$4 sm:$0x11]   ;;  %v6733_v45 = vld [vmem:[%s5732_s6 + $0x50] sm:$0xff]   ;;  %v1880_v4 = vrot.slane %v6144_v41, 1 }
  0xd1   : > { %v1826_v52 = vrot.slane %v5647_v27, 1  ;;  %v2033_v42 = vsel %vm596_vm5, %v6733_v45, %v6667_v43  ;;  %v5448_v43 = vld [vmem:[%s8028_s2 + $0x48] sm:$0xff]  }
  0xd2   : > { %5252 = vmatmul.mubr.msk.bf16.gmra.mrb[28].mxu0 %vm596_vm5, %v591_v36  ;;  %5310 = vmatpush3.bf16.msra.mxu1 %v5435_v35  ;;  %v6690_v34 = vpop.permute.xlu1 %1810  ;;  %v5447_v36 = vld [vmem:[%s8028_s2] sm:$0xff]  }
  0xd3   : > { %5068 = vmatpush3.bf16.msra.mxu0 %v5433_v21  ;;  %5255 = vmatprep.mubr.msk.bf16.mxu0 %vm596_vm5, %v593_v9  ;;  %v1856_v6 = vpop.permute.xlu0 %1855  ;;  %v1827_v5 = vsel %vm386_vm2, %v8107_v20, %v1826_v52  ;;  %v1873_v21 = vrot.slane %v8109_v7, 2  ;;  %v5455_v7 = vld [vmem:[%s8028_s2 + $0x18] sm:$0xff]  }
  0xd4   : > { %5069 = vmatprep.subr.bf16.mxu0 %v5434_v14  ;;  %5303 = vmatprep.subr.bf16.mxu1 %v5438_v22  ;;  %v2060_v28 = vsel %vm596_vm5, %v1827_v5, %v1856_v6  ;;  %v6747_v14 = vld [vmem:[%s5732_s6 + $0x68] sm:$0xff]  }
  0xd5   : > { %2472 = vmatmul.mubr.bf16.gmra.mrb[32].mxu1 %v2027_v2  ;;  %v1943_v53 = vrot.slane %v6747_v14, 2  ;;  %v8110_v2 = vld [vmem:[#allocation14_spill] sm:$0xff]  ;;  %v1874_v19 = vor.u32 %v1873_v21, %v1872_v13  ;;  %v5456_v21 = vld [vmem:[%s8028_s2 + $0x108] sm:$0xff]  }
  0xd6   : > { %2479 = vmatprep.mubr.bf16.mxu1 %v2052_v29  ;;  %5311 = vmatpush3.bf16.msra.mxu1 %v5439_v48  ;;  %v1919_v17 = vpop.permute.xlu1 %1918  ;;  %v8112_v29 = vshrl.u32 %v8111_v39, 16 }
  0xd7   : > { %5070 = vmatpush3.bf16.msra.mxu0 %v5435_v35  ;;  %v1993_v46 = vpop.permute.xlu0 %1992  ;;  %5304 = vmatprep.subr.bf16.mxu1 %v5440_v31  ;;  %v2064_v15 = vsel %vm596_vm5, %v1871_v38, %v1919_v17  ;;  %v1881_v35 = vrot.slane %v6125_v56, 2  ;;  %v8114_v56 = vld [vmem:[#allocation8_spill] sm:$0xff]  ;;  %v1875_v49 = vsel %vm432_vm4, %v6217_v51, %v1874_v19 }
  0xd8   : > { %5071 = vmatprep.subr.bf16.mxu0 %v5438_v22  ;;  %v2088_v12 = vsel %vm596_vm5, %v1942_v8, %v1993_v46  ;;  %v1887_v6 = vrot.slane %v8112_v29, 1  ;;  %v5454_v8 = vld [vmem:[%s5732_s6 + $0x70] ss:$0 sps:$4 sm:$0x33]   ;;  %v5449_v46 = vld [vmem:[%s8028_s2 + $0x8] sm:$0xff]  }
  0xd9   : > { %v1945_v52 = vrot.slane %v5454_v8, 2 }
  0xda   : > { %5256 = vmatmul.mubr.msk.bf16.gmra.mrb[32].mxu0 %vm596_vm5, %v595_v1  ;;  %5312 = vmatpush3.bf16.msra.mxu1 %v5441_v30  ;;  %v6729_v32 = vpop.permute.xlu1 %1926  ;;  %v6768_v1 = vor.u32 %v1881_v35, %v1880_v4  ;;  %v2702_v4 = vld [vmem:[%s6582_s27 + $0x60] sm:$0xff] }
  0xdb   : > { %5072 = vmatpush3.bf16.msra.mxu0 %v5439_v48  ;;  %2536 = vmatprep.mubr.bf16.mxu0 %v2088_v12  ;;  %v6710_v37 = vpop.permute.xlu0 %2000  ;;  %v8113_v48 = vshll.u32 %v8111_v39, 16  ;;  %v5450_v12 = vld [vmem:[%s8028_s2 + $0x50] sm:$0xff]   ;;  %v1946_v13 = vsel %vm478_vm1, %v1943_v53, %v1945_v52  ;;  %v2706_v52 = vld [vmem:[%s6582_s27 + $0x80] sm:$0xff] }
  0xdc   : > { %5073 = vmatprep.subr.bf16.mxu0 %v5440_v31  ;;  %5305 = vmatprep.subr.bf16.mxu1 %v5442_v11  ;;  %v1944_v31 = vsel %vm478_vm1, %v8114_v56, %v1943_v53  ;;  %v2008_v56 = vrot.slane %v6701_v33, 3  ;;  %v2705_v33 = vld [vmem:[%s6582_s27 + $0x78] sm:$0xff] }
  0xdd   : > { %2480 = vmatmul.mubr.bf16.gmra.mrb[36].mxu1 %v2030_v59  ;;  %v1890_v41 = vrot.slane %v8113_v48, 2  ;;  %v8115_v59 = vld [vmem:[#allocation7_spill] sm:$0xff]  ;;  %v2104_v40 = vsel %vm596_vm5, %v1944_v31, %v6710_v37  ;;  %v5453_v37 = vld [vmem:[%s8028_s2 + $0x58] sm:$0xff]   ;;  %2726 = vrot.lane.b32.xlu0 %v2702_v4, %s5674_s28  ;;  %v5458_v48 = vld [vmem:[%s8028_s2 + $0x20] sm:$0xff]  }
  0xde   : > { %2487 = vmatprep.mubr.bf16.mxu1 %v2056_v18  ;;  %5313 = vmatpush3.bf16.msra.mxu1 %v5443_v10  ;;  %v1921_v44 = vpop.permute.xlu1 %1920  ;;  %v8116_v18 = vld [vmem:[#allocation4_spill] sm:$0xff]  ;;  %v5460_v31 = vld [vmem:[%s8028_s2 + $0x68] sm:$0xff]  }
  0xdf   : > { %5074 = vmatpush3.bf16.msra.mxu0 %v5441_v30  ;;  %5306 = vmatprep.subr.bf16.mxu1 %v5444_v60  ;;  %v1995_v47 = vpop.permute.xlu0 %1994  ;;  %v6774_v30 = vld [vmem:[%s5732_s6 + $0x58] sm:$0xff]   ;;  %v1891_v55 = vor.u32 %v1890_v41, %v1887_v6  ;;  %v5472_v4 = vld [vmem:[%s8028_s2 + $0x88] sm:$0xff]  }
  0xe0   : > { %5075 = vmatprep.subr.bf16.mxu0 %v5442_v11  ;;  %v2092_v22 = vsel %vm596_vm5, %v8110_v2, %v1995_v47  ;;  %v2036_v54 = vsel %vm596_vm5, %v6774_v30, %v6690_v34  ;;  %v1876_v11 = vrot.slane %v8115_v59, 1  ;;  %v5651_v34 = vld [vmem:[%s5732_s6 + $0x68] ss:$0 sps:$4 sm:$0x33]   ;;  %v8117_v47 = vld [vmem:[#allocation16_spill] sm:$0xff] }
  0xe1   : > { %v1897_v27 = vshll.u32 %v5651_v34, 16  ;;  %v1892_v38 = vsel %vm432_vm4, %v6768_v1, %v1891_v55  ;;  %v2703_v2 = vld [vmem:[%s6582_s27 + $0x68] sm:$0xff] }
  0xe2   : > { %5314 = vmatpush3.bf16.msra.mxu1 %v5445_v62  ;;  %v6789_v51 = vpop.permute.xlu1 %1928  ;;  %v2080_v35 = vsel %vm596_vm5, %v1892_v38, %v6729_v32  ;;  %2728 = vrot.lane.b32.xlu1 %v2703_v2, %s5674_s28  ;;  %v5653_v32 = vld [vmem:[%s5732_s6 + $0x64] sm:$0xf]  ;;  %v8119_v59 = vld [vmem:[#allocation11_spill] sm:$0xff] }
  0xe3   : > { %5076 = vmatpush3.bf16.msra.mxu0 %v5443_v10  ;;  %5259 = vmatprep.subr.bf16.mxu1 %v6722_v16  ;;  %v2003_v9 = vpop.permute.xlu0 %2002  ;;  %v1877_v10 = vrot.slane %v8116_v18, 2  ;;  %v1899_v0 = vrot.slane %v1897_v27, 2  ;;  %v5461_v18 = vld [vmem:[%s8028_s2 + $0x28] sm:$0xff]   ;;  %v2710_v2 = vld [vmem:[%s6582_s27 + $0xa0] sm:$0xff] }
  0xe4   : > { %5077 = vmatprep.subr.bf16.mxu0 %v5444_v60  ;;  %v1894_v60 = vshrl.u32 %v5651_v34, 16 }
  0xe5   : > { %2488 = vmatmul.mubr.bf16.gmra.mrb[40].mxu1 %v2033_v42  ;;  %v1878_v5 = vor.u32 %v1877_v10, %v1876_v11  ;;  %v1714_v42 = vld [vmem:[%s5732_s6 + $0x40] sm:$0x8]  ;;  %v3237_v11 = vrot.slane %v8119_v59, 1  ;;  %v5462_v10 = vld [vmem:[%s8028_s2 + $0x118] sm:$0xff]  }
  0xe6   : > { %2495 = vmatprep.mubr.bf16.mxu1 %v2060_v28  ;;  %v5652_v28 = vld [vmem:[%s5732_s6 + $0x44] sm:$0xf]  ;;  %v1923_v53 = vpop.permute.xlu1 %1922  ;;  %2732 = vrot.lane.b32.xlu1 %v2705_v33, %s5674_s28  ;;  %v5655_v33 = vld [vmem:[%s5732_s6 + $0x70] ss:$0 sps:$4 sm:$0x77]  }
  0xe7   : > { %5078 = vmatpush3.bf16.msra.mxu0 %v5445_v62  ;;  %v1997_v17 = vpop.permute.xlu0 %1996  ;;  %v2068_v62 = vsel %vm596_vm5, %v1875_v49, %v1921_v44  ;;  %v5457_v44 = vld [vmem:[%s8028_s2 + $0x60] sm:$0xff]   ;;  %v1883_v34 = vsel %vm432_vm4, %v1878_v5, %v6768_v1 }
  0xe8   : > { %5125 = vmatprep.subr.bf16.mxu0 %v5446_v26  ;;  %v2096_v20 = vsel %vm596_vm5, %v8117_v47, %v1997_v17  ;;  %v1896_v26 = vrot.slane %v1894_v60, 1  ;;  %v5463_v60 = vld [vmem:[%s8028_s2 + $0x70] sm:$0xff]   ;;  %v5466_v47 = vld [vmem:[%s8028_s2 + $0xc0] sm:$0xff]  }
  0xea   : > { %2537 = vmatmul.mubr.bf16.vlgmr.msra.gmra.mrb[36].mxu0 %v2064_v15  ;;  %v4730_v15 = vcombine.low %v1714_v42, %v5652_v28  ;;  %v1900_v39 = vor.u32 %v1899_v0, %v1896_v26  ;;  %v1925_v17 = vpop.permute.xlu1 %1924  ;;  %v2708_v0 = vld [vmem:[%s6582_s27 + $0x90] sm:$0xff]  ;;  %v5473_v28 = vld [vmem:[%s8028_s2 + $0x100] sm:$0xff]  }
  0xeb   : > { %5126 = vmatpush3.bf16.msra.mxu0 %v5447_v36  ;;  %2544 = vmatprep.mubr.bf16.mxu0 %v2092_v22  ;;  %v3123_v36 = vld [vmem:[%s5732_s6 + $0x60] sm:$0xe]  ;;  %v2108_v22 = vsel %vm596_vm5, %v1946_v13, %v2003_v9  ;;  %v1999_v29 = vpop.permute.xlu0 %1998  ;;  %v5459_v9 = vld [vmem:[%s8028_s2 + $0x110] sm:$0xff]   ;;  %v2076_v1 = vsel %vm596_vm5, %v1883_v34, %v1925_v17  ;;  %v5469_v13 = vld [vmem:[%s8028_s2 + $0x38] sm:$0xff]  }
  0xec   : > { %5127 = vmatprep.subr.bf16.mxu0 %v5448_v43  ;;  %v1879_v43 = vsel %vm432_vm4, %v1874_v19, %v1878_v5  ;;  %v4793_v19 = vcombine.low %v3123_v36, %v5653_v32  ;;  %v2007_v41 = vrot.slane %v4730_v15, 3  ;;  %v1901_v8 = vsel %vm432_vm4, %v1891_v55, %v1900_v39  ;;  %v2709_v36 = vld [vmem:[%s6582_s27 + $0x98] sm:$0xff]  ;;  %v5478_v17 = vld [vmem:[%s8028_s2 + $0xe0] sm:$0xff]   ;;  %v8123_v34 = vld [vmem:[#allocation20_spill] sm:$0xff] }
  0xed   : > { %2496 = vmatmul.mubr.bf16.gmra.mrb[44].mxu1 %v2036_v54  ;;  %v2072_v6 = vsel %vm596_vm5, %v1879_v43, %v1923_v53  ;;  %v8120_v43 = vld [vmem:[#allocation15_spill] sm:$0xff]  ;;  %v2016_v32 = vrot.slane %v6747_v14, 3  ;;  %v5475_v14 = vld [vmem:[%s8028_s2 + $0x90] sm:$0xff]  }
  0xee   : > { %2568 = vmatprep.mubr.bf16.mxu1 %v2104_v40  ;;  %v2009_v55 = vsel %vm582_vm6, %v2007_v41, %v2008_v56  ;;  %v2084_v40 = vsel %vm596_vm5, %v1901_v8, %v6789_v51  ;;  %v2010_v51 = vrot.slane %v6733_v45, 3  ;;  %v5467_v45 = vld [vmem:[%s8028_s2 + $0x78] sm:$0xff]   ;;  %v3222_v5 = vpop.permute.xlu1 %3221 }
  0xef   : > { %5128 = vmatpush3.bf16.msra.mxu0 %v5449_v46  ;;  %v8118_v46 = vld [vmem:[#allocation9_spill] sm:$0xff]  ;;  %v3267_v49 = vpop.permute.xlu0 %3266 }
  0xf0   : > { %5129 = vmatprep.subr.bf16.mxu0 %v5450_v12  ;;  %v2100_v54 = vsel %vm596_vm5, %v8118_v46, %v1999_v29  ;;  %v3236_v12 = vrot.slane %v4793_v19, 1  ;;  %v2011_v26 = vsel %vm582_vm6, %v2008_v56, %v2010_v51  ;;  %v5474_v29 = vld [vmem:[%s8028_s2 + $0xd0] sm:$0xff]   ;;  %v2711_v56 = vld [vmem:[%s6582_s27 + $0xa8] sm:$0xff]  ;;  %v8122_v8 = vld [vmem:[#allocation17_spill] sm:$0xff] }
  0xf1   : > { %v3362_v46 = vrot.slane %v8122_v8, 2  ;;  %v5657_v8 = vld [vmem:[%s5732_s6 + $0x90] ss:$0 sps:$4 sm:$0x11]  }
  0xf2   : > { %2545 = vmatmul.mubr.bf16.gmra.mrb[40].mxu0 %v2068_v62  ;;  %v3238_v62 = vsel %vm386_vm2, %v3236_v12, %v3237_v11  ;;  %v3224_v15 = vpop.permute.xlu1 %3223  ;;  %v2712_v12 = vld [vmem:[%s6582_s27 + $0xb0] sm:$0xff] }
  0xf3   : > { %5130 = vmatpush3.bf16.msra.mxu0 %v5451_v63  ;;  %2552 = vmatprep.mubr.bf16.mxu0 %v2096_v20  ;;  %v3269_v27 = vpop.permute.xlu0 %3268  ;;  %v2707_v63 = vld [vmem:[%s6582_s27 + $0x88] sm:$0xff]  ;;  %v2012_v20 = vrot.slane %v6774_v30, 3  ;;  %v3461_v42 = vsel %vm596_vm5, %v3238_v62, %v3267_v49  ;;  %v5468_v30 = vld [vmem:[%s8028_s2 + $0x80] sm:$0xff]  }
  0xf4   : > { %5131 = vmatprep.subr.bf16.mxu0 %v5453_v37  ;;  %v5464_v37 = vld [vmem:[%s8028_s2 + $0x30] sm:$0xff]   ;;  %2736 = vrot.lane.b32.xlu1 %v2707_v63, %s5674_s28 }
  0xf5   : > { %2569 = vmatmul.mubr.bf16.vlgmr.msra.gmra.mrb[48].mxu1 %v2080_v35  ;;  %v5654_v35 = vld [vmem:[%s5732_s6 + $0x60] sm:$0xff]  }
  0xf6   : > { %5260 = vmatpush3.bf16.msra.mxu1 %v6722_v16  ;;  %2576 = vmatprep.mubr.bf16.mxu1 %v2108_v22  ;;  %v2704_v16 = vld [vmem:[%s6582_s27 + $0x70] sm:$0xff]  ;;  %v2014_v53 = vrot.slane %v5654_v35, 3  ;;  %v8121_v22 = vld [vmem:[#allocation10_spill] sm:$0xff] }
  0xf7   : > { %5132 = vmatpush3.bf16.msra.mxu0 %v5455_v7  ;;  %5261 = vmatprep.subr.bf16.mxu1 %v5456_v21  ;;  %v6876_v38 = vpop.permute.xlu0 %3270  ;;  %v5471_v7 = vld [vmem:[%s8028_s2 + $0xc8] sm:$0xff]   ;;  %v3442_v39 = vsel %vm596_vm5, %v8121_v22, %v3222_v5  ;;  %v5486_v22 = vld [vmem:[%s8028_s2 + $0xb8] sm:$0xff]  }
  0xf8   : > { %5133 = vmatprep.subr.bf16.mxu0 %v5457_v44  ;;  %2730 = vrot.lane.b32.xlu0 %v2704_v16, %s5674_s28  ;;  %v3240_v44 = vsel %vm386_vm2, %v3237_v11, %v8120_v43  ;;  %v2015_v41 = vsel %vm582_vm6, %v2012_v20, %v2014_v53  ;;  %v5476_v16 = vld [vmem:[%s8028_s2 + $0xd8] sm:$0xff]   ;;  %v4127_v43 = vld [vmem:[%s6582_s27 + $0xe0] sm:$0xff] }
  0xf9   : > { %2740 = vrot.lane.b32.xlu1 %v2709_v36, %s5674_s28  ;;  %v5477_v11 = vld [vmem:[%s8028_s2 + $0x98] sm:$0xff]  }
  0xfa   : > { %2553 = vmatmul.mubr.bf16.gmra.mrb[44].mxu0 %v2072_v6  ;;  %5262 = vmatpush3.bf16.msra.mxu1 %v5456_v21  ;;  %v2013_v21 = vsel %vm582_vm6, %v2010_v51, %v2012_v20  ;;  %v5480_v6 = vld [vmem:[%s8028_s2 + $0x108] sm:$0xff]   ;;  %v5479_v51 = vld [vmem:[%s8028_s2 + $0xa0] sm:$0xff]   ;;  %v8124_v20 = vld [vmem:[#allocation13_spill] sm:$0xff] }
  0xfb   : > { %5134 = vmatpush3.bf16.msra.mxu0 %v5458_v48  ;;  %5263 = vmatprep.subr.bf16.mxu1 %v5459_v9  ;;  %v3414_v19 = vpop.permute.xlu0 %3413  ;;  %v3226_v48 = vpop.permute.xlu1 %3225  ;;  %v3285_v5 = vshll.u32 %v8124_v20, 16  ;;  %v4126_v36 = vld [vmem:[%s6582_s27 + $0xd8] sm:$0xff] }
  0xfc   : > { %5135 = vmatprep.subr.bf16.mxu0 %v5460_v31  ;;  %2560 = vmatprep.mubr.bf16.mxu0 %v2100_v54  ;;  %v2017_v31 = vsel %vm582_vm6, %v2014_v53, %v2016_v32  ;;  %v5487_v54 = vld [vmem:[%s8028_s2 + $0x110] sm:$0xff]   ;;  %v5485_v53 = vld [vmem:[%s8028_s2 + $0xf8] sm:$0xff]  }
  0xfd   : > { %2577 = vmatmul.mubr.bf16.gmra.mrb[52].mxu1 %v2084_v40  ;;  %2734 = vrot.lane.b32.xlu0 %v2706_v52, %s5674_s28  ;;  %v3445_v40 = vsel %vm596_vm5, %v8119_v59, %v3224_v15  ;;  %v5488_v59 = vld [vmem:[%s8028_s2 + $0x118] sm:$0xff]  }
  0xfe   : > { %5264 = vmatpush3.bf16.msra.mxu1 %v5459_v9  ;;  %5267 = vmatprep.mubr.msk.bf16.mxu1 %vm596_vm5, %v2009_v55  ;;  %v3465_v9 = vsel %vm596_vm5, %v3240_v44, %v3269_v27  ;;  %v2713_v55 = vld [vmem:[%s6582_s27 + $0xb8] sm:$0xff]  ;;  %v3363_v27 = vsel %vm478_vm1, %v3362_v46, %v6377_v57  ;;  %v5481_v57 = vld [vmem:[%s8028_s2 + $0xe8] sm:$0xff]   ;;  %v3247_v46 = vrot.slane %v5657_v8, 1 }
  0xff   : > { %5136 = vmatpush3.bf16.msra.mxu0 %v5461_v18  ;;  %5265 = vmatprep.subr.bf16.mxu1 %v5462_v10  ;;  %v3273_v49 = vpop.permute.xlu0 %3272  ;;  %v2018_v18 = vrot.slane %v5655_v33, 3  ;;  %v3509_v62 = vsel %vm596_vm5, %v3363_v27, %v3414_v19  ;;  %v4129_v19 = vld [vmem:[%s6582_s27 + $0xf0] sm:$0xff] }
 0x100   : > { %5137 = vmatprep.subr.bf16.mxu0 %v5463_v60  ;;  %2744 = vrot.lane.b32.xlu1 %v2711_v56, %s5674_s28  ;;  %v3469_v60 = vsel %vm596_vm5, %v8123_v34, %v6876_v38  ;;  %v8125_v38 = vld [vmem:[#allocation12_spill] sm:$0xff] }
 0x101   : > { %2738 = vrot.lane.b32.xlu0 %v2708_v0, %s5674_s28  ;;  %v2019_v52 = vsel %vm582_vm6, %v2016_v32, %v2018_v18  ;;  %v4125_v0 = vld [vmem:[%s6582_s27 + $0xd0] sm:$0xff] }
 0x102   : > { %2561 = vmatmul.mubr.bf16.gmra.mrb[48].mxu0 %v2076_v1  ;;  %5266 = vmatpush3.bf16.msra.mxu1 %v5462_v10  ;;  %v6938_v10 = vpop.permute.xlu1 %3339  ;;  %v4123_v1 = vld [vmem:[%s6582_s27 + $0xc0] sm:$0xff] }
 0x103   : > { %5138 = vmatpush3.bf16.msra.mxu0 %v5464_v37  ;;  %5177 = vmatprep.subr.bf16.mxu1 %v5466_v47  ;;  %v3416_v63 = vpop.permute.xlu0 %3415  ;;  %v4124_v47 = vld [vmem:[%s6582_s27 + $0xc8] sm:$0xff] }
 0x104   : > { %5139 = vmatprep.subr.bf16.mxu0 %v5467_v45  ;;  %3876 = vmatprep.mubr.bf16.mxu0 %v3461_v42  ;;  %v3282_v45 = vshrl.u32 %v8124_v20, 16  ;;  %v5482_v42 = vld [vmem:[%s8028_s2 + $0xa8] sm:$0xff]  }
 0x105   : > { %5268 = vmatmul.mubr.msk.bf16.vlgmr.msra.gmra.mrb[56].mxu1 %vm596_vm5, %v2011_v26  ;;  %2742 = vrot.lane.b32.xlu0 %v2710_v2, %s5674_s28  ;;  %v3448_v26 = vsel %vm596_vm5, %v8125_v38, %v3226_v48  ;;  %v4128_v2 = vld [vmem:[%s6582_s27 + $0xe8] sm:$0xff]  ;;  %v8127_v48 = vld [vmem:[#allocation25_spill] sm:$0xff] }
 0x106   : > { %5178 = vmatpush3.bf16.msra.mxu1 %v5468_v30  ;;  %5271 = vmatprep.mubr.msk.bf16.mxu1 %vm596_vm5, %v2013_v21  ;;  %v3228_v37 = vpop.permute.xlu1 %3227  ;;  %v5483_v30 = vld [vmem:[%s8028_s2 + $0xf0] sm:$0xff]   ;;  %v3284_v21 = vrot.slane %v3282_v45, 1 }
 0x107   : > { %5140 = vmatpush3.bf16.msra.mxu0 %v5469_v13  ;;  %5179 = vmatprep.subr.bf16.mxu1 %v5471_v7  ;;  %v8126_v13 = vld [vmem:[#allocation22_spill] sm:$0xff]  ;;  %v3275_v15 = vpop.permute.xlu0 %3274 }
 0x108   : > { %5279 = vmatprep.subr.bf16.mxu0 %v5473_v28  ;;  %2748 = vrot.lane.b32.xlu1 %v2713_v55, %s5674_s28  ;;  %v3473_v7 = vsel %vm596_vm5, %v8126_v13, %v3273_v49  ;;  %v3513_v49 = vsel %vm596_vm5, %v6453_v61, %v3416_v63  ;;  %v8130_v55 = vld [vmem:[#allocation24_spill] sm:$0xff]  ;;  %v4132_v61 = vld [vmem:[%s6582_s27 + $0x108] sm:$0xff]  ;;  %v8133_v13 = vld [vmem:[#allocation26_spill] sm:$0xff] }
 0x109   : > { %2746 = vrot.lane.b32.xlu0 %v2712_v12, %s5674_s28  ;;  %v4131_v12 = vld [vmem:[%s6582_s27 + $0x100] sm:$0xff] }
 0x10a   : > { %3877 = vmatmul.mubr.bf16.vlgmr.msra.gmra.mrb[52].mxu0 %v3442_v39  ;;  %5180 = vmatpush3.bf16.msra.mxu1 %v5472_v4  ;;  %v5484_v4 = vld [vmem:[%s8028_s2 + $0xb0] sm:$0xff]   ;;  %v3342_v35 = vpop.permute.xlu1 %3341  ;;  %v6998_v39 = vld [vmem:[%s5732_s6 + $0x78] sm:$0xff]  }
 0x10b   : > { %5280 = vmatpush3.bf16.msra.mxu0 %v5473_v28  ;;  %5181 = vmatprep.subr.bf16.mxu1 %v5474_v29  ;;  %v3287_v28 = vrot.slane %v3285_v5, 2  ;;  %v3451_v29 = vsel %vm596_vm5, %v6998_v39, %v3228_v37  ;;  %v3418_v32 = vpop.permute.xlu0 %3417  ;;  %v3429_v38 = vrot.slane %v6998_v39, 3  ;;  %v8134_v39 = vshrl.u32 %v6366_v24, 16 }
 0x10c   : > { %3884 = vmatprep.mubr.bf16.mxu0 %v3465_v9  ;;  %5281 = vmatprep.subr.bf16.mxu0 %v5480_v6  ;;  %v3477_v9 = vsel %vm596_vm5, %v8127_v48, %v3275_v15  ;;  %v3517_v20 = vsel %vm596_vm5, %v6498_v25, %v3418_v32  ;;  %v3302_v25 = vrot.slane %v8133_v13, 2 }
 0x10d   : > { %5272 = vmatmul.mubr.msk.bf16.gmra.mrb[60].mxu1 %vm596_vm5, %v2015_v41  ;;  %4147 = vrot.lane.b32.xlu0 %v4123_v1, %s5674_s28  ;;  %v3288_v44 = vor.u32 %v3287_v28, %v3284_v21  ;;  %v8132_v1 = vld [vmem:[#allocation21_spill] sm:$0xff] }
 0x10e   : > { %5182 = vmatpush3.bf16.msra.mxu1 %v5475_v14  ;;  %5275 = vmatprep.mubr.msk.bf16.mxu1 %vm596_vm5, %v2017_v31  ;;  %v8128_v14 = vld [vmem:[#allocation19_spill] sm:$0xff]  ;;  %v3298_v37 = vrot.slane %v8132_v1, 2 }
 0x10f   : > { %5183 = vmatprep.subr.bf16.mxu1 %v5476_v16  ;;  %5282 = vmatpush3.bf16.msra.mxu0 %v5480_v6  ;;  %v3230_v6 = vpop.permute.xlu1 %3229  ;;  %v3292_v41 = vsel %vm432_vm4, %v3288_v44, %v6456_v23  ;;  %v3293_v56 = vrot.slane %v8128_v14, 1  ;;  %v8129_v16 = vld [vmem:[#allocation18_spill] sm:$0xff]  ;;  %v3277_v18 = vpop.permute.xlu0 %3276  ;;  %v5662_v14 = vld [vmem:[%s5732_s6 + $0x90] sm:$0xff]  }
 0x110   : > { %5283 = vmatprep.subr.bf16.mxu0 %v5487_v54  ;;  %4149 = vrot.lane.b32.xlu1 %v4124_v47, %s5674_s28  ;;  %v3294_v31 = vrot.slane %v8129_v16, 2  ;;  %v4134_v47 = vld [vmem:[%s6582_s27 + $0x118] sm:$0xff] }
 0x111   : > { %4151 = vrot.lane.b32.xlu0 %v4125_v0, %s5674_s28  ;;  %v3301_v0 = vrot.slane %v6373_v3, 1  ;;  %v5661_v3 = vld [vmem:[%s5732_s6 + $0x98] sm:$0xff]  }
 0x112   : > { %3885 = vmatmul.mubr.bf16.gmra.mrb[56].mxu0 %v3445_v40  ;;  %5184 = vmatpush3.bf16.msra.mxu1 %v5477_v11  ;;  %v3485_v11 = vsel %vm596_vm5, %v3292_v41, %v6938_v10  ;;  %v3295_v33 = vor.u32 %v3294_v31, %v3293_v56  ;;  %v3248_v40 = vsel %vm386_vm2, %v8130_v55, %v3247_v46  ;;  %v3435_v56 = vrot.slane %v5662_v14, 3 }
 0x113   : > { %5185 = vmatprep.subr.bf16.mxu1 %v5478_v17  ;;  %3892 = vmatprep.mubr.bf16.mxu0 %v3469_v60  ;;  %v3135_v17 = vld [vmem:[%s5732_s6 + $0x70] sm:$0x8]  ;;  %v3344_v34 = vpop.permute.xlu1 %3343  ;;  %v5658_v60 = vld [vmem:[%s5732_s6 + $0x80] sm:$0xff]   ;;  %v3481_v10 = vsel %vm596_vm5, %v3248_v40, %v3277_v18  ;;  %v3420_v21 = vpop.permute.xlu0 %3419 }
 0x114   : > { %5284 = vmatpush3.bf16.msra.mxu0 %v5487_v54  ;;  %4153 = vrot.lane.b32.xlu1 %v4126_v36, %s5674_s28  ;;  %v4130_v54 = vld [vmem:[%s6582_s27 + $0xf8] sm:$0xff]  ;;  %v3454_v27 = vsel %vm596_vm5, %v5658_v60, %v3230_v6  ;;  %v3431_v15 = vrot.slane %v5658_v60, 3  ;;  %v3521_v36 = vsel %vm596_vm5, %v6527_v50, %v3420_v21  ;;  %v8135_v50 = vshll.u32 %v6366_v24, 16 }
 0x115   : > { %5276 = vmatmul.mubr.msk.bf16.gmra.mrb[64].mxu1 %vm596_vm5, %v2019_v52  ;;  %5285 = vmatprep.subr.bf16.mxu0 %v5488_v59  ;;  %v5659_v52 = vld [vmem:[%s5732_s6 + $0x74] sm:$0xf]  ;;  %v5663_v24 = vld [vmem:[%s5732_s6 + $0x98] ss:$0 sps:$4 sm:$0x33]  }
 0x116   : > { %5186 = vmatpush3.bf16.msra.mxu1 %v5479_v51  ;;  %3957 = vmatprep.mubr.bf16.mxu1 %v3509_v62  ;;  %v4803_v51 = vcombine.low %v3135_v17, %v5659_v52  ;;  %v8131_v62 = vld [vmem:[#allocation23_spill] sm:$0xff]  ;;  %v3432_v44 = vsel %vm582_vm6, %v3429_v38, %v3431_v15  ;;  %v3311_v32 = vrot.slane %v8135_v50, 2  ;;  %v3315_v8 = vshrl.u32 %v5663_v24, 16 }
 0x117   : > { %5187 = vmatprep.subr.bf16.mxu1 %v5481_v57  ;;  %4155 = vrot.lane.b32.xlu0 %v4127_v43, %s5674_s28  ;;  %v3296_v57 = vsel %vm432_vm4, %v6456_v23, %v3295_v33  ;;  %v3297_v63 = vrot.slane %v8131_v62, 1  ;;  %v3232_v5 = vpop.permute.xlu1 %3231  ;;  %v3364_v43 = vrot.slane %v5661_v3, 2  ;;  %v3422_v6 = vpop.permute.xlu0 %3421  ;;  %v3318_v46 = vshll.u32 %v5663_v24, 16 }
 0x118   : > { %5286 = vmatpush3.bf16.msra.mxu0 %v5488_v59  ;;  %4157 = vrot.lane.b32.xlu1 %v4128_v2, %s5674_s28  ;;  %v4133_v59 = vld [vmem:[%s6582_s27 + $0x110] sm:$0xff]  ;;  %v3489_v45 = vsel %vm596_vm5, %v3296_v57, %v3342_v35 }
 0x119   : > { %v3299_v23 = vor.u32 %v3298_v37, %v3297_v63  ;;  %v3365_v48 = vsel %vm478_vm1, %v6501_v58, %v3364_v43  ;;  %v3320_v18 = vrot.slane %v3318_v46, 2 }
 0x11a   : > { %3893 = vmatmul.mubr.bf16.gmra.mrb[60].mxu0 %v3448_v26  ;;  %5188 = vmatpush3.bf16.msra.mxu1 %v5482_v42  ;;  %v3428_v42 = vrot.slane %v4803_v51, 3  ;;  %v5660_v26 = vld [vmem:[%s5732_s6 + $0x88] sm:$0xff]   ;;  %v3525_v16 = vsel %vm596_vm5, %v3365_v48, %v3422_v6 }
 0x11b   : > { %5189 = vmatprep.subr.bf16.mxu1 %v5483_v30  ;;  %3900 = vmatprep.mubr.bf16.mxu0 %v3473_v7  ;;  %v3457_v30 = vsel %vm596_vm5, %v5660_v26, %v3232_v5  ;;  %v3300_v28 = vsel %vm432_vm4, %v3295_v33, %v3299_v23  ;;  %v3346_v2 = vpop.permute.xlu1 %3345  ;;  %v3317_v33 = vrot.slane %v3315_v8, 1  ;;  %v3424_v40 = vpop.permute.xlu0 %3423  ;;  %v7084_v5 = vld [vmem:[%s8029_s3] ss:$0 sm:$0xff] }
 0x11c   : > { %4159 = vrot.lane.b32.xlu0 %v4129_v19, %s5674_s28  ;;  %4161 = vrot.lane.b32.xlu1 %v4130_v54, %s5674_s28  ;;  %v3430_v7 = vsel %vm582_vm6, %v3428_v42, %v3429_v38  ;;  %v3493_v35 = vsel %vm596_vm5, %v3300_v28, %v3344_v34  ;;  %v3437_v54 = vrot.slane %v5661_v3, 3  ;;  %v5664_v34 = vld [vmem:[%s5732_s6 + $0xa0] ss:$0 sps:$4 sm:$0x77]  }
 0x11d   : > { %v3439_v60 = vrot.slane %v5664_v34, 3 }
 0x11e   : > { %5190 = vmatpush3.bf16.msra.mxu1 %v5484_v4  ;;  %v3303_v4 = vor.u32 %v3302_v25, %v3301_v0  ;;  %v3438_v55 = vsel %vm582_vm6, %v3435_v56, %v3437_v54 }
 0x11f   : > { %5191 = vmatprep.subr.bf16.mxu1 %v5485_v53  ;;  %v3433_v53 = vrot.slane %v5660_v26, 3 }
 0x120   : > { %4163 = vrot.lane.b32.xlu0 %v4131_v12, %s5674_s28  ;;  %4165 = vrot.lane.b32.xlu1 %v4132_v61, %s5674_s28  ;;  %v3348_v12 = vpop.permute.xlu1 %3347 }
 0x121   : > { %v3434_v19 = vsel %vm582_vm6, %v3431_v15, %v3433_v53  ;;  %v3436_v58 = vsel %vm582_vm6, %v3433_v53, %v3435_v56 }
 0x122   : > { %3901 = vmatmul.mubr.bf16.gmra.mrb[64].mxu0 %v3451_v29  ;;  %5192 = vmatpush3.bf16.msra.mxu1 %v5486_v22  ;;  %v3304_v22 = vsel %vm432_vm4, %v3299_v23, %v3303_v4  ;;  %v3308_v29 = vrot.slane %v8134_v39, 1 }
 0x123   : > { %3908 = vmatprep.mubr.bf16.mxu0 %v3477_v9  ;;  %v5490_v9 = vld [vmem:[%s5732_s6 + $0xa0] ss:$0 sps:$4 sm:$0x33]   ;;  %v3497_v41 = vsel %vm596_vm5, %v3304_v22, %v3346_v2 }
 0x124   : > { %4167 = vrot.lane.b32.xlu0 %v4133_v59, %s5674_s28  ;;  %4169 = vrot.lane.b32.xlu1 %v4134_v47, %s5674_s28  ;;  %v3312_v31 = vor.u32 %v3311_v32, %v3308_v29  ;;  %v3321_v59 = vor.u32 %v3320_v18, %v3317_v33  ;;  %v3350_v52 = vpop.permute.xlu1 %3349 }
 0x125   : > { %3958 = vmatmul.mubr.bf16.vlgmr.msra.gmra.mrb[68].mxu1 %v3485_v11 }
 0x126   : > { %3965 = vmatprep.mubr.bf16.mxu1 %v3513_v49  ;;  %v3366_v49 = vrot.slane %v5490_v9, 2  ;;  %v3313_v11 = vsel %vm432_vm4, %v3303_v4, %v3312_v31  ;;  %v3322_v51 = vsel %vm432_vm4, %v3312_v31, %v3321_v59 }
 0x127   : > { %v3501_v61 = vsel %vm596_vm5, %v3313_v11, %v3348_v12  ;;  %v3505_v57 = vsel %vm596_vm5, %v3322_v51, %v3350_v52 }
 0x128   : > { %v3367_v17 = vsel %vm478_vm1, %v3364_v43, %v3366_v49 }
 0x12a   : > { %3909 = vmatmul.mubr.bf16.gmra.mrb[68].mxu0 %v3454_v27  ;;  %v3529_v27 = vsel %vm596_vm5, %v3367_v17, %v3424_v40 }
 0x12b   : > { %3916 = vmatprep.mubr.bf16.mxu0 %v3481_v10  ;;  %v3440_v10 = vsel %vm582_vm6, %v3437_v54, %v3439_v60 }
 0x12d   : > { %3966 = vmatmul.mubr.bf16.gmra.mrb[72].mxu1 %v3489_v45 }
 0x12e   : > { %3973 = vmatprep.mubr.bf16.mxu1 %v3517_v20 }
 0x132   : > { %3917 = vmatmul.mubr.bf16.gmra.mrb[72].mxu0 %v3457_v30 }
 0x133   : > { %5287 = vmatprep.mubr.msk.bf16.mxu0 %vm596_vm5, %v3430_v7 }
 0x135   : > { %3974 = vmatmul.mubr.bf16.gmra.mrb[76].mxu1 %v3493_v35 }
 0x136   : > { %3981 = vmatprep.mubr.bf16.mxu1 %v3521_v36 }
 0x13a   : > { %5288 = vmatmul.mubr.msk.bf16.vlgmr.msra.gmra.mrb[76].mxu0 %vm596_vm5, %v3432_v44 }
 0x13b   : > { %5291 = vmatprep.mubr.msk.bf16.mxu0 %vm596_vm5, %v3434_v19 }
 0x13d   : > { %3982 = vmatmul.mubr.bf16.gmra.mrb[80].mxu1 %v3497_v41 }
 0x13e   : > { %3989 = vmatprep.mubr.bf16.mxu1 %v3525_v16 }
 0x142   : > { %5292 = vmatmul.mubr.msk.bf16.gmra.mrb[80].mxu0 %vm596_vm5, %v3436_v58 }
 0x143   : > { %5295 = vmatprep.mubr.msk.bf16.mxu0 %vm596_vm5, %v3438_v55 }
 0x145   : > { %3990 = vmatmul.mubr.bf16.gmra.mrb[84].mxu1 %v3501_v61 }
 0x146   : > { %3997 = vmatprep.mubr.bf16.mxu1 %v3529_v27 }
 0x14a   : > { %5296 = vmatmul.mubr.msk.bf16.gmra.mrb[84].mxu0 %vm596_vm5, %v3440_v10 }
 0x14d   : > { %3998 = vmatmul.mubr.bf16.gmra.mrb[88].mxu1 %v3505_v57 }
 0x168   : > { %v4965_v62 = vpop.f32.mrb[0].mxu1 }
 0x169   : > { %v4966_v63 = vpop.f32.mrb[1].mxu1 }
 0x16a   : > { %v4967_v1 = vadd.f32 %v4966_v63, %v4965_v62  ;;  %v4968_v37 = vpop.f32.mrb[2].mxu1 }
 0x16b   : > { %v4969_v47 = vpop.f32.mrb[3].mxu1 }
 0x16c   : > { %v4970_v20 = vadd.f32 %v4969_v47, %v4968_v37 }
 0x16d   : > { %v4913_v45 = vpop.f32.mrb[0].mxu0 }
 0x16e   : > { %v4914_v42 = vpop.f32.mrb[1].mxu0 }
 0x16f   : > { %v4915_v38 = vadd.f32 %v4914_v42, %v4913_v45  ;;  %v4916_v23 = vpop.f32.mrb[2].mxu0 }
 0x170   : > { %v4917_v26 = vpop.f32.mrb[3].mxu0  ;;  %v4971_v30 = vpop.f32.mrb[4].mxu1 }
 0x171   : > { %v1035_v0 = vadd.f32 %v4915_v38, %v7084_v5  ;;  %v4918_v13 = vadd.f32 %v4917_v26, %v4916_v23  ;;  %v4972_v25 = vpop.f32.mrb[5].mxu1 }
 0x172   : > { %v4973_v7 = vadd.f32 %v4972_v25, %v4971_v30  ;;  %v4974_v21 = vpop.f32.mrb[6].mxu1 }
 0x173   : > { %v1038_v28 = vadd.f32 %v4918_v13, %v7084_v5  ;;  %v4975_v15 = vpop.f32.mrb[7].mxu1  ;;  %v7088_v36 = vadd.f32 %v4967_v1, %v1035_v0 }
 0x174   : > { %v4976_v4 = vadd.f32 %v4975_v15, %v4974_v21 }
 0x175   : > { %v4919_v35 = vpop.f32.mrb[4].mxu0  ;;  %v7090_v53 = vadd.f32 %v4970_v20, %v1038_v28 }
 0x176   : > { %v4920_v3 = vpop.f32.mrb[5].mxu0 }
 0x177   : > { %v4921_v43 = vadd.f32 %v4920_v3, %v4919_v35  ;;  %v4922_v44 = vpop.f32.mrb[6].mxu0 }
 0x178   : > { %v4923_v2 = vpop.f32.mrb[7].mxu0  ;;  %v4977_v22 = vpop.f32.mrb[8].mxu1 }
 0x179   : > { %v1043_v39 = vadd.f32 %v4921_v43, %v7084_v5  ;;  %v4924_v29 = vadd.f32 %v4923_v2, %v4922_v44  ;;  %v4978_v50 = vpop.f32.mrb[9].mxu1 }
 0x17a   : > { %v4979_v32 = vadd.f32 %v4978_v50, %v4977_v22  ;;  %v4980_v19 = vpop.f32.mrb[10].mxu1 }
 0x17b   : > { %v1046_v6 = vadd.f32 %v4924_v29, %v7084_v5  ;;  %v4981_v48 = vpop.f32.mrb[11].mxu1  ;;  %v7094_v9 = vadd.f32 %v4973_v7, %v1043_v39 }
 0x17c   : > { %v4982_v41 = vadd.f32 %v4981_v48, %v4980_v19 }
 0x17d   : > { %v4925_v14 = vpop.f32.mrb[8].mxu0  ;;  %v7096_v56 = vadd.f32 %v4976_v4, %v1046_v6 }
 0x17e   : > { %v4926_v16 = vpop.f32.mrb[9].mxu0 }
 0x17f   : > { %v4927_v31 = vadd.f32 %v4926_v16, %v4925_v14  ;;  %v4928_v24 = vpop.f32.mrb[10].mxu0 }
 0x180   : > { %v4929_v8 = vpop.f32.mrb[11].mxu0  ;;  %v4983_v46 = vpop.f32.mrb[12].mxu1 }
 0x181   : > { %v1051_v54 = vadd.f32 %v4927_v31, %v7084_v5  ;;  %v4930_v49 = vadd.f32 %v4929_v8, %v4928_v24  ;;  %v4984_v58 = vpop.f32.mrb[13].mxu1 }
 0x182   : > { %v4985_v12 = vadd.f32 %v4984_v58, %v4983_v46  ;;  %v4986_v11 = vpop.f32.mrb[14].mxu1 }
 0x183   : > { %v1054_v33 = vadd.f32 %v4930_v49, %v7084_v5  ;;  %v4987_v18 = vpop.f32.mrb[15].mxu1  ;;  %v7100_v55 = vadd.f32 %v4979_v32, %v1051_v54 }
 0x184   : > { %v4988_v40 = vadd.f32 %v4987_v18, %v4986_v11 }
 0x185   : > { %v4931_v17 = vpop.f32.mrb[12].mxu0  ;;  %v7102_v61 = vadd.f32 %v4982_v41, %v1054_v33 }
 0x186   : > { %v4932_v34 = vpop.f32.mrb[13].mxu0 }
 0x187   : > { %v4933_v60 = vadd.f32 %v4932_v34, %v4931_v17  ;;  %v4934_v27 = vpop.f32.mrb[14].mxu0 }
 0x188   : > { %v4935_v59 = vpop.f32.mrb[15].mxu0  ;;  %v4989_v10 = vpop.f32.mrb[16].mxu1 }
 0x189   : > { %v1059_v52 = vadd.f32 %v4933_v60, %v7084_v5  ;;  %v4936_v51 = vadd.f32 %v4935_v59, %v4934_v27  ;;  %v4990_v57 = vpop.f32.mrb[17].mxu1 }
 0x18a   : > { %v4991_v62 = vadd.f32 %v4990_v57, %v4989_v10  ;;  %v4992_v63 = vpop.f32.mrb[18].mxu1 }
 0x18b   : > { %v1062_v1 = vadd.f32 %v4936_v51, %v7084_v5  ;;  %v4993_v37 = vpop.f32.mrb[19].mxu1  ;;  %v1140_v47 = vadd.f32 %v4985_v12, %v1059_v52 }
 0x18c   : > { %v4994_v20 = vadd.f32 %v4993_v37, %v4992_v63 }
 0x18d   : > { %v4937_v45 = vpop.f32.mrb[16].mxu0  ;;  %v1143_v42 = vadd.f32 %v4988_v40, %v1062_v1 }
 0x18e   : > { %v4938_v38 = vpop.f32.mrb[17].mxu0 }
 0x18f   : > { %v4939_v23 = vadd.f32 %v4938_v38, %v4937_v45  ;;  %v4940_v26 = vpop.f32.mrb[18].mxu0 }
 0x190   : > { %v4941_v30 = vpop.f32.mrb[19].mxu0  ;;  %v4995_v0 = vpop.f32.mrb[20].mxu1 }
 0x191   : > { %v1067_v13 = vadd.f32 %v4939_v23, %v7084_v5  ;;  %v4942_v25 = vadd.f32 %v4941_v30, %v4940_v26  ;;  %v4996_v7 = vpop.f32.mrb[21].mxu1 }
 0x192   : > { %v4997_v21 = vadd.f32 %v4996_v7, %v4995_v0  ;;  %v4998_v28 = vpop.f32.mrb[22].mxu1 }
 0x193   : > { %v1070_v15 = vadd.f32 %v4942_v25, %v7084_v5  ;;  %v4999_v4 = vpop.f32.mrb[23].mxu1  ;;  %v7108_v35 = vadd.f32 %v4991_v62, %v1067_v13 }
 0x194   : > { %v5000_v3 = vadd.f32 %v4999_v4, %v4998_v28 }
 0x195   : > { %v4943_v43 = vpop.f32.mrb[20].mxu0  ;;  %v7110_v44 = vadd.f32 %v4994_v20, %v1070_v15 }
 0x196   : > { %v4944_v2 = vpop.f32.mrb[21].mxu0 }
 0x197   : > { %v4945_v22 = vadd.f32 %v4944_v2, %v4943_v43  ;;  %v4946_v39 = vpop.f32.mrb[22].mxu0 }
 0x198   : > { %v4947_v29 = vpop.f32.mrb[23].mxu0  ;;  %v5027_v50 = vpop.f32.mrb[24].mxu1 }
 0x199   : > { %v1075_v32 = vadd.f32 %v4945_v22, %v7084_v5  ;;  %v4948_v19 = vadd.f32 %v4947_v29, %v4946_v39  ;;  %v5028_v6 = vpop.f32.mrb[25].mxu1  ;;  %v7166_v39 = vpop.permute.xlu1 %1305 }
 0x19a   : > { %v7113_v48 = vadd.f32 %v5028_v6, %v5027_v50  ;;  %v5030_v41 = vpop.f32.mrb[26].mxu1 }
 0x19b   : > { %v1078_v14 = vadd.f32 %v4948_v19, %v7084_v5  ;;  %v5031_v16 = vpop.f32.mrb[27].mxu1  ;;  %v1156_v31 = vadd.f32 %v4997_v21, %v1075_v32 }
 0x19c   : > { %v7116_v24 = vadd.f32 %v5031_v16, %v5030_v41 }
 0x19d   : > { %v5249_v8 = vpop.f32.mrb[24].mxu0  ;;  %v1159_v46 = vadd.f32 %v5000_v3, %v1078_v14 }
 0x19e   : > { %v1205_v54 = vadd.f32 %v5249_v8, %v7094_v9  ;;  %v1196_v49 = vpop.f32.mrb[25].mxu0 }
 0x19f   : > { %v1197_v58 = vadd.f32 %v1196_v49, %v7088_v36  ;;  %v5250_v12 = vpop.f32.mrb[26].mxu0 }
 0x1a0   : > { %5491 = vtanh.f32 %v1205_v54  ;;  %v1208_v11 = vadd.f32 %v5250_v12, %v7096_v56  ;;  %v1199_v33 = vpop.f32.mrb[27].mxu0  ;;  %v5033_v18 = vpop.f32.mrb[28].mxu1  ;;  %v2458_v12 = vadd.f32 %v7113_v48, %v7084_v5 }
 0x1a1   : > { %v1200_v40 = vadd.f32 %v1199_v33, %v7090_v53  ;;  %v5034_v17 = vpop.f32.mrb[29].mxu1 }
 0x1a2   : > { %5493 = vtanh.f32 %v1208_v11  ;;  %v7122_v34 = vadd.f32 %v5034_v17, %v5033_v18  ;;  %v5036_v60 = vpop.f32.mrb[30].mxu1 }
 0x1a3   : > { %v5037_v27 = vpop.f32.mrb[31].mxu1  ;;  %5495 = vtanh.f32 %v1197_v58 }
 0x1a4   : > { %v7124_v59 = vadd.f32 %v5037_v27, %v5036_v60  ;;  %5497 = vtanh.f32 %v1200_v40  ;;  %v2461_v60 = vadd.f32 %v7116_v24, %v7084_v5  ;;  %v2466_v24 = vadd.f32 %v7122_v34, %v7084_v5 }
 0x1a5   : > { %v5253_v9 = vpop.f32.mrb[28].mxu0 }
 0x1a6   : > { %v1221_v36 = vadd.f32 %v5253_v9, %v1140_v47  ;;  %v1212_v10 = vpop.f32.mrb[29].mxu0 }
 0x1a7   : > { %v1213_v52 = vadd.f32 %v1212_v10, %v7100_v55  ;;  %v5254_v56 = vpop.f32.mrb[30].mxu0 }
 0x1a8   : > { %5499 = vtanh.f32 %v1221_v36  ;;  %v1224_v51 = vadd.f32 %v5254_v56, %v1143_v42  ;;  %v1215_v57 = vpop.f32.mrb[31].mxu0  ;;  %v5039_v53 = vpop.f32.mrb[32].mxu1 }
 0x1a9   : > { %v1216_v62 = vadd.f32 %v1215_v57, %v7102_v61  ;;  %v5040_v63 = vpop.f32.mrb[33].mxu1 }
 0x1aa   : > { %v7128_v1 = vpop.eup %5491  ;;  %5501 = vtanh.f32 %v1224_v51  ;;  %v7130_v37 = vadd.f32 %v5040_v63, %v5039_v53  ;;  %v5042_v20 = vpop.f32.mrb[34].mxu1 }
 0x1ab   : > { %1367 = vrot.lane.b32.xlu0 %v7128_v1, %s5674_s28  ;;  %v5043_v47 = vpop.f32.mrb[35].mxu1  ;;  %5503 = vtanh.f32 %v1213_v52 }
 0x1ac   : > { %v7134_v45 = vpop.eup %5493  ;;  %v7136_v55 = vadd.f32 %v5043_v47, %v5042_v20  ;;  %5505 = vtanh.f32 %v1216_v62 }
 0x1ad   : > { %1369 = vrot.lane.b32.xlu1 %v7134_v45, %s5674_s28  ;;  %v5257_v61 = vpop.f32.mrb[32].mxu0  ;;  %v7140_v42 = vpop.eup %5495 }
 0x1ae   : > { %v1237_v38 = vadd.f32 %v5257_v61, %v1156_v31  ;;  %v1228_v23 = vpop.f32.mrb[33].mxu0  ;;  %v7145_v0 = vpop.eup %5497 }
 0x1af   : > { %v1229_v26 = vadd.f32 %v1228_v23, %v7108_v35  ;;  %v5258_v30 = vpop.f32.mrb[34].mxu0  ;;  %1363 = vrot.lane.b32.xlu0 %v7140_v42, %s5674_s28 }
 0x1b0   : > { %5507 = vtanh.f32 %v1237_v38  ;;  %v1240_v13 = vadd.f32 %v5258_v30, %v1159_v46  ;;  %v1231_v25 = vpop.f32.mrb[35].mxu0  ;;  %v5045_v7 = vpop.f32.mrb[36].mxu1 }
 0x1b1   : > { %v1232_v21 = vadd.f32 %v1231_v25, %v7110_v44  ;;  %1365 = vrot.lane.b32.xlu1 %v7145_v0, %s5674_s28  ;;  %v5046_v28 = vpop.f32.mrb[37].mxu1  ;;  %v7160_v44 = vpop.permute.xlu0 %1303 }
 0x1b2   : > { %v7150_v15 = vpop.eup %5499  ;;  %5509 = vtanh.f32 %v1240_v13  ;;  %v7152_v4 = vadd.f32 %v5046_v28, %v5045_v7  ;;  %v5048_v35 = vpop.f32.mrb[38].mxu1 }
 0x1b3   : > { %1375 = vrot.lane.b32.xlu0 %v7150_v15, %s5674_s28  ;;  %v5049_v3 = vpop.f32.mrb[39].mxu1  ;;  %5511 = vtanh.f32 %v1229_v26  ;;  %v7182_v46 = vpop.permute.xlu1 %1309  ;;  %v2469_v26 = vadd.f32 %v7124_v59, %v7084_v5 }
 0x1b4   : > { %v7156_v43 = vpop.eup %5501  ;;  %v7158_v2 = vadd.f32 %v5049_v3, %v5048_v35  ;;  %5513 = vtanh.f32 %v1232_v21 }
 0x1b5   : > { %1377 = vrot.lane.b32.xlu1 %v7156_v43, %s5674_s28  ;;  %v7164_v22 = vpop.eup %5503  ;;  %v7176_v14 = vpop.permute.xlu0 %1307 }
 0x1b6   : > { %v7170_v29 = vpop.eup %5505 }
 0x1b7   : > { %1371 = vrot.lane.b32.xlu0 %v7164_v22, %s5674_s28  ;;  %v7202_v56 = vpop.permute.xlu1 %1313 }
 0x1b8   : > { %v5051_v50 = vpop.f32.mrb[40].mxu1 }
 0x1b9   : > { %1373 = vrot.lane.b32.xlu1 %v7170_v29, %s5674_s28  ;;  %v5052_v32 = vpop.f32.mrb[41].mxu1  ;;  %v7196_v27 = vpop.permute.xlu0 %1311 }
 0x1ba   : > { %v7174_v19 = vpop.eup %5507  ;;  %v5053_v6 = vadd.f32 %v5052_v32, %v5051_v50  ;;  %v5054_v41 = vpop.f32.mrb[42].mxu1 }
 0x1bb   : > { %1383 = vrot.lane.b32.xlu0 %v7174_v19, %s5674_s28  ;;  %v5055_v16 = vpop.f32.mrb[43].mxu1  ;;  %v7212_v30 = vpop.permute.xlu1 %1317 }
 0x1bc   : > { %v7180_v31 = vpop.eup %5509  ;;  %v5056_v8 = vadd.f32 %v5055_v16, %v5054_v41  ;;  %v2490_v21 = vadd.f32 %v5053_v6, %v7084_v5 }
 0x1bd   : > { %v5079_v54 = vpop.f32.mrb[36].mxu0  ;;  %1385 = vrot.lane.b32.xlu1 %v7180_v31, %s5674_s28  ;;  %v7186_v49 = vpop.eup %5511 }
 0x1be   : > { %v5080_v58 = vpop.f32.mrb[37].mxu0  ;;  %v7192_v18 = vpop.eup %5513  ;;  %v2493_v50 = vadd.f32 %v5056_v8, %v7084_v5  ;;  %v2477_v8 = vadd.f32 %v7136_v55, %v7084_v5 }
 0x1bf   : > { %v5081_v11 = vadd.f32 %v5080_v58, %v5079_v54  ;;  %v5082_v33 = vpop.f32.mrb[38].mxu0  ;;  %1379 = vrot.lane.b32.xlu0 %v7186_v49, %s5674_s28  ;;  %v7208_v20 = vpop.permute.xlu0 %1315 }
 0x1c0   : > { %v5083_v40 = vpop.f32.mrb[39].mxu0  ;;  %v5057_v17 = vpop.f32.mrb[44].mxu1 }
 0x1c1   : > { %v5084_v9 = vadd.f32 %v5083_v40, %v5082_v33  ;;  %1381 = vrot.lane.b32.xlu1 %v7192_v18, %s5674_s28  ;;  %v5058_v36 = vpop.f32.mrb[45].mxu1  ;;  %v7200_v48 = vadd.f32 %v5081_v11, %v2458_v12  ;;  %v2474_v12 = vadd.f32 %v7130_v37, %v7084_v5  ;;  %v7224_v11 = vpop.permute.xlu1 %1321 }
 0x1c2   : > { %v5059_v10 = vadd.f32 %v5058_v36, %v5057_v17  ;;  %v5060_v52 = vpop.f32.mrb[46].mxu1  ;;  %8137 = vst [vmem:[#allocation3_spill] sm:$0xff] %v7224_v11 }
 0x1c3   : > { %v5061_v51 = vpop.f32.mrb[47].mxu1  ;;  %v7204_v57 = vadd.f32 %v5084_v9, %v2461_v60  ;;  %v7218_v16 = vpop.permute.xlu0 %1319 }
 0x1c4   : > { %v5062_v53 = vadd.f32 %v5061_v51, %v5060_v52  ;;  %8136 = vst [vmem:[#allocation6_spill] sm:$0xff] %v7218_v16  ;;  %v2498_v52 = vadd.f32 %v5059_v10, %v7084_v5  ;;  %v2482_v10 = vadd.f32 %v7152_v4, %v7084_v5 }
 0x1c5   : > { %v5085_v62 = vpop.f32.mrb[40].mxu0 }
 0x1c6   : > { %v5086_v63 = vpop.f32.mrb[41].mxu0 }
 0x1c7   : > { %v5087_v47 = vadd.f32 %v5086_v63, %v5085_v62  ;;  %v5088_v61 = vpop.f32.mrb[42].mxu0  ;;  %v7229_v63 = vpop.permute.xlu0 %1323 }
 0x1c8   : > { %v5089_v38 = vpop.f32.mrb[43].mxu0  ;;  %v5103_v23 = vpop.f32.mrb[48].mxu1  ;;  %8138 = vst [vmem:[#allocation2_spill] sm:$0xff] %v7229_v63 }
 0x1c9   : > { %v5090_v13 = vadd.f32 %v5089_v38, %v5088_v61  ;;  %v5104_v25 = vpop.f32.mrb[49].mxu1  ;;  %v2547_v7 = vadd.f32 %v5087_v47, %v2466_v24  ;;  %v2501_v47 = vadd.f32 %v5062_v53, %v7084_v5  ;;  %v2485_v53 = vadd.f32 %v7158_v2, %v7084_v5 }
 0x1ca   : > { %v5105_v28 = vadd.f32 %v5104_v25, %v5103_v23  ;;  %v5106_v35 = vpop.f32.mrb[50].mxu1  ;;  %v7234_v23 = vpop.permute.xlu1 %1325 }
 0x1cb   : > { %v5107_v3 = vpop.f32.mrb[51].mxu1  ;;  %v2550_v34 = vadd.f32 %v5090_v13, %v2469_v26  ;;  %8139 = vst [vmem:[#allocation14_spill] sm:$0xff] %v7234_v23 }
 0x1cc   : > { %v5108_v32 = vadd.f32 %v5107_v3, %v5106_v35  ;;  %v7216_v41 = vadd.f32 %v5105_v28, %v2490_v21  ;;  %v7240_v28 = vpop.permute.xlu0 %2726 }
 0x1cd   : > { %v5091_v54 = vpop.f32.mrb[44].mxu0  ;;  %8140 = vst [vmem:[#allocation5_spill] sm:$0xff] %v7240_v28 }
 0x1ce   : > { %v5092_v59 = vpop.f32.mrb[45].mxu0  ;;  %v7220_v58 = vadd.f32 %v5108_v32, %v2493_v50 }
 0x1cf   : > { %v5093_v6 = vadd.f32 %v5092_v59, %v5091_v54  ;;  %v5094_v33 = vpop.f32.mrb[46].mxu0 }
 0x1d0   : > { %v5095_v40 = vpop.f32.mrb[47].mxu0  ;;  %v5109_v17 = vpop.f32.mrb[52].mxu1 }
 0x1d1   : > { %v5096_v60 = vadd.f32 %v5095_v40, %v5094_v33  ;;  %v5110_v9 = vpop.f32.mrb[53].mxu1  ;;  %v2555_v36 = vadd.f32 %v5093_v6, %v2474_v12  ;;  %v7244_v12 = vpop.permute.xlu1 %2728 }
 0x1d2   : > { %v5111_v51 = vadd.f32 %v5110_v9, %v5109_v17  ;;  %v5112_v62 = vpop.f32.mrb[54].mxu1  ;;  %8141 = vst [vmem:[#allocation8_spill] sm:$0xff] %v7244_v12  ;;  %v7248_v9 = vpop.permute.xlu0 %2730 }
 0x1d3   : > { %v5113_v24 = vpop.f32.mrb[55].mxu1  ;;  %v2558_v37 = vadd.f32 %v5096_v60, %v2477_v8  ;;  %8142 = vst [vmem:[#allocation7_spill] sm:$0xff] %v7248_v9 }
 0x1d4   : > { %v5114_v61 = vadd.f32 %v5113_v24, %v5112_v62  ;;  %v7232_v38 = vadd.f32 %v5111_v51, %v2498_v52 }
 0x1d5   : > { %v5097_v26 = vpop.f32.mrb[48].mxu0  ;;  %v7252_v51 = vpop.permute.xlu1 %2732 }
 0x1d6   : > { %v5098_v55 = vpop.f32.mrb[49].mxu0  ;;  %v7236_v13 = vadd.f32 %v5114_v61, %v2501_v47  ;;  %8143 = vst [vmem:[#allocation4_spill] sm:$0xff] %v7252_v51 }
 0x1d7   : > { %v5099_v25 = vadd.f32 %v5098_v55, %v5097_v26  ;;  %v5100_v21 = vpop.f32.mrb[50].mxu0 }
 0x1d8   : > { %v5101_v35 = vpop.f32.mrb[51].mxu0  ;;  %v5269_v3 = vpop.f32.mrb[56].mxu1 }
 0x1d9   : > { %v5102_v50 = vadd.f32 %v5101_v35, %v5100_v21  ;;  %v2628_v32 = vadd.f32 %v5269_v3, %v2547_v7  ;;  %v2619_v54 = vpop.f32.mrb[57].mxu1  ;;  %v2563_v59 = vadd.f32 %v5099_v25, %v2482_v10  ;;  %v7256_v10 = vpop.permute.xlu0 %2734 }
 0x1da   : > { %v2620_v6 = vadd.f32 %v2619_v54, %v7200_v48  ;;  %v5270_v33 = vpop.f32.mrb[58].mxu1  ;;  %8144 = vst [vmem:[#allocation16_spill] sm:$0xff] %v7256_v10  ;;  %v7260_v3 = vpop.permute.xlu1 %2736 }
 0x1db   : > { %5515 = vtanh.f32 %v2628_v32  ;;  %v2631_v4 = vadd.f32 %v5270_v33, %v2550_v34  ;;  %v2622_v40 = vpop.f32.mrb[59].mxu1  ;;  %v2566_v17 = vadd.f32 %v5102_v50, %v2485_v53  ;;  %8145 = vst [vmem:[#allocation9_spill] sm:$0xff] %v7260_v3 }
 0x1dc   : > { %v2623_v8 = vadd.f32 %v2622_v40, %v7204_v57 }
 0x1dd   : > { %5517 = vtanh.f32 %v2631_v4  ;;  %v5141_v60 = vpop.f32.mrb[52].mxu0  ;;  %v7274_v4 = vpop.permute.xlu0 %2738 }
 0x1de   : > { %v5142_v2 = vpop.f32.mrb[53].mxu0  ;;  %5519 = vtanh.f32 %v2620_v6  ;;  %8146 = vst [vmem:[#allocation11_spill] sm:$0xff] %v7274_v4 }
 0x1df   : > { %v7250_v7 = vadd.f32 %v5142_v2, %v5141_v60  ;;  %v5144_v52 = vpop.f32.mrb[54].mxu0  ;;  %5521 = vtanh.f32 %v2623_v8 }
 0x1e0   : > { %v5145_v62 = vpop.f32.mrb[55].mxu0  ;;  %v5273_v48 = vpop.f32.mrb[60].mxu1 }
 0x1e1   : > { %v7254_v24 = vadd.f32 %v5145_v62, %v5144_v52  ;;  %v2644_v34 = vadd.f32 %v5273_v48, %v2563_v59  ;;  %v2635_v47 = vpop.f32.mrb[61].mxu1  ;;  %v7283_v62 = vpop.permute.xlu1 %2740 }
 0x1e2   : > { %v2636_v61 = vadd.f32 %v2635_v47, %v2555_v36  ;;  %v5274_v57 = vpop.f32.mrb[62].mxu1  ;;  %8147 = vst [vmem:[#allocation15_spill] sm:$0xff] %v7283_v62 }
 0x1e3   : > { %5523 = vtanh.f32 %v2644_v34  ;;  %v2647_v26 = vadd.f32 %v5274_v57, %v2566_v17  ;;  %v2638_v55 = vpop.f32.mrb[63].mxu1  ;;  %v7296_v57 = vpop.permute.xlu0 %2742 }
 0x1e4   : > { %v2639_v25 = vadd.f32 %v2638_v55, %v2558_v37  ;;  %8148 = vst [vmem:[#allocation10_spill] sm:$0xff] %v7296_v57 }
 0x1e5   : > { %v7258_v21 = vpop.eup %5515  ;;  %5525 = vtanh.f32 %v2647_v26  ;;  %v5147_v35 = vpop.f32.mrb[56].mxu0 }
 0x1e6   : > { %v5148_v53 = vpop.f32.mrb[57].mxu0  ;;  %2790 = vrot.lane.b32.xlu0 %v7258_v21, %s5674_s28  ;;  %5527 = vtanh.f32 %v2636_v61 }
 0x1e7   : > { %v7264_v50 = vpop.eup %5517  ;;  %v7266_v36 = vadd.f32 %v5148_v53, %v5147_v35  ;;  %v5150_v32 = vpop.f32.mrb[58].mxu0  ;;  %5529 = vtanh.f32 %v2639_v25 }
 0x1e8   : > { %v5151_v54 = vpop.f32.mrb[59].mxu0  ;;  %2792 = vrot.lane.b32.xlu1 %v7264_v50, %s5674_s28  ;;  %v5277_v37 = vpop.f32.mrb[64].mxu1 }
 0x1e9   : > { %v7270_v59 = vpop.eup %5519  ;;  %v7272_v6 = vadd.f32 %v5151_v54, %v5150_v32  ;;  %v2651_v33 = vpop.f32.mrb[65].mxu1  ;;  %v2660_v40 = vadd.f32 %v5277_v37, %v7232_v38 }
 0x1ea   : > { %v2652_v17 = vadd.f32 %v2651_v33, %v7216_v41  ;;  %v5278_v8 = vpop.f32.mrb[66].mxu1  ;;  %2786 = vrot.lane.b32.xlu0 %v7270_v59, %s5674_s28  ;;  %v7280_v60 = vpop.eup %5521 }
 0x1eb   : > { %v2663_v2 = vadd.f32 %v5278_v8, %v7236_v13  ;;  %v2654_v52 = vpop.f32.mrb[67].mxu1  ;;  %5531 = vtanh.f32 %v2660_v40  ;;  %v7304_v25 = vpop.permute.xlu1 %2744 }
 0x1ec   : > { %v2655_v48 = vadd.f32 %v2654_v52, %v7220_v58  ;;  %2788 = vrot.lane.b32.xlu1 %v7280_v60, %s5674_s28  ;;  %8149 = vst [vmem:[#allocation17_spill] sm:$0xff] %v7304_v25  ;;  %v7312_v32 = vpop.permute.xlu0 %2746 }
 0x1ed   : > { %v7288_v38 = vpop.eup %5523  ;;  %v5153_v41 = vpop.f32.mrb[60].mxu0  ;;  %5533 = vtanh.f32 %v2663_v2  ;;  %8150 = vst [vmem:[#allocation20_spill] sm:$0xff] %v7312_v32 }
 0x1ee   : > { %v5154_v34 = vpop.f32.mrb[61].mxu0  ;;  %2798 = vrot.lane.b32.xlu0 %v7288_v38, %s5674_s28  ;;  %5535 = vtanh.f32 %v2652_v17 }
 0x1ef   : > { %v7292_v47 = vpop.eup %5525  ;;  %v7294_v13 = vadd.f32 %v5154_v34, %v5153_v41  ;;  %v5156_v61 = vpop.f32.mrb[62].mxu0  ;;  %5537 = vtanh.f32 %v2655_v48 }
 0x1f0   : > { %v5157_v58 = vpop.f32.mrb[63].mxu0  ;;  %2800 = vrot.lane.b32.xlu1 %v7292_v47, %s5674_s28  ;;  %v7300_v26 = vpop.eup %5527 }
 0x1f1   : > { %v7302_v55 = vadd.f32 %v5157_v58, %v5156_v61  ;;  %v7308_v35 = vpop.eup %5529  ;;  %v7320_v17 = vpop.permute.xlu1 %2748  ;;  %v3879_v58 = vadd.f32 %v7250_v7, %v7084_v5 }
 0x1f2   : > { %2794 = vrot.lane.b32.xlu0 %v7300_v26, %s5674_s28  ;;  %8151 = vst [vmem:[#allocation13_spill] sm:$0xff] %v7320_v17  ;;  %v7328_v34 = vpop.permute.xlu0 %4147 }
 0x1f3   : > { %8152 = vst [vmem:[#allocation12_spill] sm:$0xff] %v7328_v34 }
 0x1f4   : > { %2796 = vrot.lane.b32.xlu1 %v7308_v35, %s5674_s28 }
 0x1f5   : > { %v5159_v53 = vpop.f32.mrb[64].mxu0  ;;  %v7314_v54 = vpop.eup %5531 }
 0x1f6   : > { %v5160_v37 = vpop.f32.mrb[65].mxu0  ;;  %2806 = vrot.lane.b32.xlu0 %v7314_v54, %s5674_s28  ;;  %v7336_v57 = vpop.permute.xlu1 %4149 }
 0x1f7   : > { %v7316_v33 = vadd.f32 %v5160_v37, %v5159_v53  ;;  %v5162_v40 = vpop.f32.mrb[66].mxu0  ;;  %v7322_v8 = vpop.eup %5533  ;;  %8153 = vst [vmem:[#allocation22_spill] sm:$0xff] %v7336_v57 }
 0x1f8   : > { %v5163_v2 = vpop.f32.mrb[67].mxu0  ;;  %v5193_v52 = vpop.f32.mrb[68].mxu1  ;;  %2808 = vrot.lane.b32.xlu1 %v7322_v8, %s5674_s28 }
 0x1f9   : > { %v7324_v48 = vadd.f32 %v5163_v2, %v5162_v40  ;;  %v5194_v41 = vpop.f32.mrb[69].mxu1  ;;  %v7330_v61 = vpop.eup %5535  ;;  %v3882_v2 = vadd.f32 %v7254_v24, %v7084_v5  ;;  %v3887_v24 = vadd.f32 %v7266_v36, %v7084_v5 }
 0x1fa   : > { %v5195_v53 = vadd.f32 %v5194_v41, %v5193_v52  ;;  %v5196_v37 = vpop.f32.mrb[70].mxu1  ;;  %2802 = vrot.lane.b32.xlu0 %v7330_v61, %s5674_s28  ;;  %v7338_v40 = vpop.eup %5537 }
 0x1fb   : > { %v5197_v25 = vpop.f32.mrb[71].mxu1  ;;  %v7346_v10 = vpop.permute.xlu0 %4151 }
 0x1fc   : > { %v5198_v17 = vadd.f32 %v5197_v25, %v5196_v37  ;;  %v3960_v34 = vadd.f32 %v5195_v53, %v3879_v58  ;;  %2804 = vrot.lane.b32.xlu1 %v7338_v40, %s5674_s28  ;;  %8154 = vst [vmem:[#allocation25_spill] sm:$0xff] %v7346_v10  ;;  %v7350_v28 = vpop.permute.xlu1 %4153 }
 0x1fd   : > { %v5165_v32 = vpop.f32.mrb[68].mxu0  ;;  %8155 = vst [vmem:[#allocation19_spill] sm:$0xff] %v7350_v28 }
 0x1fe   : > { %v5166_v7 = vpop.f32.mrb[69].mxu0  ;;  %v3963_v52 = vadd.f32 %v5198_v17, %v3882_v2 }
 0x1ff   : > { %v7344_v41 = vadd.f32 %v5166_v7, %v5165_v32  ;;  %v5168_v3 = vpop.f32.mrb[70].mxu0  ;;  %v3890_v32 = vadd.f32 %v7272_v6, %v7084_v5  ;;  %v7356_v7 = vpop.permute.xlu0 %4155  ;;  %v3895_v6 = vadd.f32 %v7294_v13, %v7084_v5 }
 0x200   : > { %v5169_v62 = vpop.f32.mrb[71].mxu0  ;;  %v5199_v57 = vpop.f32.mrb[72].mxu1  ;;  %8156 = vst [vmem:[#allocation18_spill] sm:$0xff] %v7356_v7 }
 0x201   : > { %v7348_v4 = vadd.f32 %v5169_v62, %v5168_v3  ;;  %v5200_v12 = vpop.f32.mrb[73].mxu1  ;;  %v7360_v28 = vpop.permute.xlu1 %4157 }
 0x202   : > { %v5201_v25 = vadd.f32 %v5200_v12, %v5199_v57  ;;  %v5202_v58 = vpop.f32.mrb[74].mxu1  ;;  %8157 = vst [vmem:[#allocation24_spill] sm:$0xff] %v7360_v28 }
 0x203   : > { %v5203_v53 = vpop.f32.mrb[75].mxu1 }
 0x204   : > { %v5204_v17 = vadd.f32 %v5203_v53, %v5202_v58  ;;  %v3968_v37 = vadd.f32 %v5201_v25, %v3887_v24  ;;  %v7366_v53 = vpop.permute.xlu0 %4159 }
 0x205   : > { %v5171_v2 = vpop.f32.mrb[72].mxu0  ;;  %8158 = vst [vmem:[#allocation23_spill] sm:$0xff] %v7366_v53  ;;  %v7370_v28 = vpop.permute.xlu1 %4161 }
 0x206   : > { %v5172_v10 = vpop.f32.mrb[73].mxu0  ;;  %v3971_v3 = vadd.f32 %v5204_v17, %v3890_v32 }
 0x207   : > { %v7358_v62 = vadd.f32 %v5172_v10, %v5171_v2  ;;  %v5174_v51 = vpop.f32.mrb[74].mxu0  ;;  %v3898_v10 = vadd.f32 %v7302_v55, %v7084_v5  ;;  %v3903_v55 = vadd.f32 %v7316_v33, %v7084_v5 }
 0x208   : > { %v5175_v9 = vpop.f32.mrb[75].mxu0  ;;  %v5205_v36 = vpop.f32.mrb[76].mxu1 }
 0x209   : > { %v7362_v12 = vadd.f32 %v5175_v9, %v5174_v51  ;;  %v5206_v57 = vpop.f32.mrb[77].mxu1  ;;  %v7372_v53 = vpop.permute.xlu0 %4163 }
 0x20a   : > { %v5207_v58 = vadd.f32 %v5206_v57, %v5205_v36  ;;  %v5208_v24 = vpop.f32.mrb[78].mxu1 }
 0x20b   : > { %v5209_v25 = vpop.f32.mrb[79].mxu1 }
 0x20c   : > { %v5210_v32 = vadd.f32 %v5209_v25, %v5208_v24  ;;  %v3976_v17 = vadd.f32 %v5207_v58, %v3895_v6 }
 0x20d   : > { %v5289_v2 = vpop.f32.mrb[76].mxu0 }
 0x20e   : > { %v4049_v7 = vadd.f32 %v5289_v2, %v3968_v37  ;;  %v4040_v9 = vpop.f32.mrb[77].mxu0  ;;  %v3979_v51 = vadd.f32 %v5210_v32, %v3898_v10  ;;  %v7376_v37 = vpop.permute.xlu1 %4165 }
 0x20f   : > { %v4041_v11 = vadd.f32 %v4040_v9, %v3960_v34  ;;  %v5290_v16 = vpop.f32.mrb[78].mxu0  ;;  %8159 = vst [vmem:[#allocation21_spill] sm:$0xff] %v7376_v37  ;;  %v3906_v34 = vadd.f32 %v7324_v48, %v7084_v5  ;;  %v7382_v2 = vpop.permute.xlu0 %4167 }
 0x210   : > { %5539 = vtanh.f32 %v4049_v7  ;;  %v4052_v13 = vadd.f32 %v5290_v16, %v3971_v3  ;;  %v5211_v36 = vpop.f32.mrb[80].mxu1  ;;  %v4043_v57 = vpop.f32.mrb[79].mxu0  ;;  %8160 = vst [vmem:[#allocation26_spill] sm:$0xff] %v7382_v2 }
 0x211   : > { %v4044_v23 = vadd.f32 %v4043_v57, %v3963_v52  ;;  %v5212_v63 = vpop.f32.mrb[81].mxu1 }
 0x212   : > { %5541 = vtanh.f32 %v4052_v13  ;;  %v5213_v6 = vadd.f32 %v5212_v63, %v5211_v36  ;;  %v5214_v58 = vpop.f32.mrb[82].mxu1  ;;  %v7386_v48 = vpop.permute.xlu1 %4169 }
 0x213   : > { %v5215_v24 = vpop.f32.mrb[83].mxu1  ;;  %5543 = vtanh.f32 %v4041_v11  ;;  %8161 = vst [vmem:[#allocation27_spill] sm:$0xff] %v7386_v48 }
 0x214   : > { %v5216_v16 = vadd.f32 %v5215_v24, %v5214_v58  ;;  %v3984_v7 = vadd.f32 %v5213_v6, %v3903_v55  ;;  %5545 = vtanh.f32 %v4044_v23  ;;  %v3911_v23 = vadd.f32 %v7344_v41, %v7084_v5 }
 0x215   : > { %v5293_v3 = vpop.f32.mrb[80].mxu0 }
 0x216   : > { %v7380_v52 = vadd.f32 %v5293_v3, %v3984_v7  ;;  %v4056_v25 = vpop.f32.mrb[81].mxu0  ;;  %v3987_v10 = vadd.f32 %v5216_v16, %v3906_v34  ;;  %v1258_v7 = vmul.f32 0.5, %v7134_v45 }
 0x217   : > { %v4057_v32 = vadd.f32 %v4056_v25, %v3976_v17  ;;  %v5294_v33 = vpop.f32.mrb[82].mxu0  ;;  %v1257_v17 = vmul.f32 0.5, %v7128_v1 }
 0x218   : > { %v7384_v63 = vadd.f32 %v5294_v33, %v3987_v10  ;;  %v5217_v9 = vpop.f32.mrb[84].mxu1  ;;  %v4059_v13 = vpop.f32.mrb[83].mxu0  ;;  %v1255_v33 = vmul.f32 0.5, %v7140_v42 }
 0x219   : > { %v4060_v36 = vadd.f32 %v4059_v13, %v3979_v51  ;;  %v5218_v57 = vpop.f32.mrb[85].mxu1  ;;  %v3914_v51 = vadd.f32 %v7348_v4, %v7084_v5  ;;  %5547 = vtanh.f32 %v4057_v32 }
 0x21a   : > { %v7388_v11 = vpop.eup %5539  ;;  %v5219_v55 = vadd.f32 %v5218_v57, %v5217_v9  ;;  %v5220_v6 = vpop.f32.mrb[86].mxu1  ;;  %v7405_v9 = vadd.f32 0.5, %v1257_v17  ;;  %v7419_v48 = vadd.f32 0.5, %v1255_v33 }
 0x21b   : > { %4211 = vrot.lane.b32.xlu0 %v7388_v11, %s5674_s28  ;;  %v5221_v58 = vpop.f32.mrb[87].mxu1  ;;  %5549 = vtanh.f32 %v4060_v36 }
 0x21c   : > { %v7395_v24 = vpop.eup %5541  ;;  %v5222_v34 = vadd.f32 %v5221_v58, %v5220_v6  ;;  %v3992_v16 = vadd.f32 %v5219_v55, %v3911_v23  ;;  %v1256_v6 = vmul.f32 0.5, %v7145_v0  ;;  %v7412_v58 = vadd.f32 0.5, %v1258_v7 }
 0x21d   : > { %4213 = vrot.lane.b32.xlu1 %v7395_v24, %s5674_s28  ;;  %v5297_v41 = vpop.f32.mrb[84].mxu0  ;;  %v1368_v3 = vpop.permute.xlu0 %1367  ;;  %5551 = vtanh.f32 %v7380_v52 }
 0x21e   : > { %v7402_v25 = vpop.eup %5543  ;;  %v4072_v1 = vpop.f32.mrb[85].mxu0  ;;  %v3995_v10 = vadd.f32 %v5222_v34, %v3914_v51  ;;  %v1401_v51 = vmul.f32 %v1368_v3, %v7405_v9  ;;  %v3919_v34 = vadd.f32 %v7358_v62, %v7084_v5  ;;  %v3922_v3 = vadd.f32 %v7362_v12, %v7084_v5 }
 0x21f   : > { %v4073_v13 = vadd.f32 %v4072_v1, %v3992_v16  ;;  %v5298_v57 = vpop.f32.mrb[86].mxu0  ;;  %4207 = vrot.lane.b32.xlu0 %v7402_v25, %s5674_s28  ;;  %v1370_v4 = vpop.permute.xlu1 %1369  ;;  %v7425_v37 = vadd.f32 0.5, %v1256_v6  ;;  %v1262_v12 = vmul.f32 0.5, %v7156_v43  ;;  %5553 = vtanh.f32 %v7384_v63 }
 0x220   : > { %v7409_v45 = vpop.eup %5545  ;;  %v5223_v23 = vpop.f32.mrb[88].mxu1  ;;  %v1402_v0 = vmul.f32 %v1370_v4, %v7412_v58  ;;  %v1259_v43 = vmul.f32 0.5, %v7164_v22 }
 0x221   : > { %v4075_v55 = vpop.f32.mrb[87].mxu0  ;;  %4209 = vrot.lane.b32.xlu1 %v7409_v45, %s5674_s28  ;;  %v5224_v17 = vpop.f32.mrb[89].mxu1  ;;  %5555 = vtanh.f32 %v4073_v13 }
 0x222   : > { %v4076_v42 = vadd.f32 %v4075_v55, %v3995_v10  ;;  %v5225_v16 = vadd.f32 %v5224_v17, %v5223_v23  ;;  %v1364_v1 = vpop.permute.xlu0 %1363  ;;  %v5226_v32 = vpop.f32.mrb[90].mxu1  ;;  %v1261_v23 = vmul.f32 0.5, %v7150_v15  ;;  %v7444_v17 = vadd.f32 0.5, %v1262_v12 }
 0x223   : > { %1427 = vrot.lane.b32.xlu0 %v1401_v51, %s5674_s28  ;;  %v5227_v7 = vpop.f32.mrb[91].mxu1  ;;  %v1366_v2 = vpop.permute.xlu1 %1365  ;;  %v1399_v62 = vmul.f32 %v1364_v1, %v7419_v48 }
 0x224   : > { %v4000_v10 = vadd.f32 %v5225_v16, %v3919_v34  ;;  %v5228_v55 = vadd.f32 %v5227_v7, %v5226_v32  ;;  %v1400_v4 = vmul.f32 %v1366_v2, %v7425_v37  ;;  %v7435_v6 = vpop.eup %5547  ;;  %v1260_v34 = vmul.f32 0.5, %v7170_v29 }
 0x225   : > { %1429 = vrot.lane.b32.xlu1 %v1402_v0, %s5674_s28  ;;  %v7442_v15 = vpop.eup %5549  ;;  %v7456_v32 = vadd.f32 0.5, %v1259_v43  ;;  %v1265_v0 = vmul.f32 0.5, %v7174_v19  ;;  %5557 = vtanh.f32 %v4076_v42  ;;  %v1264_v42 = vmul.f32 0.5, %v7192_v18 }
 0x226   : > { %v4081_v36 = vadd.f32 %v5297_v41, %v4000_v10  ;;  %v4003_v33 = vadd.f32 %v5228_v55, %v3922_v3  ;;  %v1376_v51 = vpop.permute.xlu0 %1375  ;;  %v7438_v41 = vadd.f32 0.5, %v1261_v23  ;;  %v7463_v7 = vadd.f32 0.5, %v1260_v34 }
 0x227   : > { %1423 = vrot.lane.b32.xlu0 %v1399_v62, %s5674_s28  ;;  %v1378_v2 = vpop.permute.xlu1 %1377  ;;  %v7454_v16 = vpop.eup %5551  ;;  %v1266_v3 = vmul.f32 0.5, %v7180_v31  ;;  %v7469_v55 = vadd.f32 0.5, %v1265_v0  ;;  %v1263_v31 = vmul.f32 0.5, %v7186_v49  ;;  %v2678_v34 = vmul.f32 0.5, %v7270_v59 }
 0x228   : > { %v4084_v5 = vadd.f32 %v5298_v57, %v4003_v33  ;;  %v1405_v52 = vmul.f32 %v1376_v51, %v7438_v41  ;;  %v1406_v63 = vmul.f32 %v1378_v2, %v7444_v17  ;;  %5559 = vtanh.f32 %v4081_v36 }
 0x229   : > { %1425 = vrot.lane.b32.xlu1 %v1400_v4, %s5674_s28  ;;  %v7461_v22 = vpop.eup %5553  ;;  %v7473_v33 = vadd.f32 0.5, %v1266_v3  ;;  %v7484_v51 = vadd.f32 0.5, %v1263_v31  ;;  %v2679_v3 = vmul.f32 0.5, %v7280_v60  ;;  %v2685_v31 = vmul.f32 0.5, %v7292_v47 }
 0x22a   : > { %v1372_v57 = vpop.permute.xlu0 %1371  ;;  %5561 = vtanh.f32 %v4084_v5 }
 0x22b   : > { %4215 = vrot.lane.b32.xlu0 %v7435_v6, %s5674_s28  ;;  %v1374_v1 = vpop.permute.xlu1 %1373  ;;  %v1403_v29 = vmul.f32 %v1372_v57, %v7456_v32  ;;  %v7482_v4 = vpop.eup %5555  ;;  %v2681_v57 = vmul.f32 0.5, %v7264_v50  ;;  %v7520_v59 = vadd.f32 0.5, %v2679_v3 }
 0x22c   : > { %v1404_v19 = vmul.f32 %v1374_v1, %v7463_v7 }
 0x22d   : > { %4217 = vrot.lane.b32.xlu1 %v7442_v15, %s5674_s28 }
 0x22e   : > { %v1384_v10 = vpop.permute.xlu0 %1383 }
 0x22f   : > { %1435 = vrot.lane.b32.xlu0 %v1405_v52, %s5674_s28  ;;  %v1386_v62 = vpop.permute.xlu1 %1385  ;;  %v1409_v13 = vmul.f32 %v1384_v10, %v7469_v55  ;;  %v7488_v2 = vpop.eup %5557  ;;  %v7490_v52 = vadd.f32 0.5, %v1264_v42  ;;  %v2682_v42 = vmul.f32 0.5, %v7300_v26 }
 0x230   : > { %v1410_v23 = vmul.f32 %v1386_v62, %v7473_v33  ;;  %v7515_v62 = vadd.f32 0.5, %v2678_v34  ;;  %v2688_v34 = vmul.f32 0.5, %v7314_v54  ;;  %v2687_v54 = vmul.f32 0.5, %v7338_v40 }
 0x231   : > { %1437 = vrot.lane.b32.xlu1 %v1406_v63, %s5674_s28  ;;  %v2680_v63 = vmul.f32 0.5, %v7258_v21 }
 0x232   : > { %v1380_v12 = vpop.permute.xlu0 %1379  ;;  %v7498_v5 = vpop.eup %5559 }
 0x233   : > { %4219 = vrot.lane.b32.xlu0 %v7454_v16, %s5674_s28  ;;  %v1382_v49 = vpop.permute.xlu1 %1381  ;;  %v1407_v36 = vmul.f32 %v1380_v12, %v7484_v51  ;;  %v7509_v1 = vadd.f32 0.5, %v2680_v63 }
 0x234   : > { %v1408_v18 = vmul.f32 %v1382_v49, %v7490_v52  ;;  %v7502_v43 = vpop.eup %5561 }
 0x235   : > { %4221 = vrot.lane.b32.xlu1 %v7461_v22, %s5674_s28 }
 0x237   : > { %1431 = vrot.lane.b32.xlu0 %v1403_v29, %s5674_s28  ;;  %v7512_v29 = vadd.f32 0.5, %v2681_v57  ;;  %v7535_v57 = vadd.f32 0.5, %v2682_v42 }
 0x239   : > { %1433 = vrot.lane.b32.xlu1 %v1404_v19, %s5674_s28 }
 0x23b   : > { %1443 = vrot.lane.b32.xlu0 %v1409_v13, %s5674_s28  ;;  %v2684_v13 = vmul.f32 0.5, %v7288_v38 }
 0x23d   : > { %1445 = vrot.lane.b32.xlu1 %v1410_v23, %s5674_s28  ;;  %v7526_v12 = vadd.f32 0.5, %v2684_v13 }
 0x23f   : > { %4223 = vrot.lane.b32.xlu0 %v7482_v4, %s5674_s28 }
 0x241   : > { %4225 = vrot.lane.b32.xlu1 %v7488_v2, %s5674_s28 }
 0x243   : > { %1439 = vrot.lane.b32.xlu0 %v1407_v36, %s5674_s28  ;;  %v2683_v36 = vmul.f32 0.5, %v7308_v35 }
 0x245   : > { %1441 = vrot.lane.b32.xlu1 %v1408_v18, %s5674_s28  ;;  %v7531_v18 = vadd.f32 0.5, %v2685_v31  ;;  %v7540_v3 = vadd.f32 0.5, %v2683_v36 }
 0x247   : > { %4227 = vrot.lane.b32.xlu0 %v7498_v5, %s5674_s28 }
 0x249   : > { %4229 = vrot.lane.b32.xlu1 %v7502_v43, %s5674_s28 }
 0x258   : > { %v2791_v0 = vpop.permute.xlu0 %2790 }
 0x259   : > { %v2824_v10 = vmul.f32 %v2791_v0, %v7509_v1 }
 0x25a   : > { %v2793_v19 = vpop.permute.xlu1 %2792 }
 0x25b   : > { %v2825_v21 = vmul.f32 %v2793_v19, %v7512_v29  ;;  %2850 = vrot.lane.b32.xlu0 %v2824_v10, %s5674_s28  ;;  %v2689_v10 = vmul.f32 0.5, %v7322_v8 }
 0x25c   : > { %v2787_v50 = vpop.permute.xlu0 %2786 }
 0x25d   : > { %v2822_v60 = vmul.f32 %v2787_v50, %v7515_v62  ;;  %2852 = vrot.lane.b32.xlu1 %v2825_v21, %s5674_s28  ;;  %v2686_v21 = vmul.f32 0.5, %v7330_v61  ;;  %v7548_v50 = vadd.f32 0.5, %v2688_v34  ;;  %v7559_v61 = vadd.f32 0.5, %v2687_v54 }
 0x25e   : > { %v2789_v23 = vpop.permute.xlu1 %2788 }
 0x25f   : > { %v2823_v38 = vmul.f32 %v2789_v23, %v7520_v59  ;;  %2846 = vrot.lane.b32.xlu0 %v2822_v60, %s5674_s28  ;;  %v7552_v60 = vadd.f32 0.5, %v2689_v10  ;;  %v7555_v8 = vadd.f32 0.5, %v2686_v21 }
 0x260   : > { %v2799_v49 = vpop.permute.xlu0 %2798 }
 0x261   : > { %v2828_v47 = vmul.f32 %v2799_v49, %v7526_v12  ;;  %2848 = vrot.lane.b32.xlu1 %v2823_v38, %s5674_s28 }
 0x262   : > { %v2801_v63 = vpop.permute.xlu1 %2800 }
 0x263   : > { %v2829_v26 = vmul.f32 %v2801_v63, %v7531_v18  ;;  %2858 = vrot.lane.b32.xlu0 %v2828_v47, %s5674_s28  ;;  %v4101_v63 = vmul.f32 0.5, %v7388_v11 }
 0x264   : > { %v2795_v0 = vpop.permute.xlu0 %2794 }
 0x265   : > { %v2826_v35 = vmul.f32 %v2795_v0, %v7535_v57  ;;  %2860 = vrot.lane.b32.xlu1 %v2829_v26, %s5674_s28  ;;  %v4102_v26 = vmul.f32 0.5, %v7395_v24  ;;  %v7568_v34 = vadd.f32 0.5, %v4101_v63  ;;  %v4099_v0 = vmul.f32 0.5, %v7402_v25 }
 0x266   : > { %v2797_v19 = vpop.permute.xlu1 %2796 }
 0x267   : > { %v2827_v13 = vmul.f32 %v2797_v19, %v7540_v3  ;;  %2854 = vrot.lane.b32.xlu0 %v2826_v35, %s5674_s28  ;;  %v7572_v19 = vadd.f32 0.5, %v4102_v26  ;;  %v7577_v54 = vadd.f32 0.5, %v4099_v0  ;;  %v1340_v0 = vmul.f32 %v7166_v39, %v7425_v37 }
 0x268   : > { %v2807_v31 = vpop.permute.xlu0 %2806  ;;  %v1345_v39 = vmul.f32 %v7208_v20, %v7438_v41 }
 0x269   : > { %2856 = vrot.lane.b32.xlu1 %v2827_v13, %s5674_s28  ;;  %v2832_v23 = vmul.f32 %v2807_v31, %v7548_v50  ;;  %v4100_v13 = vmul.f32 0.5, %v7409_v45 }
 0x26a   : > { %v2809_v42 = vpop.permute.xlu1 %2808 }
 0x26b   : > { %v2833_v38 = vmul.f32 %v2809_v42, %v7552_v60  ;;  %2866 = vrot.lane.b32.xlu0 %v2832_v23, %s5674_s28  ;;  %v7581_v25 = vadd.f32 0.5, %v4100_v13  ;;  %v1341_v42 = vmul.f32 %v7176_v14, %v7405_v9  ;;  %v4103_v14 = vmul.f32 0.5, %v7435_v6 }
 0x26c   : > { %v2803_v49 = vpop.permute.xlu0 %2802 }
 0x26d   : > { %v2830_v36 = vmul.f32 %v2803_v49, %v7555_v8  ;;  %2868 = vrot.lane.b32.xlu1 %v2833_v38, %s5674_s28  ;;  %v1342_v49 = vmul.f32 %v7182_v46, %v7412_v58  ;;  %v4104_v46 = vmul.f32 0.5, %v7442_v15  ;;  %v4105_v15 = vmul.f32 0.5, %v7454_v16 }
 0x26e   : > { %v2805_v47 = vpop.permute.xlu1 %2804 }
 0x26f   : > { %v2831_v40 = vmul.f32 %v2805_v47, %v7559_v61  ;;  %2862 = vrot.lane.b32.xlu0 %v2830_v36, %s5674_s28  ;;  %v7603_v6 = vadd.f32 0.5, %v4104_v46  ;;  %v7615_v20 = vadd.f32 0.5, %v4105_v15 }
 0x271   : > { %2864 = vrot.lane.b32.xlu1 %v2831_v40, %s5674_s28  ;;  %v1339_v40 = vmul.f32 %v7160_v44, %v7419_v48  ;;  %v7599_v44 = vadd.f32 0.5, %v4103_v14 }
 0x28d   : > { %v4212_v35 = vpop.permute.xlu0 %4211 }
 0x28e   : > { %v4245_v10 = vmul.f32 %v4212_v35, %v7568_v34 }
 0x28f   : > { %v4214_v21 = vpop.permute.xlu1 %4213 }
 0x290   : > { %v4246_v31 = vmul.f32 %v4214_v21, %v7572_v19  ;;  %4271 = vrot.lane.b32.xlu0 %v4245_v10, %s5674_s28 }
 0x291   : > { %v4208_v11 = vpop.permute.xlu0 %4207 }
 0x292   : > { %v4243_v24 = vmul.f32 %v4208_v11, %v7577_v54  ;;  %4273 = vrot.lane.b32.xlu1 %v4246_v31, %s5674_s28 }
 0x293   : > { %v4210_v23 = vpop.permute.xlu1 %4209 }
 0x294   : > { %v4244_v45 = vmul.f32 %v4210_v23, %v7581_v25  ;;  %4267 = vrot.lane.b32.xlu0 %v4243_v24, %s5674_s28 }
 0x295   : > { %v1428_v38 = vpop.permute.xlu0 %1427 }
 0x296   : > { %v1461_v36 = vadd.f32 %v1428_v38, %v1341_v42  ;;  %4269 = vrot.lane.b32.xlu1 %v4244_v45, %s5674_s28  ;;  %v1346_v42 = vmul.f32 %v7212_v30, %v7444_v17  ;;  %v4106_v38 = vmul.f32 0.5, %v7461_v22 }
 0x297   : > { %v1430_v47 = vpop.permute.xlu1 %1429 }
 0x298   : > { %v1462_v63 = vadd.f32 %v1430_v47, %v1342_v49  ;;  %1559 = vrot.lane.b32.xlu0 %v1461_v36, %s5675_s7  ;;  %5563 = vtanh.f32 %v1461_v36  ;;  %v7619_v16 = vadd.f32 0.5, %v4106_v38  ;;  %v1344_v36 = vmul.f32 %v7202_v56, %v7463_v7  ;;  %v8162_v56 = vld [vmem:[#allocation2_spill] sm:$0xff] }
 0x299   : > { %v1424_v26 = vpop.permute.xlu0 %1423 }
 0x29a   : > { %v1459_v35 = vadd.f32 %v1424_v26, %v1339_v40  ;;  %1561 = vrot.lane.b32.xlu1 %v1462_v63, %s5675_s7  ;;  %5565 = vtanh.f32 %v1462_v63  ;;  %v1343_v26 = vmul.f32 %v7196_v27, %v7456_v32 }
 0x29b   : > { %v1426_v10 = vpop.permute.xlu1 %1425 }
 0x29c   : > { %v1460_v13 = vadd.f32 %v1426_v10, %v1340_v0  ;;  %1555 = vrot.lane.b32.xlu0 %v1459_v35, %s5675_s7  ;;  %5567 = vtanh.f32 %v1459_v35 }
 0x29d   : > { %v4216_v21 = vpop.permute.xlu0 %4215 }
 0x29e   : > { %v4247_v31 = vmul.f32 %v4216_v21, %v7599_v44  ;;  %1557 = vrot.lane.b32.xlu1 %v1460_v13, %s5675_s7  ;;  %5569 = vtanh.f32 %v1460_v13  ;;  %v4107_v13 = vmul.f32 0.5, %v7482_v4 }
 0x29f   : > { %v4218_v11 = vpop.permute.xlu1 %4217 }
 0x2a0   : > { %v4248_v24 = vmul.f32 %v4218_v11, %v7603_v6  ;;  %4275 = vrot.lane.b32.xlu0 %v4247_v31, %s5674_s28 }
 0x2a1   : > { %v1436_v23 = vpop.permute.xlu0 %1435 }
 0x2a2   : > { %v1465_v45 = vadd.f32 %v1436_v23, %v1345_v39  ;;  %4277 = vrot.lane.b32.xlu1 %v4248_v24, %s5674_s28  ;;  %v5564_v27 = vpop.eup %5563  ;;  %v1349_v39 = vmul.f32 %v8162_v56, %v7469_v55  ;;  %v8163_v23 = vld [vmem:[#allocation14_spill] sm:$0xff] }
 0x2a3   : > { %v1438_v49 = vpop.permute.xlu1 %1437 }
 0x2a4   : > { %v1466_v47 = vadd.f32 %v1438_v49, %v1346_v42  ;;  %1567 = vrot.lane.b32.xlu0 %v1465_v45, %s5675_s7  ;;  %v5566_v31 = vpop.eup %5565  ;;  %v1350_v42 = vmul.f32 %v8163_v23, %v7473_v33  ;;  %v4108_v49 = vmul.f32 0.5, %v7488_v2  ;;  %5571 = vtanh.f32 %v1465_v45 }
 0x2a5   : > { %v4220_v40 = vpop.permute.xlu0 %4219 }
 0x2a6   : > { %v4249_v14 = vmul.f32 %v4220_v40, %v7615_v20  ;;  %1569 = vrot.lane.b32.xlu1 %v1466_v47, %s5675_s7  ;;  %v5568_v11 = vpop.eup %5567  ;;  %5573 = vtanh.f32 %v1466_v47 }
 0x2a7   : > { %v4222_v30 = vpop.permute.xlu1 %4221 }
 0x2a8   : > { %v4250_v22 = vmul.f32 %v4222_v30, %v7619_v16  ;;  %4279 = vrot.lane.b32.xlu0 %v4249_v14, %s5674_s28  ;;  %v5570_v24 = vpop.eup %5569  ;;  %v7640_v30 = vadd.f32 0.5, %v4107_v13 }
 0x2a9   : > { %v1432_v0 = vpop.permute.xlu0 %1431 }
 0x2aa   : > { %v1463_v46 = vadd.f32 %v1432_v0, %v1343_v26  ;;  %4281 = vrot.lane.b32.xlu1 %v4250_v22, %s5674_s28  ;;  %v7644_v26 = vadd.f32 0.5, %v4108_v49  ;;  %v8164_v0 = vld [vmem:[#allocation6_spill] sm:$0xff] }
 0x2ab   : > { %v1434_v10 = vpop.permute.xlu1 %1433  ;;  %v1347_v2 = vmul.f32 %v8164_v0, %v7484_v51 }
 0x2ac   : > { %v1464_v21 = vadd.f32 %v1434_v10, %v1344_v36  ;;  %1563 = vrot.lane.b32.xlu0 %v1463_v46, %s5675_s7  ;;  %5575 = vtanh.f32 %v1463_v46  ;;  %v4110_v46 = vmul.f32 0.5, %v7502_v43 }
 0x2ad   : > { %v1444_v63 = vpop.permute.xlu0 %1443 }
 0x2ae   : > { %1565 = vrot.lane.b32.xlu1 %v1464_v21, %s5675_s7  ;;  %v1469_v38 = vadd.f32 %v1444_v63, %v1349_v39  ;;  %5577 = vtanh.f32 %v1464_v21  ;;  %v5572_v47 = vpop.eup %5571 }
 0x2af   : > { %v1446_v35 = vpop.permute.xlu1 %1445 }
 0x2b0   : > { %1499 = vrot.lane.b32.xlu0 %v5564_v27, %s5674_s28  ;;  %v1470_v14 = vadd.f32 %v1446_v35, %v1350_v42  ;;  %v8165_v27 = vld [vmem:[#allocation3_spill] sm:$0xff]  ;;  %v4109_v35 = vmul.f32 0.5, %v7498_v5  ;;  %5579 = vtanh.f32 %v1469_v38 }
 0x2b1   : > { %v4224_v15 = vpop.permute.xlu0 %4223  ;;  %v1348_v45 = vmul.f32 %v8165_v27, %v7490_v52 }
 0x2b2   : > { %1501 = vrot.lane.b32.xlu1 %v5566_v31, %s5674_s28  ;;  %v4251_v4 = vmul.f32 %v4224_v15, %v7640_v30  ;;  %5581 = vtanh.f32 %v1470_v14  ;;  %v7660_v21 = vadd.f32 0.5, %v4109_v35  ;;  %v7664_v15 = vadd.f32 0.5, %v4110_v46  ;;  %v8169_v35 = vld [vmem:[#allocation8_spill] sm:$0xff] }
 0x2b3   : > { %v4226_v40 = vpop.permute.xlu1 %4225 }
 0x2b4   : > { %1495 = vrot.lane.b32.xlu0 %v5568_v11, %s5674_s28  ;;  %v4252_v36 = vmul.f32 %v4226_v40, %v7644_v26  ;;  %v5574_v11 = vpop.eup %5573 }
 0x2b5   : > { %v1440_v22 = vpop.permute.xlu0 %1439 }
 0x2b6   : > { %1497 = vrot.lane.b32.xlu1 %v5570_v24, %s5674_s28  ;;  %v1467_v63 = vadd.f32 %v1440_v22, %v1347_v2  ;;  %v5576_v56 = vpop.eup %5575 }
 0x2b7   : > { %v1442_v10 = vpop.permute.xlu1 %1441 }
 0x2b8   : > { %1575 = vrot.lane.b32.xlu0 %v1469_v38, %s5675_s7  ;;  %v1468_v31 = vadd.f32 %v1442_v10, %v1348_v45  ;;  %v5578_v13 = vpop.eup %5577  ;;  %5583 = vtanh.f32 %v1467_v63  ;;  %v8168_v45 = vld [vmem:[#allocation5_spill] sm:$0xff] }
 0x2b9   : > { %v4228_v39 = vpop.permute.xlu0 %4227 }
 0x2ba   : > { %1577 = vrot.lane.b32.xlu1 %v1470_v14, %s5675_s7  ;;  %v4253_v5 = vmul.f32 %v4228_v39, %v7660_v21  ;;  %5585 = vtanh.f32 %v1468_v31  ;;  %v5580_v42 = vpop.eup %5579  ;;  %v8170_v39 = vld [vmem:[#allocation11_spill] sm:$0xff] }
 0x2bb   : > { %v4230_v24 = vpop.permute.xlu1 %4229 }
 0x2bc   : > { %4283 = vrot.lane.b32.xlu0 %v4251_v4, %s5674_s28  ;;  %v4254_v43 = vmul.f32 %v4230_v24, %v7664_v15  ;;  %v5582_v49 = vpop.eup %5581  ;;  %v8166_v4 = vld [vmem:[#allocation7_spill] sm:$0xff] }
 0x2bd   : > { %v2764_v22 = vmul.f32 %v8166_v4, %v7509_v1  ;;  %v8173_v4 = vld [vmem:[#allocation9_spill] sm:$0xff] }
 0x2be   : > { %4285 = vrot.lane.b32.xlu1 %v4252_v36, %s5674_s28  ;;  %v8167_v36 = vld [vmem:[#allocation4_spill] sm:$0xff] }
 0x2bf   : > { %v2765_v10 = vmul.f32 %v8167_v36, %v7512_v29 }
 0x2c0   : > { %1571 = vrot.lane.b32.xlu0 %v1467_v63, %s5675_s7  ;;  %v2762_v63 = vmul.f32 %v8168_v45, %v7515_v62 }
 0x2c2   : > { %1573 = vrot.lane.b32.xlu1 %v1468_v31, %s5675_s7  ;;  %v5584_v40 = vpop.eup %5583 }
 0x2c4   : > { %1507 = vrot.lane.b32.xlu0 %v5572_v47, %s5674_s28  ;;  %v5586_v0 = vpop.eup %5585 }
 0x2c6   : > { %1509 = vrot.lane.b32.xlu1 %v5574_v11, %s5674_s28  ;;  %v2763_v11 = vmul.f32 %v8169_v35, %v7520_v59 }
 0x2c8   : > { %1503 = vrot.lane.b32.xlu0 %v5576_v56, %s5674_s28 }
 0x2ca   : > { %1505 = vrot.lane.b32.xlu1 %v5578_v13, %s5674_s28  ;;  %v2768_v13 = vmul.f32 %v8170_v39, %v7526_v12 }
 0x2cc   : > { %4287 = vrot.lane.b32.xlu0 %v4253_v5, %s5674_s28  ;;  %v8171_v5 = vld [vmem:[#allocation15_spill] sm:$0xff] }
 0x2cd   : > { %v2851_v23 = vpop.permute.xlu0 %2850 }
 0x2ce   : > { %4289 = vrot.lane.b32.xlu1 %v4254_v43, %s5674_s28  ;;  %v2884_v27 = vadd.f32 %v2851_v23, %v2764_v22  ;;  %v2769_v43 = vmul.f32 %v8171_v5, %v7531_v18  ;;  %v2767_v22 = vmul.f32 %v8173_v4, %v7540_v3 }
 0x2cf   : > { %v2853_v38 = vpop.permute.xlu1 %2852 }
 0x2d0   : > { %1515 = vrot.lane.b32.xlu0 %v5580_v42, %s5674_s28  ;;  %v2885_v31 = vadd.f32 %v2853_v38, %v2765_v10  ;;  %5587 = vtanh.f32 %v2884_v27  ;;  %v8172_v38 = vld [vmem:[#allocation16_spill] sm:$0xff] }
 0x2d1   : > { %v2847_v14 = vpop.permute.xlu0 %2846 }
 0x2d2   : > { %1517 = vrot.lane.b32.xlu1 %v5582_v49, %s5674_s28  ;;  %v2882_v46 = vadd.f32 %v2847_v14, %v2762_v63  ;;  %5589 = vtanh.f32 %v2885_v31  ;;  %v2766_v49 = vmul.f32 %v8172_v38, %v7535_v57 }
 0x2d3   : > { %v2849_v2 = vpop.permute.xlu1 %2848 }
 0x2d4   : > { %1511 = vrot.lane.b32.xlu0 %v5584_v40, %s5674_s28  ;;  %v2883_v24 = vadd.f32 %v2849_v2, %v2763_v11  ;;  %5591 = vtanh.f32 %v2882_v46  ;;  %v8175_v11 = vld [vmem:[#allocation13_spill] sm:$0xff] }
 0x2d5   : > { %v2859_v47 = vpop.permute.xlu0 %2858 }
 0x2d6   : > { %1513 = vrot.lane.b32.xlu1 %v5586_v0, %s5674_s28  ;;  %v2888_v23 = vadd.f32 %v2859_v47, %v2768_v13  ;;  %5593 = vtanh.f32 %v2883_v24  ;;  %v8176_v13 = vld [vmem:[#allocation10_spill] sm:$0xff] }
 0x2d7   : > { %v2861_v56 = vpop.permute.xlu1 %2860 }
 0x2d8   : > { %2982 = vrot.lane.b32.xlu0 %v2884_v27, %s5675_s7  ;;  %v2889_v40 = vadd.f32 %v2861_v56, %v2769_v43  ;;  %5595 = vtanh.f32 %v2888_v23 }
 0x2d9   : > { %v2855_v42 = vpop.permute.xlu0 %2854 }
 0x2da   : > { %2984 = vrot.lane.b32.xlu1 %v2885_v31, %s5675_s7  ;;  %v2886_v0 = vadd.f32 %v2855_v42, %v2766_v49  ;;  %v5588_v36 = vpop.eup %5587  ;;  %v8174_v31 = vld [vmem:[#allocation20_spill] sm:$0xff]  ;;  %5597 = vtanh.f32 %v2889_v40  ;;  %v8177_v42 = vld [vmem:[#allocation17_spill] sm:$0xff] }
 0x2db   : > { %v2857_v14 = vpop.permute.xlu1 %2856  ;;  %v2772_v47 = vmul.f32 %v8174_v31, %v7548_v50  ;;  %v2771_v38 = vmul.f32 %v8177_v42, %v7559_v61  ;;  %v8179_v31 = vld [vmem:[#allocation19_spill] sm:$0xff] }
 0x2dc   : > { %2978 = vrot.lane.b32.xlu0 %v2882_v46, %s5675_s7  ;;  %v2887_v2 = vadd.f32 %v2857_v14, %v2767_v22  ;;  %v5590_v10 = vpop.eup %5589  ;;  %v2773_v46 = vmul.f32 %v8175_v11, %v7552_v60  ;;  %5599 = vtanh.f32 %v2886_v0 }
 0x2dd   : > { %v2867_v27 = vpop.permute.xlu0 %2866 }
 0x2de   : > { %2980 = vrot.lane.b32.xlu1 %v2883_v24, %s5675_s7  ;;  %v5592_v45 = vpop.eup %5591  ;;  %v2892_v56 = vadd.f32 %v2867_v27, %v2772_v47  ;;  %v2770_v24 = vmul.f32 %v8176_v13, %v7555_v8  ;;  %5601 = vtanh.f32 %v2887_v2  ;;  %v4186_v47 = vmul.f32 %v8179_v31, %v7572_v19 }
 0x2df   : > { %v2869_v63 = vpop.permute.xlu1 %2868 }
 0x2e0   : > { %2990 = vrot.lane.b32.xlu0 %v2888_v23, %s5675_s7  ;;  %v5594_v35 = vpop.eup %5593  ;;  %v2893_v5 = vadd.f32 %v2869_v63, %v2773_v46  ;;  %5603 = vtanh.f32 %v2892_v56 }
 0x2e1   : > { %v2863_v39 = vpop.permute.xlu0 %2862 }
 0x2e2   : > { %2992 = vrot.lane.b32.xlu1 %v2889_v40, %s5675_s7  ;;  %v2890_v23 = vadd.f32 %v2863_v39, %v2770_v24  ;;  %v5596_v40 = vpop.eup %5595  ;;  %5605 = vtanh.f32 %v2893_v5 }
 0x2e3   : > { %v2865_v43 = vpop.permute.xlu1 %2864 }
 0x2e4   : > { %2986 = vrot.lane.b32.xlu0 %v2886_v0, %s5675_s7  ;;  %v2891_v49 = vadd.f32 %v2865_v43, %v2771_v38  ;;  %v5598_v14 = vpop.eup %5597  ;;  %5607 = vtanh.f32 %v2890_v23 }
 0x2e6   : > { %2988 = vrot.lane.b32.xlu1 %v2887_v2, %s5675_s7  ;;  %v5600_v4 = vpop.eup %5599  ;;  %5609 = vtanh.f32 %v2891_v49 }
 0x2e8   : > { %2922 = vrot.lane.b32.xlu0 %v5588_v36, %s5674_s28  ;;  %v5602_v22 = vpop.eup %5601  ;;  %v8178_v36 = vld [vmem:[#allocation25_spill] sm:$0xff] }
 0x2ea   : > { %2924 = vrot.lane.b32.xlu1 %v5590_v10, %s5674_s28  ;;  %v5604_v0 = vpop.eup %5603  ;;  %v4185_v10 = vmul.f32 %v8178_v36, %v7568_v34 }
 0x2ec   : > { %2918 = vrot.lane.b32.xlu0 %v5592_v45, %s5674_s28  ;;  %v5606_v2 = vpop.eup %5605 }
 0x2ee   : > { %2920 = vrot.lane.b32.xlu1 %v5594_v35, %s5674_s28  ;;  %v5608_v45 = vpop.eup %5607 }
 0x2f0   : > { %2998 = vrot.lane.b32.xlu0 %v2892_v56, %s5675_s7  ;;  %v5610_v11 = vpop.eup %5609  ;;  %v8180_v56 = vld [vmem:[#allocation12_spill] sm:$0xff] }
 0x2f1   : > { %v4183_v39 = vmul.f32 %v8180_v56, %v7577_v54  ;;  %v8183_v56 = vld [vmem:[#allocation24_spill] sm:$0xff] }
 0x2f2   : > { %3000 = vrot.lane.b32.xlu1 %v2893_v5, %s5675_s7  ;;  %v8181_v5 = vld [vmem:[#allocation22_spill] sm:$0xff] }
 0x2f3   : > { %v4184_v43 = vmul.f32 %v8181_v5, %v7581_v25  ;;  %v8184_v5 = vld [vmem:[#allocation23_spill] sm:$0xff] }
 0x2f4   : > { %2994 = vrot.lane.b32.xlu0 %v2890_v23, %s5675_s7 }
 0x2f6   : > { %2996 = vrot.lane.b32.xlu1 %v2891_v49, %s5675_s7 }
 0x2f8   : > { %2930 = vrot.lane.b32.xlu0 %v5596_v40, %s5674_s28 }
 0x2fa   : > { %2932 = vrot.lane.b32.xlu1 %v5598_v14, %s5674_s28 }
 0x2fc   : > { %2926 = vrot.lane.b32.xlu0 %v5600_v4, %s5674_s28 }
 0x2fe   : > { %2928 = vrot.lane.b32.xlu1 %v5602_v22, %s5674_s28 }
 0x300   : > { %2938 = vrot.lane.b32.xlu0 %v5604_v0, %s5674_s28 }
 0x302   : > { %v4272_v27 = vpop.permute.xlu0 %4271  ;;  %2940 = vrot.lane.b32.xlu1 %v5606_v2, %s5674_s28 }
 0x303   : > { %v4305_v63 = vadd.f32 %v4272_v27, %v4185_v10 }
 0x304   : > { %2934 = vrot.lane.b32.xlu0 %v5608_v45, %s5674_s28  ;;  %v4274_v35 = vpop.permute.xlu1 %4273 }
 0x305   : > { %5611 = vtanh.f32 %v4305_v63  ;;  %v4306_v46 = vadd.f32 %v4274_v35, %v4186_v47  ;;  %v8182_v47 = vld [vmem:[#allocation18_spill] sm:$0xff] }
 0x306   : > { %v4268_v13 = vpop.permute.xlu0 %4267  ;;  %2936 = vrot.lane.b32.xlu1 %v5610_v11, %s5674_s28  ;;  %v4187_v35 = vmul.f32 %v8182_v47, %v7599_v44 }
 0x307   : > { %5613 = vtanh.f32 %v4306_v46  ;;  %v4303_v24 = vadd.f32 %v4268_v13, %v4183_v39  ;;  %v4188_v39 = vmul.f32 %v8183_v56, %v7603_v6 }
 0x308   : > { %4403 = vrot.lane.b32.xlu0 %v4305_v63, %s5675_s7  ;;  %v4270_v42 = vpop.permute.xlu1 %4269 }
 0x309   : > { %5615 = vtanh.f32 %v4303_v24  ;;  %v4304_v38 = vadd.f32 %v4270_v42, %v4184_v43  ;;  %v4189_v43 = vmul.f32 %v8184_v5, %v7615_v20 }
 0x30a   : > { %v1560_v23 = vpop.permute.xlu0 %1559  ;;  %4405 = vrot.lane.b32.xlu1 %v4306_v46, %s5675_s7 }
 0x30b   : > { %5617 = vtanh.f32 %v4304_v38  ;;  %1594 = vst.msk [vmem:[%s7736_s11 + $0x10] sm:$0xff] %vm1591_vm7, %v1560_v23 }
 0x30c   : > { %4399 = vrot.lane.b32.xlu0 %v4303_v24, %s5675_s7  ;;  %v1562_v49 = vpop.permute.xlu1 %1561 }
 0x30d   : > { %1595 = vst.msk [vmem:[%s7736_s11 + $0x18] sm:$0xff] %vm1591_vm7, %v1562_v49  ;;  %v4190_v49 = vmul.f32 %v7370_v28, %v7619_v16 }
 0x30e   : > { %v1556_v40 = vpop.permute.xlu0 %1555  ;;  %4401 = vrot.lane.b32.xlu1 %v4304_v38, %s5675_s7 }
 0x30f   : > { %v5612_v14 = vpop.eup %5611  ;;  %1592 = vst.msk [vmem:[%s7736_s11] sm:$0xff] %vm1591_vm7, %v1556_v40 }
 0x310   : > { %4343 = vrot.lane.b32.xlu0 %v5612_v14, %s5674_s28  ;;  %v1558_v4 = vpop.permute.xlu1 %1557 }
 0x311   : > { %v5614_v22 = vpop.eup %5613  ;;  %1593 = vst.msk [vmem:[%s7736_s11 + $0x8] sm:$0xff] %vm1591_vm7, %v1558_v4 }
 0x312   : > { %v4276_v0 = vpop.permute.xlu0 %4275  ;;  %4345 = vrot.lane.b32.xlu1 %v5614_v22, %s5674_s28 }
 0x313   : > { %v5616_v2 = vpop.eup %5615  ;;  %v7761_v46 = vadd.f32 %v4276_v0, %v4187_v35  ;;  %v4191_v35 = vmul.f32 %v7372_v53, %v7640_v30 }
 0x314   : > { %4339 = vrot.lane.b32.xlu0 %v5616_v2, %s5674_s28  ;;  %v4278_v36 = vpop.permute.xlu1 %4277 }
 0x315   : > { %v5618_v10 = vpop.eup %5617  ;;  %v7767_v24 = vadd.f32 %v4278_v36, %v4188_v39  ;;  %5619 = vtanh.f32 %v7761_v46 }
 0x316   : > { %v1568_v27 = vpop.permute.xlu0 %1567  ;;  %4341 = vrot.lane.b32.xlu1 %v5618_v10, %s5674_s28 }
 0x317   : > { %1598 = vst.msk [vmem:[%s7736_s11 + $0x30] sm:$0xff] %vm1591_vm7, %v1568_v27  ;;  %5621 = vtanh.f32 %v7767_v24 }
 0x318   : > { %v1570_v45 = vpop.permute.xlu1 %1569 }
 0x319   : > { %1599 = vst.msk [vmem:[%s7736_s11 + $0x38] sm:$0xff] %vm1591_vm7, %v1570_v45 }
 0x31a   : > { %v4280_v63 = vpop.permute.xlu0 %4279 }
 0x31b   : > { %v7773_v23 = vadd.f32 %v4280_v63, %v4189_v43 }
 0x31c   : > { %v4282_v31 = vpop.permute.xlu1 %4281 }
 0x31d   : > { %v7779_v22 = vadd.f32 %v4282_v31, %v4190_v49  ;;  %5623 = vtanh.f32 %v7773_v23 }
 0x31e   : > { %v1564_v11 = vpop.permute.xlu0 %1563 }
 0x31f   : > { %1596 = vst.msk [vmem:[%s7736_s11 + $0x20] sm:$0xff] %vm1591_vm7, %v1564_v11  ;;  %5625 = vtanh.f32 %v7779_v22  ;;  %v5620_v45 = vpop.eup %5619 }
 0x320   : > { %v1566_v13 = vpop.permute.xlu1 %1565 }
 0x321   : > { %1597 = vst.msk [vmem:[%s7736_s11 + $0x28] sm:$0xff] %vm1591_vm7, %v1566_v13  ;;  %v8185_v13 = vld [vmem:[#allocation21_spill] sm:$0xff] }
 0x322   : > { %v1500_v42 = vpop.permute.xlu0 %1499  ;;  %v4192_v5 = vmul.f32 %v8185_v13, %v7644_v26 }
 0x323   : > { %v1533_v38 = vmul.f32 %v1500_v42, %v7405_v9 }
 0x324   : > { %v1502_v40 = vpop.permute.xlu1 %1501 }
 0x325   : > { %v4863_v14 = vpack.c.bf16 %v1533_v38, %v1533_v38  ;;  %v1534_v4 = vmul.f32 %v1502_v40, %v7412_v58 }
 0x326   : > { %v1496_v0 = vpop.permute.xlu0 %1495 }
 0x327   : > { %v4864_v2 = vpack.c.bf16 %v1534_v4, %v1534_v4  ;;  %v1531_v9 = vmul.f32 %v1496_v0, %v7419_v48  ;;  %1644 = vrot.lane.b32.xlu0 %v4863_v14, %s5673_s9 }
 0x328   : > { %v1498_v36 = vpop.permute.xlu1 %1497 }
 0x329   : > { %v4861_v28 = vpack.c.bf16 %v1531_v9, %v1531_v9  ;;  %v1532_v10 = vmul.f32 %v1498_v36, %v7425_v37  ;;  %1646 = vrot.lane.b32.xlu1 %v4864_v2, %s5673_s9  ;;  %v5622_v37 = vpop.eup %5621 }
 0x32a   : > { %v1576_v58 = vpop.permute.xlu0 %1575  ;;  %v5624_v47 = vpop.eup %5623 }
 0x32b   : > { %v4862_v27 = vpack.c.bf16 %v1532_v10, %v1532_v10  ;;  %1602 = vst.msk [vmem:[%s7736_s11 + $0x50] sm:$0xff] %vm1591_vm7, %v1576_v58  ;;  %1640 = vrot.lane.b32.xlu0 %v4861_v28, %s5673_s9  ;;  %v5626_v56 = vpop.eup %5625  ;;  %v8186_v10 = vld [vmem:[#allocation26_spill] sm:$0xff] }
 0x32c   : > { %v1578_v48 = vpop.permute.xlu1 %1577  ;;  %v4193_v58 = vmul.f32 %v8186_v10, %v7660_v21 }
 0x32d   : > { %1603 = vst.msk [vmem:[%s7736_s11 + $0x58] sm:$0xff] %vm1591_vm7, %v1578_v48  ;;  %1642 = vrot.lane.b32.xlu1 %v4862_v27, %s5673_s9  ;;  %v8187_v48 = vld [vmem:[#allocation27_spill] sm:$0xff] }
 0x32e   : > { %v4284_v63 = vpop.permute.xlu0 %4283 }
 0x32f   : > { %4347 = vrot.lane.b32.xlu0 %v5620_v45, %s5674_s28  ;;  %v7800_v39 = vadd.f32 %v4284_v63, %v4191_v35  ;;  %v4194_v45 = vmul.f32 %v8187_v48, %v7664_v15 }
 0x330   : > { %v4286_v31 = vpop.permute.xlu1 %4285 }
 0x331   : > { %4349 = vrot.lane.b32.xlu1 %v5622_v37, %s5674_s28  ;;  %v7807_v42 = vadd.f32 %v4286_v31, %v4192_v5  ;;  %5627 = vtanh.f32 %v7800_v39 }
 0x332   : > { %v1572_v11 = vpop.permute.xlu0 %1571 }
 0x333   : > { %1600 = vst.msk [vmem:[%s7736_s11 + $0x40] sm:$0xff] %vm1591_vm7, %v1572_v11  ;;  %4351 = vrot.lane.b32.xlu0 %v5624_v47, %s5674_s28  ;;  %5629 = vtanh.f32 %v7807_v42 }
 0x334   : > { %v1574_v43 = vpop.permute.xlu1 %1573 }
 0x335   : > { %1601 = vst.msk [vmem:[%s7736_s11 + $0x48] sm:$0xff] %vm1591_vm7, %v1574_v43  ;;  %4353 = vrot.lane.b32.xlu1 %v5626_v56, %s5674_s28 }
 0x336   : > { %v1508_v38 = vpop.permute.xlu0 %1507 }
 0x337   : > { %v1537_v53 = vmul.f32 %v1508_v38, %v7438_v41 }
 0x338   : > { %v1510_v49 = vpop.permute.xlu1 %1509 }
 0x339   : > { %v4867_v40 = vpack.c.bf16 %v1537_v53, %v1537_v53  ;;  %v1538_v14 = vmul.f32 %v1510_v49, %v7444_v17 }
 0x33a   : > { %v1504_v4 = vpop.permute.xlu0 %1503 }
 0x33b   : > { %v4868_v0 = vpack.c.bf16 %v1538_v14, %v1538_v14  ;;  %v1535_v2 = vmul.f32 %v1504_v4, %v7456_v32  ;;  %1652 = vrot.lane.b32.xlu0 %v4867_v40, %s5673_s9  ;;  %v5628_v63 = vpop.eup %5627 }
 0x33c   : > { %v1506_v9 = vpop.permute.xlu1 %1505 }
 0x33d   : > { %v4865_v36 = vpack.c.bf16 %v1535_v2, %v1535_v2  ;;  %v1536_v28 = vmul.f32 %v1506_v9, %v7463_v7  ;;  %1654 = vrot.lane.b32.xlu1 %v4868_v0, %s5673_s9  ;;  %v5630_v47 = vpop.eup %5629 }
 0x33e   : > { %v4288_v41 = vpop.permute.xlu0 %4287 }
 0x33f   : > { %v4866_v27 = vpack.c.bf16 %v1536_v28, %v1536_v28  ;;  %1648 = vrot.lane.b32.xlu0 %v4865_v36, %s5673_s9  ;;  %v4313_v17 = vadd.f32 %v4288_v41, %v4193_v58 }
 0x340   : > { %v4290_v32 = vpop.permute.xlu1 %4289 }
 0x341   : > { %1650 = vrot.lane.b32.xlu1 %v4866_v27, %s5673_s9  ;;  %v4314_v37 = vadd.f32 %v4290_v32, %v4194_v45  ;;  %5631 = vtanh.f32 %v4313_v17 }
 0x342   : > { %v1516_v31 = vpop.permute.xlu0 %1515 }
 0x343   : > { %v1541_v7 = vmul.f32 %v1516_v31, %v7469_v55  ;;  %4355 = vrot.lane.b32.xlu0 %v5628_v63, %s5674_s28  ;;  %5633 = vtanh.f32 %v4314_v37 }
 0x344   : > { %v1518_v35 = vpop.permute.xlu1 %1517 }
 0x345   : > { %v4871_v11 = vpack.c.bf16 %v1541_v7, %v1541_v7  ;;  %v1542_v56 = vmul.f32 %v1518_v35, %v7473_v33  ;;  %4357 = vrot.lane.b32.xlu1 %v5630_v47, %s5674_s28 }
 0x346   : > { %v1512_v13 = vpop.permute.xlu0 %1511 }
 0x347   : > { %v4872_v5 = vpack.c.bf16 %v1542_v56, %v1542_v56  ;;  %v1539_v43 = vmul.f32 %v1512_v13, %v7484_v51  ;;  %1660 = vrot.lane.b32.xlu0 %v4871_v11, %s5673_s9 }
 0x348   : > { %v1514_v55 = vpop.permute.xlu1 %1513 }
 0x349   : > { %v4869_v38 = vpack.c.bf16 %v1539_v43, %v1539_v43  ;;  %v1540_v53 = vmul.f32 %v1514_v55, %v7490_v52  ;;  %1662 = vrot.lane.b32.xlu1 %v4872_v5, %s5673_s9 }
 0x34a   : > { %v2983_v49 = vpop.permute.xlu0 %2982 }
 0x34b   : > { %v4870_v33 = vpack.c.bf16 %v1540_v53, %v1540_v53  ;;  %3016 = vst.msk [vmem:[%s7736_s11 + $0x70] sm:$0xff] %vm1591_vm7, %v2983_v49  ;;  %1656 = vrot.lane.b32.xlu0 %v4869_v38, %s5673_s9  ;;  %v5632_v51 = vpop.eup %5631 }
 0x34c   : > { %v2985_v40 = vpop.permute.xlu1 %2984 }
 0x34d   : > { %3017 = vst.msk [vmem:[%s7736_s11 + $0x78] sm:$0xff] %vm1591_vm7, %v2985_v40  ;;  %1658 = vrot.lane.b32.xlu1 %v4870_v33, %s5673_s9  ;;  %v5634_v52 = vpop.eup %5633 }
 0x34e   : > { %v2979_v14 = vpop.permute.xlu0 %2978 }
 0x34f   : > { %3014 = vst.msk [vmem:[%s7736_s11 + $0x60] sm:$0xff] %vm1591_vm7, %v2979_v14  ;;  %4359 = vrot.lane.b32.xlu0 %v5632_v51, %s5674_s28 }
 0x350   : > { %v2981_v4 = vpop.permute.xlu1 %2980 }
 0x351   : > { %3015 = vst.msk [vmem:[%s7736_s11 + $0x68] sm:$0xff] %vm1591_vm7, %v2981_v4  ;;  %4361 = vrot.lane.b32.xlu1 %v5634_v52, %s5674_s28 }
 0x352   : > { %v2991_v0 = vpop.permute.xlu0 %2990 }
 0x353   : > { %3020 = vst.msk [vmem:[%s7736_s11 + $0x90] sm:$0xff] %vm1591_vm7, %v2991_v0  ;;  %4407 = vrot.lane.b32.xlu0 %v7761_v46, %s5675_s7 }
 0x354   : > { %v2993_v2 = vpop.permute.xlu1 %2992 }
 0x355   : > { %3021 = vst.msk [vmem:[%s7736_s11 + $0x98] sm:$0xff] %vm1591_vm7, %v2993_v2  ;;  %4409 = vrot.lane.b32.xlu1 %v7767_v24, %s5675_s7 }
 0x356   : > { %v2987_v9 = vpop.permute.xlu0 %2986 }
 0x357   : > { %3018 = vst.msk [vmem:[%s7736_s11 + $0x80] sm:$0xff] %vm1591_vm7, %v2987_v9  ;;  %4411 = vrot.lane.b32.xlu0 %v7773_v23, %s5675_s7 }
 0x358   : > { %v2989_v36 = vpop.permute.xlu1 %2988 }
 0x359   : > { %3019 = vst.msk [vmem:[%s7736_s11 + $0x88] sm:$0xff] %vm1591_vm7, %v2989_v36  ;;  %4413 = vrot.lane.b32.xlu1 %v7779_v22, %s5675_s7 }
 0x35a   : > { %v2923_v46 = vpop.permute.xlu0 %2922 }
 0x35b   : > { %4415 = vrot.lane.b32.xlu0 %v7800_v39, %s5675_s7  ;;  %v2956_v24 = vmul.f32 %v2923_v46, %v7509_v1 }
 0x35c   : > { %v2925_v28 = vpop.permute.xlu1 %2924 }
 0x35d   : > { %4417 = vrot.lane.b32.xlu1 %v7807_v42, %s5675_s7  ;;  %v2957_v23 = vmul.f32 %v2925_v28, %v7512_v29  ;;  %v4875_v22 = vpack.c.bf16 %v2956_v24, %v2956_v24 }
 0x35e   : > { %v2919_v41 = vpop.permute.xlu0 %2918 }
 0x35f   : > { %4419 = vrot.lane.b32.xlu0 %v4313_v17, %s5675_s7  ;;  %v2954_v58 = vmul.f32 %v2919_v41, %v7515_v62  ;;  %v4876_v27 = vpack.c.bf16 %v2957_v23, %v2957_v23 }
 0x360   : > { %v2921_v10 = vpop.permute.xlu1 %2920 }
 0x361   : > { %4421 = vrot.lane.b32.xlu1 %v4314_v37, %s5675_s7  ;;  %v2955_v1 = vmul.f32 %v2921_v10, %v7520_v59  ;;  %v4873_v29 = vpack.c.bf16 %v2954_v58, %v2954_v58 }
 0x362   : > { %v2999_v39 = vpop.permute.xlu0 %2998 }
 0x363   : > { %3024 = vst.msk [vmem:[%s7736_s11 + $0xb0] sm:$0xff] %vm1591_vm7, %v2999_v39  ;;  %3066 = vrot.lane.b32.xlu0 %v4875_v22, %s5673_s9  ;;  %v4874_v48 = vpack.c.bf16 %v2955_v1, %v2955_v1 }
 0x364   : > { %v3001_v42 = vpop.permute.xlu1 %3000 }
 0x365   : > { %3025 = vst.msk [vmem:[%s7736_s11 + $0xb8] sm:$0xff] %vm1591_vm7, %v3001_v42  ;;  %3068 = vrot.lane.b32.xlu1 %v4876_v27, %s5673_s9 }
 0x366   : > { %v2995_v17 = vpop.permute.xlu0 %2994 }
 0x367   : > { %3022 = vst.msk [vmem:[%s7736_s11 + $0xa0] sm:$0xff] %vm1591_vm7, %v2995_v17  ;;  %3062 = vrot.lane.b32.xlu0 %v4873_v29, %s5673_s9 }
 0x368   : > { %v2997_v62 = vpop.permute.xlu1 %2996 }
 0x369   : > { %3023 = vst.msk [vmem:[%s7736_s11 + $0xa8] sm:$0xff] %vm1591_vm7, %v2997_v62  ;;  %3064 = vrot.lane.b32.xlu1 %v4874_v48, %s5673_s9 }
 0x36a   : > { %v2931_v59 = vpop.permute.xlu0 %2930 }
 0x36b   : > { %v2960_v45 = vmul.f32 %v2931_v59, %v7526_v12 }
 0x36c   : > { %v2933_v32 = vpop.permute.xlu1 %2932 }
 0x36d   : > { %v4879_v63 = vpack.c.bf16 %v2960_v45, %v2960_v45  ;;  %v2961_v37 = vmul.f32 %v2933_v32, %v7531_v18 }
 0x36e   : > { %v2927_v31 = vpop.permute.xlu0 %2926 }
 0x36f   : > { %v4880_v7 = vpack.c.bf16 %v2961_v37, %v2961_v37  ;;  %v2958_v47 = vmul.f32 %v2927_v31, %v7535_v57  ;;  %3074 = vrot.lane.b32.xlu0 %v4879_v63, %s5673_s9 }
 0x370   : > { %v2929_v35 = vpop.permute.xlu1 %2928 }
 0x371   : > { %v4877_v11 = vpack.c.bf16 %v2958_v47, %v2958_v47  ;;  %v2959_v56 = vmul.f32 %v2929_v35, %v7540_v3  ;;  %3076 = vrot.lane.b32.xlu1 %v4880_v7, %s5673_s9 }
 0x372   : > { %v2939_v13 = vpop.permute.xlu0 %2938 }
 0x373   : > { %v4878_v5 = vpack.c.bf16 %v2959_v56, %v2959_v56  ;;  %v2964_v12 = vmul.f32 %v2939_v13, %v7548_v50  ;;  %3070 = vrot.lane.b32.xlu0 %v4877_v11, %s5673_s9 }
 0x374   : > { %v2941_v18 = vpop.permute.xlu1 %2940 }
 0x375   : > { %v4883_v43 = vpack.c.bf16 %v2964_v12, %v2964_v12  ;;  %v2965_v57 = vmul.f32 %v2941_v18, %v7552_v60  ;;  %3072 = vrot.lane.b32.xlu1 %v4878_v5, %s5673_s9 }
 0x376   : > { %v2935_v55 = vpop.permute.xlu0 %2934 }
 0x377   : > { %v4884_v38 = vpack.c.bf16 %v2965_v57, %v2965_v57  ;;  %v2962_v3 = vmul.f32 %v2935_v55, %v7555_v8  ;;  %3082 = vrot.lane.b32.xlu0 %v4883_v43, %s5673_s9 }
 0x378   : > { %v2937_v53 = vpop.permute.xlu1 %2936 }
 0x379   : > { %v4881_v50 = vpack.c.bf16 %v2962_v3, %v2962_v3  ;;  %v2963_v49 = vmul.f32 %v2937_v53, %v7559_v61  ;;  %3084 = vrot.lane.b32.xlu1 %v4884_v38, %s5673_s9 }
 0x37a   : > { %v4404_v33 = vpop.permute.xlu0 %4403 }
 0x37b   : > { %v4882_v40 = vpack.c.bf16 %v2963_v49, %v2963_v49  ;;  %4437 = vst.msk [vmem:[%s7736_s11 + $0xd0] sm:$0xff] %vm1591_vm7, %v4404_v33  ;;  %3078 = vrot.lane.b32.xlu0 %v4881_v50, %s5673_s9 }
 0x37c   : > { %v4406_v60 = vpop.permute.xlu1 %4405 }
 0x37d   : > { %4438 = vst.msk [vmem:[%s7736_s11 + $0xd8] sm:$0xff] %vm1591_vm7, %v4406_v60  ;;  %3080 = vrot.lane.b32.xlu1 %v4882_v40, %s5673_s9 }
 0x37e   : > { %v4400_v8 = vpop.permute.xlu0 %4399 }
 0x37f   : > { %4435 = vst.msk [vmem:[%s7736_s11 + $0xc0] sm:$0xff] %vm1591_vm7, %v4400_v8 }
 0x380   : > { %v4402_v51 = vpop.permute.xlu1 %4401 }
 0x381   : > { %4436 = vst.msk [vmem:[%s7736_s11 + $0xc8] sm:$0xff] %vm1591_vm7, %v4402_v51 }
 0x382   : > { %v4344_v61 = vpop.permute.xlu0 %4343 }
 0x383   : > { %v4377_v14 = vmul.f32 %v4344_v61, %v7568_v34 }
 0x384   : > { %v4346_v52 = vpop.permute.xlu1 %4345 }
 0x385   : > { %v4887_v4 = vpack.c.bf16 %v4377_v14, %v4377_v14  ;;  %v4378_v0 = vmul.f32 %v4346_v52, %v7572_v19 }
 0x386   : > { %v4340_v2 = vpop.permute.xlu0 %4339 }
 0x387   : > { %v4888_v9 = vpack.c.bf16 %v4378_v0, %v4378_v0  ;;  %v4375_v36 = vmul.f32 %v4340_v2, %v7577_v54  ;;  %4487 = vrot.lane.b32.xlu0 %v4887_v4, %s5673_s9 }
 0x388   : > { %v4342_v46 = vpop.permute.xlu1 %4341 }
 0x389   : > { %v4885_v28 = vpack.c.bf16 %v4375_v36, %v4375_v36  ;;  %v4376_v24 = vmul.f32 %v4342_v46, %v7581_v25  ;;  %4489 = vrot.lane.b32.xlu1 %v4888_v9, %s5673_s9 }
 0x38b   : > { %v4886_v41 = vpack.c.bf16 %v4376_v24, %v4376_v24  ;;  %4483 = vrot.lane.b32.xlu0 %v4885_v28, %s5673_s9 }
 0x38d   : > { %4485 = vrot.lane.b32.xlu1 %v4886_v41, %s5673_s9 }
 0x399   : > { %v1645_v34 = vpop.permute.xlu0 %1644 }
 0x39a   : > { %1679 = vst.msk [vmem:[%s7917_s13 + $0x8] sm:$0xf] %vm1676_vm8, %v1645_v34 }
 0x39b   : > { %v1647_v19 = vpop.permute.xlu1 %1646 }
 0x39c   : > { %1680 = vst.msk [vmem:[%s7917_s13 + $0xc] sm:$0xf] %vm1676_vm8, %v1647_v19 }
 0x39d   : > { %v1641_v54 = vpop.permute.xlu0 %1640 }
 0x39e   : > { %1677 = vst.msk [vmem:[%s7917_s13] sm:$0xf] %vm1676_vm8, %v1641_v54 }
 0x39f   : > { %v1643_v25 = vpop.permute.xlu1 %1642 }
 0x3a0   : > { %1678 = vst.msk [vmem:[%s7917_s13 + $0x4] sm:$0xf] %vm1676_vm8, %v1643_v25 }
 0x3a1   : > { %v4348_v23 = vpop.permute.xlu0 %4347 }
 0x3a2   : > { %v4379_v10 = vmul.f32 %v4348_v23, %v7599_v44 }
 0x3a3   : > { %v4350_v22 = vpop.permute.xlu1 %4349 }
 0x3a4   : > { %v4889_v58 = vpack.c.bf16 %v4379_v10, %v4379_v10  ;;  %v4380_v39 = vmul.f32 %v4350_v22, %v7603_v6 }
 0x3a5   : > { %v4352_v27 = vpop.permute.xlu0 %4351 }
 0x3a6   : > { %v4890_v1 = vpack.c.bf16 %v4380_v39, %v4380_v39  ;;  %v4381_v42 = vmul.f32 %v4352_v27, %v7615_v20  ;;  %4491 = vrot.lane.b32.xlu0 %v4889_v58, %s5673_s9 }
 0x3a7   : > { %v4354_v29 = vpop.permute.xlu1 %4353 }
 0x3a8   : > { %v4891_v17 = vpack.c.bf16 %v4381_v42, %v4381_v42  ;;  %v4382_v48 = vmul.f32 %v4354_v29, %v7619_v16  ;;  %4493 = vrot.lane.b32.xlu1 %v4890_v1, %s5673_s9 }
 0x3aa   : > { %v4892_v44 = vpack.c.bf16 %v4382_v48, %v4382_v48  ;;  %4495 = vrot.lane.b32.xlu0 %v4891_v17, %s5673_s9 }
 0x3ac   : > { %4497 = vrot.lane.b32.xlu1 %v4892_v44, %s5673_s9 }
 0x3ad   : > { %v1653_v6 = vpop.permute.xlu0 %1652 }
 0x3ae   : > { %1683 = vst.msk [vmem:[%s7917_s13 + $0x18] sm:$0xf] %vm1676_vm8, %v1653_v6 }
 0x3af   : > { %v1655_v62 = vpop.permute.xlu1 %1654 }
 0x3b0   : > { %1684 = vst.msk [vmem:[%s7917_s13 + $0x1c] sm:$0xf] %vm1676_vm8, %v1655_v62 }
 0x3b1   : > { %v1649_v20 = vpop.permute.xlu0 %1648 }
 0x3b2   : > { %1681 = vst.msk [vmem:[%s7917_s13 + $0x10] sm:$0xf] %vm1676_vm8, %v1649_v20 }
 0x3b3   : > { %v1651_v16 = vpop.permute.xlu1 %1650 }
 0x3b4   : > { %1682 = vst.msk [vmem:[%s7917_s13 + $0x14] sm:$0xf] %vm1676_vm8, %v1651_v16 }
 0x3b5   : > { %v4356_v59 = vpop.permute.xlu0 %4355 }
 0x3b6   : > { %v4383_v45 = vmul.f32 %v4356_v59, %v7640_v30 }
 0x3b7   : > { %v4358_v32 = vpop.permute.xlu1 %4357 }
 0x3b8   : > { %v4893_v63 = vpack.c.bf16 %v4383_v45, %v4383_v45  ;;  %v4384_v37 = vmul.f32 %v4358_v32, %v7644_v26 }
 0x3b9   : > { %v1661_v31 = vpop.permute.xlu0 %1660 }
 0x3ba   : > { %v4894_v7 = vpack.c.bf16 %v4384_v37, %v4384_v37  ;;  %1687 = vst.msk [vmem:[%s7917_s13 + $0x28] sm:$0xf] %vm1676_vm8, %v1661_v31  ;;  %4499 = vrot.lane.b32.xlu0 %v4893_v63, %s5673_s9 }
 0x3bb   : > { %v1663_v47 = vpop.permute.xlu1 %1662 }
 0x3bc   : > { %1688 = vst.msk [vmem:[%s7917_s13 + $0x2c] sm:$0xf] %vm1676_vm8, %v1663_v47  ;;  %4501 = vrot.lane.b32.xlu1 %v4894_v7, %s5673_s9 }
 0x3bd   : > { %v1657_v35 = vpop.permute.xlu0 %1656 }
 0x3be   : > { %1685 = vst.msk [vmem:[%s7917_s13 + $0x20] sm:$0xf] %vm1676_vm8, %v1657_v35 }
 0x3bf   : > { %v1659_v30 = vpop.permute.xlu1 %1658 }
 0x3c0   : > { %1686 = vst.msk [vmem:[%s7917_s13 + $0x24] sm:$0xf] %vm1676_vm8, %v1659_v30 }
 0x3c1   : > { %v4360_v26 = vpop.permute.xlu0 %4359 }
 0x3c2   : > { %v4385_v11 = vmul.f32 %v4360_v26, %v7660_v21 }
 0x3c3   : > { %v4362_v56 = vpop.permute.xlu1 %4361 }
 0x3c4   : > { %v4895_v13 = vpack.c.bf16 %v4385_v11, %v4385_v11  ;;  %v4386_v5 = vmul.f32 %v4362_v56, %v7664_v15 }
 0x3c5   : > { %v4408_v12 = vpop.permute.xlu0 %4407 }
 0x3c6   : > { %v4896_v18 = vpack.c.bf16 %v4386_v5, %v4386_v5  ;;  %4439 = vst.msk [vmem:[%s7736_s11 + $0xe0] sm:$0xff] %vm1591_vm7, %v4408_v12  ;;  %4503 = vrot.lane.b32.xlu0 %v4895_v13, %s5673_s9 }
 0x3c7   : > { %v4410_v43 = vpop.permute.xlu1 %4409 }
 0x3c8   : > { %4440 = vst.msk [vmem:[%s7736_s11 + $0xe8] sm:$0xff] %vm1591_vm7, %v4410_v43  ;;  %4505 = vrot.lane.b32.xlu1 %v4896_v18, %s5673_s9 }
 0x3c9   : > { %v4412_v21 = vpop.permute.xlu0 %4411 }
 0x3ca   : > { %4441 = vst.msk [vmem:[%s7736_s11 + $0xf0] sm:$0xff] %vm1591_vm7, %v4412_v21 }
 0x3cb   : > { %v4414_v15 = vpop.permute.xlu1 %4413 }
 0x3cc   : > { %4442 = vst.msk [vmem:[%s7736_s11 + $0xf8] sm:$0xff] %vm1591_vm7, %v4414_v15 }
 0x3cd   : > { %v4416_v57 = vpop.permute.xlu0 %4415 }
 0x3ce   : > { %4443 = vst.msk [vmem:[%s7736_s11 + $0x100] sm:$0xff] %vm1591_vm7, %v4416_v57 }
 0x3cf   : > { %v4418_v55 = vpop.permute.xlu1 %4417 }
 0x3d0   : > { %4444 = vst.msk [vmem:[%s7736_s11 + $0x108] sm:$0xff] %vm1591_vm7, %v4418_v55 }
 0x3d1   : > { %v4420_v38 = vpop.permute.xlu0 %4419 }
 0x3d2   : > { %4445 = vst.msk [vmem:[%s7736_s11 + $0x110] sm:$0xff] %vm1591_vm7, %v4420_v38 }
 0x3d3   : > { %v4422_v3 = vpop.permute.xlu1 %4421 }
 0x3d4   : > { %4446 = vst.msk [vmem:[%s7736_s11 + $0x118] sm:$0xff] %vm1591_vm7, %v4422_v3 }
 0x3d5   : > { %v3067_v53 = vpop.permute.xlu0 %3066 }
 0x3d6   : > { %3100 = vst.msk [vmem:[%s7917_s13 + $0x38] sm:$0xf] %vm1676_vm8, %v3067_v53 }
 0x3d7   : > { %v3069_v50 = vpop.permute.xlu1 %3068 }
 0x3d8   : > { %3101 = vst.msk [vmem:[%s7917_s13 + $0x3c] sm:$0xf] %vm1676_vm8, %v3069_v50 }
 0x3d9   : > { %v3063_v49 = vpop.permute.xlu0 %3062 }
 0x3da   : > { %3098 = vst.msk [vmem:[%s7917_s13 + $0x30] sm:$0xf] %vm1676_vm8, %v3063_v49 }
 0x3db   : > { %v3065_v33 = vpop.permute.xlu1 %3064 }
 0x3dc   : > { %3099 = vst.msk [vmem:[%s7917_s13 + $0x34] sm:$0xf] %vm1676_vm8, %v3065_v33 }
 0x3e1   : > { %v3075_v40 = vpop.permute.xlu0 %3074 }
 0x3e2   : > { %3104 = vst.msk [vmem:[%s7917_s13 + $0x48] sm:$0xf] %vm1676_vm8, %v3075_v40 }
 0x3e3   : > { %v3077_v60 = vpop.permute.xlu1 %3076 }
 0x3e4   : > { %3105 = vst.msk [vmem:[%s7917_s13 + $0x4c] sm:$0xf] %vm1676_vm8, %v3077_v60 }
 0x3e5   : > { %v3071_v8 = vpop.permute.xlu0 %3070 }
 0x3e6   : > { %3102 = vst.msk [vmem:[%s7917_s13 + $0x40] sm:$0xf] %vm1676_vm8, %v3071_v8 }
 0x3e7   : > { %v3073_v51 = vpop.permute.xlu1 %3072 }
 0x3e8   : > { %3103 = vst.msk [vmem:[%s7917_s13 + $0x44] sm:$0xf] %vm1676_vm8, %v3073_v51 }
 0x3e9   : > { %v3083_v61 = vpop.permute.xlu0 %3082 }
 0x3ea   : > { %3108 = vst.msk [vmem:[%s7917_s13 + $0x58] sm:$0xf] %vm1676_vm8, %v3083_v61 }
 0x3eb   : > { %v3085_v14 = vpop.permute.xlu1 %3084 }
 0x3ec   : > { %3109 = vst.msk [vmem:[%s7917_s13 + $0x5c] sm:$0xf] %vm1676_vm8, %v3085_v14 }
 0x3ed   : > { %v3079_v52 = vpop.permute.xlu0 %3078 }
 0x3ee   : > { %3106 = vst.msk [vmem:[%s7917_s13 + $0x50] sm:$0xf] %vm1676_vm8, %v3079_v52 }
 0x3ef   : > { %v3081_v4 = vpop.permute.xlu1 %3080 }
 0x3f0   : > { %3107 = vst.msk [vmem:[%s7917_s13 + $0x54] sm:$0xf] %vm1676_vm8, %v3081_v4 }
 0x3f9   : > { %v4488_v0 = vpop.permute.xlu0 %4487 }
 0x3fa   : > { %4521 = vst.msk [vmem:[%s7917_s13 + $0x68] sm:$0xf] %vm1676_vm8, %v4488_v0 }
 0x3fb   : > { %v4490_v2 = vpop.permute.xlu1 %4489 }
 0x3fc   : > { %4522 = vst.msk [vmem:[%s7917_s13 + $0x6c] sm:$0xf] %vm1676_vm8, %v4490_v2 }
 0x3fd   : > { %v4484_v9 = vpop.permute.xlu0 %4483 }
 0x3fe   : > { %4519 = vst.msk [vmem:[%s7917_s13 + $0x60] sm:$0xf] %vm1676_vm8, %v4484_v9 }
 0x3ff   : > { %v4486_v36 = vpop.permute.xlu1 %4485 }
 0x400   : > { %4520 = vst.msk [vmem:[%s7917_s13 + $0x64] sm:$0xf] %vm1676_vm8, %v4486_v36 }
 0x418   : > { %v4492_v46 = vpop.permute.xlu0 %4491 }
 0x419   : > { %4523 = vst.msk [vmem:[%s7917_s13 + $0x70] sm:$0xf] %vm1676_vm8, %v4492_v46 }
 0x41a   : > { %v4494_v28 = vpop.permute.xlu1 %4493 }
 0x41b   : > { %4524 = vst.msk [vmem:[%s7917_s13 + $0x74] sm:$0xf] %vm1676_vm8, %v4494_v28 }
 0x41c   : > { %v4496_v24 = vpop.permute.xlu0 %4495 }
 0x41d   : > { %4525 = vst.msk [vmem:[%s7917_s13 + $0x78] sm:$0xf] %vm1676_vm8, %v4496_v24 }
 0x41e   : > { %v4498_v41 = vpop.permute.xlu1 %4497 }
 0x41f   : > { %4526 = vst.msk [vmem:[%s7917_s13 + $0x7c] sm:$0xf] %vm1676_vm8, %v4498_v41 }
 0x42c   : > { %v4500_v34 = vpop.permute.xlu0 %4499 }
 0x42d   : > { %4527 = vst.msk [vmem:[%s7917_s13 + $0x80] sm:$0xf] %vm1676_vm8, %v4500_v34 }
 0x42e   : > { %v4502_v19 = vpop.permute.xlu1 %4501 }
 0x42f   : > { %4528 = vst.msk [vmem:[%s7917_s13 + $0x84] sm:$0xf] %vm1676_vm8, %v4502_v19 }
 0x438   : > { %v4504_v54 = vpop.permute.xlu0 %4503 }
 0x439   : > { %4529 = vst.msk [vmem:[%s7917_s13 + $0x88] sm:$0xf] %vm1676_vm8, %v4504_v54 }
 0x43a   : > { %v4506_v25 = vpop.permute.xlu1 %4505 }
 0x43b   : > { %4530 = vst.msk [vmem:[%s7917_s13 + $0x8c] sm:$0xf] %vm1676_vm8, %v4506_v25 }
 0x43c PF: > { %s16_s18 = sadd.s32 1, %s5671_s18  }
 0x43d   : > { %p13_p4 = scmp.ge.s32.totalorder %s16_s18, 4  }
 0x43f   :  { %15 = sbr.rel (!%p13_p4) target bundleno = 1 (0x1), region = 81 }

</bundles_post_ra>
